<compile_context>
chip_gen: v7x
topology: tpu7x:2x2x1
jax: 0.10.0
libtpu: 0.0.40
codegen_flags: <defaults>
</compile_context>

<pallas_src>
import functools

import jax
import jax.numpy as jnp
from jax import lax
from jax.experimental import pallas as pl
from jax.experimental.pallas import tpu as pltpu


# -----------------------------------------------------------------------------
# Padding helpers (all zero padding; numerically inert for the LSTM recurrence)
# -----------------------------------------------------------------------------
def _round_up(x, m):
    return (x + m - 1) // m * m


def _pad_axis(x, axis, new_size):
    if x.shape[axis] == new_size:
        return x
    pad = [(0, 0)] * x.ndim
    pad[axis] = (0, new_size - x.shape[axis])
    return jnp.pad(x, pad)


def _pad_gate_cols(w, H, H_p):
    """Pad each PyTorch-order gate block [i|f|g|o] (size H) along the last axis to H_p."""
    if H == H_p:
        return w
    parts = [_pad_axis(w[..., k * H:(k + 1) * H], -1, H_p) for k in range(4)]
    return jnp.concatenate(parts, axis=-1)


# -----------------------------------------------------------------------------
# Pallas kernel: one grid step == one chunk of T LSTM time steps
# -----------------------------------------------------------------------------
def _lstm_chunk_kernel(gx_ref,     # (T*B, 4H) f32  gathered gates = x@W_ih + b, this chunk
                       w_hh_ref,   # (H, 4H)   bf16
                       h0_ref,     # (B, H)    f32
                       c0_ref,     # (B, H)    f32
                       wp_ref,     # (H, V)    bf16  output projection (transposed)
                       bp_ref,     # (1, V)    f32
                       scores_ref, # (T*B, V)  f32   out
                       hN_ref,     # (B, H)    f32   out + VMEM-resident recurrent h state
                       cN_ref,     # (B, H)    f32   out + VMEM-resident recurrent c state
                       *, T, B, H, L):
    g = pl.program_id(0)

    @pl.when(g == 0)
    def _():
        hN_ref[...] = h0_ref[...]
        cN_ref[...] = c0_ref[...]

    # Grid-invariant weights: load once per chunk; hoist the bias broadcast out of the loop.
    w_hh = w_hh_ref[...]                                              # bf16
    w_p = wp_ref[...]                                                 # bf16
    b_out = jnp.broadcast_to(bp_ref[...], (B, bp_ref.shape[1]))      # f32 (B, V)

    h = hN_ref[...]                      # f32 recurrent state
    c = cN_ref[...]
    h_b = h.astype(jnp.bfloat16)         # bf16 copy for MXU operands
    needs_mask = (L % T) != 0            # static Python bool: padded trailing time steps?

    for t in range(T):                   # static unrolled recurrence over the chunk
        # Recurrent matmul in bf16 with f32 accumulation; input projection is precomputed.
        gates = gx_ref[t * B:(t + 1) * B, :] + jnp.dot(
            h_b, w_hh, preferred_element_type=jnp.float32)            # (B, 4H) f32
        i_g = jax.nn.sigmoid(gates[:, 0 * H:1 * H])
        f_g = jax.nn.sigmoid(gates[:, 1 * H:2 * H])
        g_g = jnp.tanh(gates[:, 2 * H:3 * H])
        o_g = jax.nn.sigmoid(gates[:, 3 * H:4 * H])
        c_new = f_g * c + i_g * g_g                                   # f32 state update
        h_new = o_g * jnp.tanh(c_new)
        if needs_mask:
            valid = (g * T + t) < L      # freeze state on padded trailing steps
            h = jnp.where(valid, h_new, h)
            c = jnp.where(valid, c_new, c)
        else:
            h, c = h_new, c_new
        h_b = h.astype(jnp.bfloat16)
        # Per-step vocab projection: free MXU filler interleaved with the next step's
        # recurrent matmul (no serial tail matmul at chunk end). Lane-dense f32 store.
        scores_ref[t * B:(t + 1) * B, :] = jnp.dot(
            h_b, w_p, preferred_element_type=jnp.float32) + b_out

    # Recurrent state carried to the next chunk; also the final-state outputs.
    hN_ref[...] = h
    cN_ref[...] = c


def char_decoder_forward_pallas(sents, dec_hidden, params, max_chunk=32):
    """Pallas implementation of CharDecoder.forward.

    sents: (length, batch) int32 character ids
    dec_hidden: (h0, c0) each of shape (1, batch, hidden)
    returns: scores (length, batch, vocab), (h_n, c_n) each (1, batch, hidden)
    """
    emb_table = params["emb"]          # (V, E)
    w_ih = params["w_ih"]              # (E, 4H)
    w_hh = params["w_hh"]              # (H, 4H)
    b = params["b"]                    # (1, 4H)  b_ih + b_hh combined
    w_proj = params["w_proj"]          # (H, V)
    b_proj = params["b_proj"]          # (1, V)

    L, B = sents.shape
    V = emb_table.shape[0]
    H = w_hh.shape[0]

    # Lane/sublane-friendly padded sizes.
    H_p = _round_up(H, 128)
    V_p = _round_up(V, 128)
    B_p = _round_up(B, 8)

    # Chunking over time (single chunk for short sequences).
    T = min(L, max_chunk)
    G = -(-L // T)           # ceil
    L_p = G * T
    TB = T * B_p

    # --- Offline fold: per-character gate table = emb @ W_ih + b, per-gate padded ------
    gate_table = _pad_gate_cols(jnp.dot(emb_table, w_ih) + b, H, H_p)     # (V, 4H_p) f32

    # Embedding/gate gather + time/batch padding + chunk flattening in plain JAX
    # (tiny char table; the gather itself is exact).
    sents_p = _pad_axis(_pad_axis(sents, 0, L_p), 1, B_p)                 # (L_p, B_p)
    gx = jnp.take(gate_table, sents_p, axis=0)                            # (L_p, B_p, 4H_p)
    gx_chunks = gx.reshape(G, TB, 4 * H_p)

    # Weights: bf16 MXU operands (f32 accumulation in-kernel); per-gate 128-aligned pad.
    w_hh_p = _pad_axis(_pad_gate_cols(w_hh, H, H_p), 0, H_p).astype(jnp.bfloat16)
    w_proj_p = _pad_axis(_pad_axis(w_proj, 0, H_p), 1, V_p).astype(jnp.bfloat16)
    b_proj_p = _pad_axis(b_proj, 1, V_p)                                  # (1, V_p) f32

    h0 = _pad_axis(_pad_axis(dec_hidden[0][0], 0, B_p), 1, H_p)           # (B_p, H_p) f32
    c0 = _pad_axis(_pad_axis(dec_hidden[1][0], 0, B_p), 1, H_p)           # (B_p, H_p) f32

    kernel = functools.partial(_lstm_chunk_kernel, T=T, B=B_p, H=H_p, L=L)

    grid_spec = pltpu.PrefetchScalarGridSpec(
        num_scalar_prefetch=0,
        grid=(G,),
        in_specs=[
            pl.BlockSpec((None, TB, 4 * H_p), lambda g: (g, 0, 0)),   # gate chunk
            pl.BlockSpec((H_p, 4 * H_p), lambda g: (0, 0)),           # W_hh (bf16)
            pl.BlockSpec((B_p, H_p), lambda g: (0, 0)),               # h0
            pl.BlockSpec((B_p, H_p), lambda g: (0, 0)),               # c0
            pl.BlockSpec((H_p, V_p), lambda g: (0, 0)),               # W_proj (bf16)
            pl.BlockSpec((1, V_p), lambda g: (0, 0)),                 # b_proj
        ],
        out_specs=[
            pl.BlockSpec((None, TB, V_p), lambda g: (g, 0, 0)),       # scores chunk
            pl.BlockSpec((B_p, H_p), lambda g: (0, 0)),               # h_n (resident state)
            pl.BlockSpec((B_p, H_p), lambda g: (0, 0)),               # c_n (resident state)
        ],
    )

    scores_p, h_n_p, c_n_p = pl.pallas_call(
        kernel,
        out_shape=(
            jax.ShapeDtypeStruct((G, TB, V_p), jnp.float32),
            jax.ShapeDtypeStruct((B_p, H_p), jnp.float32),
            jax.ShapeDtypeStruct((B_p, H_p), jnp.float32),
        ),
        grid_spec=grid_spec,
        compiler_params=pltpu.CompilerParams(
            dimension_semantics=("arbitrary",),   # sequential recurrence over chunks
        ),
    )(gx_chunks, w_hh_p, h0, c0, w_proj_p, b_proj_p)

    scores = scores_p.reshape(L_p, B_p, V_p)[:L, :B, :V]
    h_n = h_n_p[:B, :H]
    c_n = c_n_p[:B, :H]
    return scores, (h_n[None], c_n[None])


# -----------------------------------------------------------------------------
# Pure-JAX reference (semantically identical to the PyTorch forward)
# -----------------------------------------------------------------------------
def char_decoder_forward_ref(sents, dec_hidden, params):
    emb_table = params["emb"]
    w_ih, w_hh, b = params["w_ih"], params["w_hh"], params["b"]
    w_proj, b_proj = params["w_proj"], params["b_proj"]
    H = w_hh.shape[0]

    x_emb = jnp.take(emb_table, sents, axis=0)   # (L, B, E)
    h0 = dec_hidden[0][0]
    c0 = dec_hidden[1][0]

    def step(carry, x_t):
        h, c = carry
        gates = x_t @ w_ih + h @ w_hh + b[0]
        i_g = jax.nn.sigmoid(gates[:, 0 * H:1 * H])
        f_g = jax.nn.sigmoid(gates[:, 1 * H:2 * H])
        g_g = jnp.tanh(gates[:, 2 * H:3 * H])
        o_g = jax.nn.sigmoid(gates[:, 3 * H:4 * H])
        c_new = f_g * c + i_g * g_g
        h_new = o_g * jnp.tanh(c_new)
        return (h_new, c_new), h_new

    (h_n, c_n), hs = lax.scan(step, (h0, c0), x_emb)
    scores = hs @ w_proj + b_proj[0]
    return scores, (h_n[None], c_n[None])


# -----------------------------------------------------------------------------
# Deterministic parameter construction (synthetic, PyTorch-like shapes)
# -----------------------------------------------------------------------------
def make_params(key, vocab_size, emb_size, hidden_size, pad_idx=0):
    ks = jax.random.split(key, 6)
    bound = 1.0 / jnp.sqrt(hidden_size)

    emb = jax.random.normal(ks[0], (vocab_size, emb_size), jnp.float32) * 0.1
    emb = emb.at[pad_idx].set(0.0)   # padding_idx row zeroed (nn.Embedding semantics)

    # nn.LSTM stores (4H, E) / (4H, H); we keep them transposed for x @ W.
    w_ih = jax.random.uniform(ks[1], (emb_size, 4 * hidden_size), jnp.float32, -bound, bound)
    w_hh = jax.random.uniform(ks[2], (hidden_size, 4 * hidden_size), jnp.float32, -bound, bound)
    b_ih = jax.random.uniform(ks[3], (4 * hidden_size,), jnp.float32, -bound, bound)
    b_hh = jax.random.uniform(ks[4], (4 * hidden_size,), jnp.float32, -bound, bound)
    b = (b_ih + b_hh)[None, :]       # (1, 4H)

    # nn.Linear(hidden, vocab): weight (V, H); keep transposed (H, V).
    kw, kb = jax.random.split(ks[5])
    lin_bound = 1.0 / jnp.sqrt(hidden_size)
    w_proj = jax.random.uniform(kw, (hidden_size, vocab_size), jnp.float32, -lin_bound, lin_bound)
    b_proj = jax.random.uniform(kb, (1, vocab_size), jnp.float32, -lin_bound, lin_bound)

    return {"emb": emb, "w_ih": w_ih, "w_hh": w_hh, "b": b,
            "w_proj": w_proj, "b_proj": b_proj}


if __name__ == "__main__":
    # Small shapes consistent with CharDecoder.forward:
    #   sents: (length, batch) ints; dec_hidden: (1, batch, hidden) x 2
    LENGTH, BATCH = 21, 6
    VOCAB, EMB, HIDDEN = 30, 50, 64   # char vocab / char embedding / hidden

    key = jax.random.PRNGKey(0)
    k_par, k_sents, k_h, k_c = jax.random.split(key, 4)

    params = make_params(k_par, VOCAB, EMB, HIDDEN, pad_idx=0)
    sents = jax.random.randint(k_sents, (LENGTH, BATCH), 0, VOCAB, dtype=jnp.int32)
    h0 = jax.random.normal(k_h, (1, BATCH, HIDDEN), jnp.float32)
    c0 = jax.random.normal(k_c, (1, BATCH, HIDDEN), jnp.float32)

    # Default path: single chunk (T = L, G = 1).
    scores, (h_n, c_n) = char_decoder_forward_pallas(sents, (h0, c0), params, max_chunk=32)
    jax.block_until_ready((scores, h_n, c_n))

    # Also exercise the multi-chunk + padded-trailing-step path (L=21, T=8 -> G=3).
    scores_ck, (h_ck, c_ck) = char_decoder_forward_pallas(sents, (h0, c0), params, max_chunk=8)
    jax.block_until_ready((scores_ck, h_ck, c_ck))

    # Correctness check against pure-JAX reference of the same semantics.
    # Tolerance loosened because MXU operands are bf16 (f32 accumulation).
    scores_ref, (h_ref, c_ref) = char_decoder_forward_ref(sents, (h0, c0), params)
    assert scores.shape == (LENGTH, BATCH, VOCAB)
    assert h_n.shape == (1, BATCH, HIDDEN) and c_n.shape == (1, BATCH, HIDDEN)
    assert jnp.allclose(scores, scores_ref, atol=3e-2, rtol=3e-2)
    assert jnp.allclose(h_n, h_ref, atol=3e-2, rtol=3e-2)
    assert jnp.allclose(c_n, c_ref, atol=3e-2, rtol=3e-2)
    assert jnp.allclose(scores_ck, scores_ref, atol=3e-2, rtol=3e-2)
    assert jnp.allclose(h_ck, h_ref, atol=3e-2, rtol=3e-2)
    assert jnp.allclose(c_ck, c_ref, atol=3e-2, rtol=3e-2)

    print("KERNEL_OK")
</pallas_src>

<mosaic_0001>
module attributes {stable_mosaic.version = 11 : i64} {
  func.func @_lstm_chunk_kernel(%arg0: i32, %arg1: memref<1x168x512xf32, #tpu.memory_space<vmem>>, %arg2: memref<128x512xbf16, #tpu.memory_space<vmem>>, %arg3: memref<8x128xf32, #tpu.memory_space<vmem>>, %arg4: memref<8x128xf32, #tpu.memory_space<vmem>>, %arg5: memref<128x128xbf16, #tpu.memory_space<vmem>>, %arg6: memref<1x128xf32, #tpu.memory_space<vmem>>, %arg7: memref<1x168x128xf32, #tpu.memory_space<vmem>>, %arg8: memref<8x128xf32, #tpu.memory_space<vmem>>, %arg9: memref<8x128xf32, #tpu.memory_space<vmem>>) attributes {dimension_semantics = [#tpu.dimension_semantics<arbitrary>], iteration_bounds = array<i64: 1>, scalar_prefetch = 0 : i64, scratch_operands = 0 : i64, tpu.core_type = #tpu.core_type<tc>, window_params = [{transform_indices = @transform_0, window_bounds = array<i64: 1, 168, 512>}, {pipeline_mode = #tpu.pipeline_mode<synchronous>, transform_indices = @transform_1, window_bounds = array<i64: 128, 512>}, {pipeline_mode = #tpu.pipeline_mode<synchronous>, transform_indices = @transform_2, window_bounds = array<i64: 8, 128>}, {pipeline_mode = #tpu.pipeline_mode<synchronous>, transform_indices = @transform_3, window_bounds = array<i64: 8, 128>}, {pipeline_mode = #tpu.pipeline_mode<synchronous>, transform_indices = @transform_4, window_bounds = array<i64: 128, 128>}, {pipeline_mode = #tpu.pipeline_mode<synchronous>, transform_indices = @transform_5, window_bounds = array<i64: 1, 128>}, {transform_indices = @transform_6, window_bounds = array<i64: 1, 168, 128>}, {pipeline_mode = #tpu.pipeline_mode<synchronous>, transform_indices = @transform_7, window_bounds = array<i64: 8, 128>}, {pipeline_mode = #tpu.pipeline_mode<synchronous>, transform_indices = @transform_8, window_bounds = array<i64: 8, 128>}]} {
    %c0_i32 = arith.constant 0 : i32
    %0 = arith.cmpi eq, %arg0, %c0_i32 : i32
    %1 = arith.extui %0 : i1 to i32
    %c0_i32_0 = arith.constant 0 : i32
    %2 = arith.cmpi ne, %1, %c0_i32_0 : i32
    scf.if %2 {
      %c0_224 = arith.constant 0 : index
      %c0_225 = arith.constant 0 : index
      %748 = vector.load %arg3[%c0_224, %c0_225] : memref<8x128xf32, #tpu.memory_space<vmem>>, vector<8x128xf32>
      %c0_226 = arith.constant 0 : index
      %c0_227 = arith.constant 0 : index
      %749 = vector.load %arg8[%c0_226, %c0_227] : memref<8x128xf32, #tpu.memory_space<vmem>>, vector<8x128xf32>
      tpu.vector_store %arg8[%c0_226, %c0_227], %748 {strides = array<i32>} : memref<8x128xf32, #tpu.memory_space<vmem>>, vector<8x128xf32>,
      %c0_228 = arith.constant 0 : index
      %c0_229 = arith.constant 0 : index
      %750 = vector.load %arg4[%c0_228, %c0_229] : memref<8x128xf32, #tpu.memory_space<vmem>>, vector<8x128xf32>
      %c0_230 = arith.constant 0 : index
      %c0_231 = arith.constant 0 : index
      %751 = vector.load %arg9[%c0_230, %c0_231] : memref<8x128xf32, #tpu.memory_space<vmem>>, vector<8x128xf32>
      tpu.vector_store %arg9[%c0_230, %c0_231], %750 {strides = array<i32>} : memref<8x128xf32, #tpu.memory_space<vmem>>, vector<8x128xf32>,
    } else {
    }
    %c0 = arith.constant 0 : index
    %c0_1 = arith.constant 0 : index
    %3 = vector.load %arg2[%c0, %c0_1] : memref<128x512xbf16, #tpu.memory_space<vmem>>, vector<128x512xbf16>
    %c0_2 = arith.constant 0 : index
    %c0_3 = arith.constant 0 : index
    %4 = vector.load %arg5[%c0_2, %c0_3] : memref<128x128xbf16, #tpu.memory_space<vmem>>, vector<128x128xbf16>
    %c0_4 = arith.constant 0 : index
    %c0_5 = arith.constant 0 : index
    %5 = vector.load %arg6[%c0_4, %c0_5] : memref<1x128xf32, #tpu.memory_space<vmem>>, vector<1x128xf32>
    %6 = vector.shape_cast %5 : vector<1x128xf32> to vector<1x128xf32>
    %7 = vector.broadcast %6 : vector<1x128xf32> to vector<8x128xf32>
    %c0_6 = arith.constant 0 : index
    %c0_7 = arith.constant 0 : index
    %8 = vector.load %arg8[%c0_6, %c0_7] : memref<8x128xf32, #tpu.memory_space<vmem>>, vector<8x128xf32>
    %c0_8 = arith.constant 0 : index
    %c0_9 = arith.constant 0 : index
    %9 = vector.load %arg9[%c0_8, %c0_9] : memref<8x128xf32, #tpu.memory_space<vmem>>, vector<8x128xf32>
    %10 = arith.truncf %8 : vector<8x128xf32> to vector<8x128xbf16>
    %c0_10 = arith.constant 0 : index
    %c0_11 = arith.constant 0 : index
    %c0_12 = arith.constant 0 : index
    %11 = vector.load %arg1[%c0_10, %c0_11, %c0_12] : memref<1x168x512xf32, #tpu.memory_space<vmem>>, vector<1x8x512xf32>
    %12 = vector.shape_cast %11 : vector<1x8x512xf32> to vector<8x512xf32>
    %cst = arith.constant dense<0.000000e+00> : vector<8x512xf32>
    %13 = tpu.matmul %10, %3, %cst {dimension_numbers = #tpu.dot_dimension_numbers<[1], [0], [0], [1], [0, 0, 1, 1], [], []>} : vector<8x128xbf16>, vector<128x512xbf16>, vector<8x512xf32> -> vector<8x512xf32>
    %14 = arith.addf %12, %13 : vector<8x512xf32>
    %15 = vector.extract_strided_slice %14 {offsets = [0, 0], sizes = [8, 128], strides = [1, 1]} : vector<8x512xf32> to vector<8x128xf32>
    %16 = arith.negf %15 : vector<8x128xf32>
    %17 = math.exp %16 : vector<8x128xf32>
    %cst_13 = arith.constant 1.000000e+00 : f32
    %18 = vector.broadcast %cst_13 : f32 to vector<8x128xf32>
    %19 = arith.addf %18, %17 : vector<8x128xf32>
    %20 = arith.divf %18, %19 : vector<8x128xf32>
    %21 = vector.extract_strided_slice %14 {offsets = [0, 128], sizes = [8, 128], strides = [1, 1]} : vector<8x512xf32> to vector<8x128xf32>
    %22 = arith.negf %21 : vector<8x128xf32>
    %23 = math.exp %22 : vector<8x128xf32>
    %cst_14 = arith.constant 1.000000e+00 : f32
    %24 = vector.broadcast %cst_14 : f32 to vector<8x128xf32>
    %25 = arith.addf %24, %23 : vector<8x128xf32>
    %26 = arith.divf %24, %25 : vector<8x128xf32>
    %27 = vector.extract_strided_slice %14 {offsets = [0, 256], sizes = [8, 128], strides = [1, 1]} : vector<8x512xf32> to vector<8x128xf32>
    %28 = math.tanh %27 : vector<8x128xf32>
    %29 = vector.extract_strided_slice %14 {offsets = [0, 384], sizes = [8, 128], strides = [1, 1]} : vector<8x512xf32> to vector<8x128xf32>
    %30 = arith.negf %29 : vector<8x128xf32>
    %31 = math.exp %30 : vector<8x128xf32>
    %cst_15 = arith.constant 1.000000e+00 : f32
    %32 = vector.broadcast %cst_15 : f32 to vector<8x128xf32>
    %33 = arith.addf %32, %31 : vector<8x128xf32>
    %34 = arith.divf %32, %33 : vector<8x128xf32>
    %35 = arith.mulf %26, %9 : vector<8x128xf32>
    %36 = arith.mulf %20, %28 : vector<8x128xf32>
    %37 = arith.addf %35, %36 : vector<8x128xf32>
    %38 = math.tanh %37 : vector<8x128xf32>
    %39 = arith.mulf %34, %38 : vector<8x128xf32>
    %40 = arith.truncf %39 : vector<8x128xf32> to vector<8x128xbf16>
    %cst_16 = arith.constant dense<0.000000e+00> : vector<8x128xf32>
    %41 = tpu.matmul %40, %4, %cst_16 {dimension_numbers = #tpu.dot_dimension_numbers<[1], [0], [0], [1], [0, 0, 1, 1], [], []>} : vector<8x128xbf16>, vector<128x128xbf16>, vector<8x128xf32> -> vector<8x128xf32>
    %42 = arith.addf %41, %7 : vector<8x128xf32>
    %c0_17 = arith.constant 0 : index
    %c0_18 = arith.constant 0 : index
    %c0_19 = arith.constant 0 : index
    %43 = vector.load %arg7[%c0_17, %c0_18, %c0_19] : memref<1x168x128xf32, #tpu.memory_space<vmem>>, vector<1x8x128xf32>
    %44 = vector.shape_cast %43 : vector<1x8x128xf32> to vector<8x128xf32>
    %45 = vector.shape_cast %42 : vector<8x128xf32> to vector<1x8x128xf32>
    tpu.vector_store %arg7[%c0_17, %c0_18, %c0_19], %45 {strides = array<i32>} : memref<1x168x128xf32, #tpu.memory_space<vmem>>, vector<1x8x128xf32>,
    %c0_20 = arith.constant 0 : index
    %c8 = arith.constant 8 : index
    %c0_21 = arith.constant 0 : index
    %46 = vector.load %arg1[%c0_20, %c8, %c0_21] : memref<1x168x512xf32, #tpu.memory_space<vmem>>, vector<1x8x512xf32>
    %47 = vector.shape_cast %46 : vector<1x8x512xf32> to vector<8x512xf32>
    %cst_22 = arith.constant dense<0.000000e+00> : vector<8x512xf32>
    %48 = tpu.matmul %40, %3, %cst_22 {dimension_numbers = #tpu.dot_dimension_numbers<[1], [0], [0], [1], [0, 0, 1, 1], [], []>} : vector<8x128xbf16>, vector<128x512xbf16>, vector<8x512xf32> -> vector<8x512xf32>
    %49 = arith.addf %47, %48 : vector<8x512xf32>
    %50 = vector.extract_strided_slice %49 {offsets = [0, 0], sizes = [8, 128], strides = [1, 1]} : vector<8x512xf32> to vector<8x128xf32>
    %51 = arith.negf %50 : vector<8x128xf32>
    %52 = math.exp %51 : vector<8x128xf32>
    %cst_23 = arith.constant 1.000000e+00 : f32
    %53 = vector.broadcast %cst_23 : f32 to vector<8x128xf32>
    %54 = arith.addf %53, %52 : vector<8x128xf32>
    %55 = arith.divf %53, %54 : vector<8x128xf32>
    %56 = vector.extract_strided_slice %49 {offsets = [0, 128], sizes = [8, 128], strides = [1, 1]} : vector<8x512xf32> to vector<8x128xf32>
    %57 = arith.negf %56 : vector<8x128xf32>
    %58 = math.exp %57 : vector<8x128xf32>
    %cst_24 = arith.constant 1.000000e+00 : f32
    %59 = vector.broadcast %cst_24 : f32 to vector<8x128xf32>
    %60 = arith.addf %59, %58 : vector<8x128xf32>
    %61 = arith.divf %59, %60 : vector<8x128xf32>
    %62 = vector.extract_strided_slice %49 {offsets = [0, 256], sizes = [8, 128], strides = [1, 1]} : vector<8x512xf32> to vector<8x128xf32>
    %63 = math.tanh %62 : vector<8x128xf32>
    %64 = vector.extract_strided_slice %49 {offsets = [0, 384], sizes = [8, 128], strides = [1, 1]} : vector<8x512xf32> to vector<8x128xf32>
    %65 = arith.negf %64 : vector<8x128xf32>
    %66 = math.exp %65 : vector<8x128xf32>
    %cst_25 = arith.constant 1.000000e+00 : f32
    %67 = vector.broadcast %cst_25 : f32 to vector<8x128xf32>
    %68 = arith.addf %67, %66 : vector<8x128xf32>
    %69 = arith.divf %67, %68 : vector<8x128xf32>
    %70 = arith.mulf %61, %37 : vector<8x128xf32>
    %71 = arith.mulf %55, %63 : vector<8x128xf32>
    %72 = arith.addf %70, %71 : vector<8x128xf32>
    %73 = math.tanh %72 : vector<8x128xf32>
    %74 = arith.mulf %69, %73 : vector<8x128xf32>
    %75 = arith.truncf %74 : vector<8x128xf32> to vector<8x128xbf16>
    %cst_26 = arith.constant dense<0.000000e+00> : vector<8x128xf32>
    %76 = tpu.matmul %75, %4, %cst_26 {dimension_numbers = #tpu.dot_dimension_numbers<[1], [0], [0], [1], [0, 0, 1, 1], [], []>} : vector<8x128xbf16>, vector<128x128xbf16>, vector<8x128xf32> -> vector<8x128xf32>
    %77 = arith.addf %76, %7 : vector<8x128xf32>
    %c0_27 = arith.constant 0 : index
    %c8_28 = arith.constant 8 : index
    %c0_29 = arith.constant 0 : index
    %78 = vector.load %arg7[%c0_27, %c8_28, %c0_29] : memref<1x168x128xf32, #tpu.memory_space<vmem>>, vector<1x8x128xf32>
    %79 = vector.shape_cast %78 : vector<1x8x128xf32> to vector<8x128xf32>
    %80 = vector.shape_cast %77 : vector<8x128xf32> to vector<1x8x128xf32>
    tpu.vector_store %arg7[%c0_27, %c8_28, %c0_29], %80 {strides = array<i32>} : memref<1x168x128xf32, #tpu.memory_space<vmem>>, vector<1x8x128xf32>,
    %c0_30 = arith.constant 0 : index
    %c16 = arith.constant 16 : index
    %c0_31 = arith.constant 0 : index
    %81 = vector.load %arg1[%c0_30, %c16, %c0_31] : memref<1x168x512xf32, #tpu.memory_space<vmem>>, vector<1x8x512xf32>
    %82 = vector.shape_cast %81 : vector<1x8x512xf32> to vector<8x512xf32>
    %cst_32 = arith.constant dense<0.000000e+00> : vector<8x512xf32>
    %83 = tpu.matmul %75, %3, %cst_32 {dimension_numbers = #tpu.dot_dimension_numbers<[1], [0], [0], [1], [0, 0, 1, 1], [], []>} : vector<8x128xbf16>, vector<128x512xbf16>, vector<8x512xf32> -> vector<8x512xf32>
    %84 = arith.addf %82, %83 : vector<8x512xf32>
    %85 = vector.extract_strided_slice %84 {offsets = [0, 0], sizes = [8, 128], strides = [1, 1]} : vector<8x512xf32> to vector<8x128xf32>
    %86 = arith.negf %85 : vector<8x128xf32>
    %87 = math.exp %86 : vector<8x128xf32>
    %cst_33 = arith.constant 1.000000e+00 : f32
    %88 = vector.broadcast %cst_33 : f32 to vector<8x128xf32>
    %89 = arith.addf %88, %87 : vector<8x128xf32>
    %90 = arith.divf %88, %89 : vector<8x128xf32>
    %91 = vector.extract_strided_slice %84 {offsets = [0, 128], sizes = [8, 128], strides = [1, 1]} : vector<8x512xf32> to vector<8x128xf32>
    %92 = arith.negf %91 : vector<8x128xf32>
    %93 = math.exp %92 : vector<8x128xf32>
    %cst_34 = arith.constant 1.000000e+00 : f32
    %94 = vector.broadcast %cst_34 : f32 to vector<8x128xf32>
    %95 = arith.addf %94, %93 : vector<8x128xf32>
    %96 = arith.divf %94, %95 : vector<8x128xf32>
    %97 = vector.extract_strided_slice %84 {offsets = [0, 256], sizes = [8, 128], strides = [1, 1]} : vector<8x512xf32> to vector<8x128xf32>
    %98 = math.tanh %97 : vector<8x128xf32>
    %99 = vector.extract_strided_slice %84 {offsets = [0, 384], sizes = [8, 128], strides = [1, 1]} : vector<8x512xf32> to vector<8x128xf32>
    %100 = arith.negf %99 : vector<8x128xf32>
    %101 = math.exp %100 : vector<8x128xf32>
    %cst_35 = arith.constant 1.000000e+00 : f32
    %102 = vector.broadcast %cst_35 : f32 to vector<8x128xf32>
    %103 = arith.addf %102, %101 : vector<8x128xf32>
    %104 = arith.divf %102, %103 : vector<8x128xf32>
    %105 = arith.mulf %96, %72 : vector<8x128xf32>
    %106 = arith.mulf %90, %98 : vector<8x128xf32>
    %107 = arith.addf %105, %106 : vector<8x128xf32>
    %108 = math.tanh %107 : vector<8x128xf32>
    %109 = arith.mulf %104, %108 : vector<8x128xf32>
    %110 = arith.truncf %109 : vector<8x128xf32> to vector<8x128xbf16>
    %cst_36 = arith.constant dense<0.000000e+00> : vector<8x128xf32>
    %111 = tpu.matmul %110, %4, %cst_36 {dimension_numbers = #tpu.dot_dimension_numbers<[1], [0], [0], [1], [0, 0, 1, 1], [], []>} : vector<8x128xbf16>, vector<128x128xbf16>, vector<8x128xf32> -> vector<8x128xf32>
    %112 = arith.addf %111, %7 : vector<8x128xf32>
    %c0_37 = arith.constant 0 : index
    %c16_38 = arith.constant 16 : index
    %c0_39 = arith.constant 0 : index
    %113 = vector.load %arg7[%c0_37, %c16_38, %c0_39] : memref<1x168x128xf32, #tpu.memory_space<vmem>>, vector<1x8x128xf32>
    %114 = vector.shape_cast %113 : vector<1x8x128xf32> to vector<8x128xf32>
    %115 = vector.shape_cast %112 : vector<8x128xf32> to vector<1x8x128xf32>
    tpu.vector_store %arg7[%c0_37, %c16_38, %c0_39], %115 {strides = array<i32>} : memref<1x168x128xf32, #tpu.memory_space<vmem>>, vector<1x8x128xf32>,
    %c0_40 = arith.constant 0 : index
    %c24 = arith.constant 24 : index
    %c0_41 = arith.constant 0 : index
    %116 = vector.load %arg1[%c0_40, %c24, %c0_41] : memref<1x168x512xf32, #tpu.memory_space<vmem>>, vector<1x8x512xf32>
    %117 = vector.shape_cast %116 : vector<1x8x512xf32> to vector<8x512xf32>
    %cst_42 = arith.constant dense<0.000000e+00> : vector<8x512xf32>
    %118 = tpu.matmul %110, %3, %cst_42 {dimension_numbers = #tpu.dot_dimension_numbers<[1], [0], [0], [1], [0, 0, 1, 1], [], []>} : vector<8x128xbf16>, vector<128x512xbf16>, vector<8x512xf32> -> vector<8x512xf32>
    %119 = arith.addf %117, %118 : vector<8x512xf32>
    %120 = vector.extract_strided_slice %119 {offsets = [0, 0], sizes = [8, 128], strides = [1, 1]} : vector<8x512xf32> to vector<8x128xf32>
    %121 = arith.negf %120 : vector<8x128xf32>
    %122 = math.exp %121 : vector<8x128xf32>
    %cst_43 = arith.constant 1.000000e+00 : f32
    %123 = vector.broadcast %cst_43 : f32 to vector<8x128xf32>
    %124 = arith.addf %123, %122 : vector<8x128xf32>
    %125 = arith.divf %123, %124 : vector<8x128xf32>
    %126 = vector.extract_strided_slice %119 {offsets = [0, 128], sizes = [8, 128], strides = [1, 1]} : vector<8x512xf32> to vector<8x128xf32>
    %127 = arith.negf %126 : vector<8x128xf32>
    %128 = math.exp %127 : vector<8x128xf32>
    %cst_44 = arith.constant 1.000000e+00 : f32
    %129 = vector.broadcast %cst_44 : f32 to vector<8x128xf32>
    %130 = arith.addf %129, %128 : vector<8x128xf32>
    %131 = arith.divf %129, %130 : vector<8x128xf32>
    %132 = vector.extract_strided_slice %119 {offsets = [0, 256], sizes = [8, 128], strides = [1, 1]} : vector<8x512xf32> to vector<8x128xf32>
    %133 = math.tanh %132 : vector<8x128xf32>
    %134 = vector.extract_strided_slice %119 {offsets = [0, 384], sizes = [8, 128], strides = [1, 1]} : vector<8x512xf32> to vector<8x128xf32>
    %135 = arith.negf %134 : vector<8x128xf32>
    %136 = math.exp %135 : vector<8x128xf32>
    %cst_45 = arith.constant 1.000000e+00 : f32
    %137 = vector.broadcast %cst_45 : f32 to vector<8x128xf32>
    %138 = arith.addf %137, %136 : vector<8x128xf32>
    %139 = arith.divf %137, %138 : vector<8x128xf32>
    %140 = arith.mulf %131, %107 : vector<8x128xf32>
    %141 = arith.mulf %125, %133 : vector<8x128xf32>
    %142 = arith.addf %140, %141 : vector<8x128xf32>
    %143 = math.tanh %142 : vector<8x128xf32>
    %144 = arith.mulf %139, %143 : vector<8x128xf32>
    %145 = arith.truncf %144 : vector<8x128xf32> to vector<8x128xbf16>
    %cst_46 = arith.constant dense<0.000000e+00> : vector<8x128xf32>
    %146 = tpu.matmul %145, %4, %cst_46 {dimension_numbers = #tpu.dot_dimension_numbers<[1], [0], [0], [1], [0, 0, 1, 1], [], []>} : vector<8x128xbf16>, vector<128x128xbf16>, vector<8x128xf32> -> vector<8x128xf32>
    %147 = arith.addf %146, %7 : vector<8x128xf32>
    %c0_47 = arith.constant 0 : index
    %c24_48 = arith.constant 24 : index
    %c0_49 = arith.constant 0 : index
    %148 = vector.load %arg7[%c0_47, %c24_48, %c0_49] : memref<1x168x128xf32, #tpu.memory_space<vmem>>, vector<1x8x128xf32>
    %149 = vector.shape_cast %148 : vector<1x8x128xf32> to vector<8x128xf32>
    %150 = vector.shape_cast %147 : vector<8x128xf32> to vector<1x8x128xf32>
    tpu.vector_store %arg7[%c0_47, %c24_48, %c0_49], %150 {strides = array<i32>} : memref<1x168x128xf32, #tpu.memory_space<vmem>>, vector<1x8x128xf32>,
    %c0_50 = arith.constant 0 : index
    %c32 = arith.constant 32 : index
    %c0_51 = arith.constant 0 : index
    %151 = vector.load %arg1[%c0_50, %c32, %c0_51] : memref<1x168x512xf32, #tpu.memory_space<vmem>>, vector<1x8x512xf32>
    %152 = vector.shape_cast %151 : vector<1x8x512xf32> to vector<8x512xf32>
    %cst_52 = arith.constant dense<0.000000e+00> : vector<8x512xf32>
    %153 = tpu.matmul %145, %3, %cst_52 {dimension_numbers = #tpu.dot_dimension_numbers<[1], [0], [0], [1], [0, 0, 1, 1], [], []>} : vector<8x128xbf16>, vector<128x512xbf16>, vector<8x512xf32> -> vector<8x512xf32>
    %154 = arith.addf %152, %153 : vector<8x512xf32>
    %155 = vector.extract_strided_slice %154 {offsets = [0, 0], sizes = [8, 128], strides = [1, 1]} : vector<8x512xf32> to vector<8x128xf32>
    %156 = arith.negf %155 : vector<8x128xf32>
    %157 = math.exp %156 : vector<8x128xf32>
    %cst_53 = arith.constant 1.000000e+00 : f32
    %158 = vector.broadcast %cst_53 : f32 to vector<8x128xf32>
    %159 = arith.addf %158, %157 : vector<8x128xf32>
    %160 = arith.divf %158, %159 : vector<8x128xf32>
    %161 = vector.extract_strided_slice %154 {offsets = [0, 128], sizes = [8, 128], strides = [1, 1]} : vector<8x512xf32> to vector<8x128xf32>
    %162 = arith.negf %161 : vector<8x128xf32>
    %163 = math.exp %162 : vector<8x128xf32>
    %cst_54 = arith.constant 1.000000e+00 : f32
    %164 = vector.broadcast %cst_54 : f32 to vector<8x128xf32>
    %165 = arith.addf %164, %163 : vector<8x128xf32>
    %166 = arith.divf %164, %165 : vector<8x128xf32>
    %167 = vector.extract_strided_slice %154 {offsets = [0, 256], sizes = [8, 128], strides = [1, 1]} : vector<8x512xf32> to vector<8x128xf32>
    %168 = math.tanh %167 : vector<8x128xf32>
    %169 = vector.extract_strided_slice %154 {offsets = [0, 384], sizes = [8, 128], strides = [1, 1]} : vector<8x512xf32> to vector<8x128xf32>
    %170 = arith.negf %169 : vector<8x128xf32>
    %171 = math.exp %170 : vector<8x128xf32>
    %cst_55 = arith.constant 1.000000e+00 : f32
    %172 = vector.broadcast %cst_55 : f32 to vector<8x128xf32>
    %173 = arith.addf %172, %171 : vector<8x128xf32>
    %174 = arith.divf %172, %173 : vector<8x128xf32>
    %175 = arith.mulf %166, %142 : vector<8x128xf32>
    %176 = arith.mulf %160, %168 : vector<8x128xf32>
    %177 = arith.addf %175, %176 : vector<8x128xf32>
    %178 = math.tanh %177 : vector<8x128xf32>
    %179 = arith.mulf %174, %178 : vector<8x128xf32>
    %180 = arith.truncf %179 : vector<8x128xf32> to vector<8x128xbf16>
    %cst_56 = arith.constant dense<0.000000e+00> : vector<8x128xf32>
    %181 = tpu.matmul %180, %4, %cst_56 {dimension_numbers = #tpu.dot_dimension_numbers<[1], [0], [0], [1], [0, 0, 1, 1], [], []>} : vector<8x128xbf16>, vector<128x128xbf16>, vector<8x128xf32> -> vector<8x128xf32>
    %182 = arith.addf %181, %7 : vector<8x128xf32>
    %c0_57 = arith.constant 0 : index
    %c32_58 = arith.constant 32 : index
    %c0_59 = arith.constant 0 : index
    %183 = vector.load %arg7[%c0_57, %c32_58, %c0_59] : memref<1x168x128xf32, #tpu.memory_space<vmem>>, vector<1x8x128xf32>
    %184 = vector.shape_cast %183 : vector<1x8x128xf32> to vector<8x128xf32>
    %185 = vector.shape_cast %182 : vector<8x128xf32> to vector<1x8x128xf32>
    tpu.vector_store %arg7[%c0_57, %c32_58, %c0_59], %185 {strides = array<i32>} : memref<1x168x128xf32, #tpu.memory_space<vmem>>, vector<1x8x128xf32>,
    %c0_60 = arith.constant 0 : index
    %c40 = arith.constant 40 : index
    %c0_61 = arith.constant 0 : index
    %186 = vector.load %arg1[%c0_60, %c40, %c0_61] : memref<1x168x512xf32, #tpu.memory_space<vmem>>, vector<1x8x512xf32>
    %187 = vector.shape_cast %186 : vector<1x8x512xf32> to vector<8x512xf32>
    %cst_62 = arith.constant dense<0.000000e+00> : vector<8x512xf32>
    %188 = tpu.matmul %180, %3, %cst_62 {dimension_numbers = #tpu.dot_dimension_numbers<[1], [0], [0], [1], [0, 0, 1, 1], [], []>} : vector<8x128xbf16>, vector<128x512xbf16>, vector<8x512xf32> -> vector<8x512xf32>
    %189 = arith.addf %187, %188 : vector<8x512xf32>
    %190 = vector.extract_strided_slice %189 {offsets = [0, 0], sizes = [8, 128], strides = [1, 1]} : vector<8x512xf32> to vector<8x128xf32>
    %191 = arith.negf %190 : vector<8x128xf32>
    %192 = math.exp %191 : vector<8x128xf32>
    %cst_63 = arith.constant 1.000000e+00 : f32
    %193 = vector.broadcast %cst_63 : f32 to vector<8x128xf32>
    %194 = arith.addf %193, %192 : vector<8x128xf32>
    %195 = arith.divf %193, %194 : vector<8x128xf32>
    %196 = vector.extract_strided_slice %189 {offsets = [0, 128], sizes = [8, 128], strides = [1, 1]} : vector<8x512xf32> to vector<8x128xf32>
    %197 = arith.negf %196 : vector<8x128xf32>
    %198 = math.exp %197 : vector<8x128xf32>
    %cst_64 = arith.constant 1.000000e+00 : f32
    %199 = vector.broadcast %cst_64 : f32 to vector<8x128xf32>
    %200 = arith.addf %199, %198 : vector<8x128xf32>
    %201 = arith.divf %199, %200 : vector<8x128xf32>
    %202 = vector.extract_strided_slice %189 {offsets = [0, 256], sizes = [8, 128], strides = [1, 1]} : vector<8x512xf32> to vector<8x128xf32>
    %203 = math.tanh %202 : vector<8x128xf32>
    %204 = vector.extract_strided_slice %189 {offsets = [0, 384], sizes = [8, 128], strides = [1, 1]} : vector<8x512xf32> to vector<8x128xf32>
    %205 = arith.negf %204 : vector<8x128xf32>
    %206 = math.exp %205 : vector<8x128xf32>
    %cst_65 = arith.constant 1.000000e+00 : f32
    %207 = vector.broadcast %cst_65 : f32 to vector<8x128xf32>
    %208 = arith.addf %207, %206 : vector<8x128xf32>
    %209 = arith.divf %207, %208 : vector<8x128xf32>
    %210 = arith.mulf %201, %177 : vector<8x128xf32>
    %211 = arith.mulf %195, %203 : vector<8x128xf32>
    %212 = arith.addf %210, %211 : vector<8x128xf32>
    %213 = math.tanh %212 : vector<8x128xf32>
    %214 = arith.mulf %209, %213 : vector<8x128xf32>
    %215 = arith.truncf %214 : vector<8x128xf32> to vector<8x128xbf16>
    %cst_66 = arith.constant dense<0.000000e+00> : vector<8x128xf32>
    %216 = tpu.matmul %215, %4, %cst_66 {dimension_numbers = #tpu.dot_dimension_numbers<[1], [0], [0], [1], [0, 0, 1, 1], [], []>} : vector<8x128xbf16>, vector<128x128xbf16>, vector<8x128xf32> -> vector<8x128xf32>
    %217 = arith.addf %216, %7 : vector<8x128xf32>
    %c0_67 = arith.constant 0 : index
    %c40_68 = arith.constant 40 : index
    %c0_69 = arith.constant 0 : index
    %218 = vector.load %arg7[%c0_67, %c40_68, %c0_69] : memref<1x168x128xf32, #tpu.memory_space<vmem>>, vector<1x8x128xf32>
    %219 = vector.shape_cast %218 : vector<1x8x128xf32> to vector<8x128xf32>
    %220 = vector.shape_cast %217 : vector<8x128xf32> to vector<1x8x128xf32>
    tpu.vector_store %arg7[%c0_67, %c40_68, %c0_69], %220 {strides = array<i32>} : memref<1x168x128xf32, #tpu.memory_space<vmem>>, vector<1x8x128xf32>,
    %c0_70 = arith.constant 0 : index
    %c48 = arith.constant 48 : index
    %c0_71 = arith.constant 0 : index
    %221 = vector.load %arg1[%c0_70, %c48, %c0_71] : memref<1x168x512xf32, #tpu.memory_space<vmem>>, vector<1x8x512xf32>
    %222 = vector.shape_cast %221 : vector<1x8x512xf32> to vector<8x512xf32>
    %cst_72 = arith.constant dense<0.000000e+00> : vector<8x512xf32>
    %223 = tpu.matmul %215, %3, %cst_72 {dimension_numbers = #tpu.dot_dimension_numbers<[1], [0], [0], [1], [0, 0, 1, 1], [], []>} : vector<8x128xbf16>, vector<128x512xbf16>, vector<8x512xf32> -> vector<8x512xf32>
    %224 = arith.addf %222, %223 : vector<8x512xf32>
    %225 = vector.extract_strided_slice %224 {offsets = [0, 0], sizes = [8, 128], strides = [1, 1]} : vector<8x512xf32> to vector<8x128xf32>
    %226 = arith.negf %225 : vector<8x128xf32>
    %227 = math.exp %226 : vector<8x128xf32>
    %cst_73 = arith.constant 1.000000e+00 : f32
    %228 = vector.broadcast %cst_73 : f32 to vector<8x128xf32>
    %229 = arith.addf %228, %227 : vector<8x128xf32>
    %230 = arith.divf %228, %229 : vector<8x128xf32>
    %231 = vector.extract_strided_slice %224 {offsets = [0, 128], sizes = [8, 128], strides = [1, 1]} : vector<8x512xf32> to vector<8x128xf32>
    %232 = arith.negf %231 : vector<8x128xf32>
    %233 = math.exp %232 : vector<8x128xf32>
    %cst_74 = arith.constant 1.000000e+00 : f32
    %234 = vector.broadcast %cst_74 : f32 to vector<8x128xf32>
    %235 = arith.addf %234, %233 : vector<8x128xf32>
    %236 = arith.divf %234, %235 : vector<8x128xf32>
    %237 = vector.extract_strided_slice %224 {offsets = [0, 256], sizes = [8, 128], strides = [1, 1]} : vector<8x512xf32> to vector<8x128xf32>
    %238 = math.tanh %237 : vector<8x128xf32>
    %239 = vector.extract_strided_slice %224 {offsets = [0, 384], sizes = [8, 128], strides = [1, 1]} : vector<8x512xf32> to vector<8x128xf32>
    %240 = arith.negf %239 : vector<8x128xf32>
    %241 = math.exp %240 : vector<8x128xf32>
    %cst_75 = arith.constant 1.000000e+00 : f32
    %242 = vector.broadcast %cst_75 : f32 to vector<8x128xf32>
    %243 = arith.addf %242, %241 : vector<8x128xf32>
    %244 = arith.divf %242, %243 : vector<8x128xf32>
    %245 = arith.mulf %236, %212 : vector<8x128xf32>
    %246 = arith.mulf %230, %238 : vector<8x128xf32>
    %247 = arith.addf %245, %246 : vector<8x128xf32>
    %248 = math.tanh %247 : vector<8x128xf32>
    %249 = arith.mulf %244, %248 : vector<8x128xf32>
    %250 = arith.truncf %249 : vector<8x128xf32> to vector<8x128xbf16>
    %cst_76 = arith.constant dense<0.000000e+00> : vector<8x128xf32>
    %251 = tpu.matmul %250, %4, %cst_76 {dimension_numbers = #tpu.dot_dimension_numbers<[1], [0], [0], [1], [0, 0, 1, 1], [], []>} : vector<8x128xbf16>, vector<128x128xbf16>, vector<8x128xf32> -> vector<8x128xf32>
    %252 = arith.addf %251, %7 : vector<8x128xf32>
    %c0_77 = arith.constant 0 : index
    %c48_78 = arith.constant 48 : index
    %c0_79 = arith.constant 0 : index
    %253 = vector.load %arg7[%c0_77, %c48_78, %c0_79] : memref<1x168x128xf32, #tpu.memory_space<vmem>>, vector<1x8x128xf32>
    %254 = vector.shape_cast %253 : vector<1x8x128xf32> to vector<8x128xf32>
    %255 = vector.shape_cast %252 : vector<8x128xf32> to vector<1x8x128xf32>
    tpu.vector_store %arg7[%c0_77, %c48_78, %c0_79], %255 {strides = array<i32>} : memref<1x168x128xf32, #tpu.memory_space<vmem>>, vector<1x8x128xf32>,
    %c0_80 = arith.constant 0 : index
    %c56 = arith.constant 56 : index
    %c0_81 = arith.constant 0 : index
    %256 = vector.load %arg1[%c0_80, %c56, %c0_81] : memref<1x168x512xf32, #tpu.memory_space<vmem>>, vector<1x8x512xf32>
    %257 = vector.shape_cast %256 : vector<1x8x512xf32> to vector<8x512xf32>
    %cst_82 = arith.constant dense<0.000000e+00> : vector<8x512xf32>
    %258 = tpu.matmul %250, %3, %cst_82 {dimension_numbers = #tpu.dot_dimension_numbers<[1], [0], [0], [1], [0, 0, 1, 1], [], []>} : vector<8x128xbf16>, vector<128x512xbf16>, vector<8x512xf32> -> vector<8x512xf32>
    %259 = arith.addf %257, %258 : vector<8x512xf32>
    %260 = vector.extract_strided_slice %259 {offsets = [0, 0], sizes = [8, 128], strides = [1, 1]} : vector<8x512xf32> to vector<8x128xf32>
    %261 = arith.negf %260 : vector<8x128xf32>
    %262 = math.exp %261 : vector<8x128xf32>
    %cst_83 = arith.constant 1.000000e+00 : f32
    %263 = vector.broadcast %cst_83 : f32 to vector<8x128xf32>
    %264 = arith.addf %263, %262 : vector<8x128xf32>
    %265 = arith.divf %263, %264 : vector<8x128xf32>
    %266 = vector.extract_strided_slice %259 {offsets = [0, 128], sizes = [8, 128], strides = [1, 1]} : vector<8x512xf32> to vector<8x128xf32>
    %267 = arith.negf %266 : vector<8x128xf32>
    %268 = math.exp %267 : vector<8x128xf32>
    %cst_84 = arith.constant 1.000000e+00 : f32
    %269 = vector.broadcast %cst_84 : f32 to vector<8x128xf32>
    %270 = arith.addf %269, %268 : vector<8x128xf32>
    %271 = arith.divf %269, %270 : vector<8x128xf32>
    %272 = vector.extract_strided_slice %259 {offsets = [0, 256], sizes = [8, 128], strides = [1, 1]} : vector<8x512xf32> to vector<8x128xf32>
    %273 = math.tanh %272 : vector<8x128xf32>
    %274 = vector.extract_strided_slice %259 {offsets = [0, 384], sizes = [8, 128], strides = [1, 1]} : vector<8x512xf32> to vector<8x128xf32>
    %275 = arith.negf %274 : vector<8x128xf32>
    %276 = math.exp %275 : vector<8x128xf32>
    %cst_85 = arith.constant 1.000000e+00 : f32
    %277 = vector.broadcast %cst_85 : f32 to vector<8x128xf32>
    %278 = arith.addf %277, %276 : vector<8x128xf32>
    %279 = arith.divf %277, %278 : vector<8x128xf32>
    %280 = arith.mulf %271, %247 : vector<8x128xf32>
    %281 = arith.mulf %265, %273 : vector<8x128xf32>
    %282 = arith.addf %280, %281 : vector<8x128xf32>
    %283 = math.tanh %282 : vector<8x128xf32>
    %284 = arith.mulf %279, %283 : vector<8x128xf32>
    %285 = arith.truncf %284 : vector<8x128xf32> to vector<8x128xbf16>
    %cst_86 = arith.constant dense<0.000000e+00> : vector<8x128xf32>
    %286 = tpu.matmul %285, %4, %cst_86 {dimension_numbers = #tpu.dot_dimension_numbers<[1], [0], [0], [1], [0, 0, 1, 1], [], []>} : vector<8x128xbf16>, vector<128x128xbf16>, vector<8x128xf32> -> vector<8x128xf32>
    %287 = arith.addf %286, %7 : vector<8x128xf32>
    %c0_87 = arith.constant 0 : index
    %c56_88 = arith.constant 56 : index
    %c0_89 = arith.constant 0 : index
    %288 = vector.load %arg7[%c0_87, %c56_88, %c0_89] : memref<1x168x128xf32, #tpu.memory_space<vmem>>, vector<1x8x128xf32>
    %289 = vector.shape_cast %288 : vector<1x8x128xf32> to vector<8x128xf32>
    %290 = vector.shape_cast %287 : vector<8x128xf32> to vector<1x8x128xf32>
    tpu.vector_store %arg7[%c0_87, %c56_88, %c0_89], %290 {strides = array<i32>} : memref<1x168x128xf32, #tpu.memory_space<vmem>>, vector<1x8x128xf32>,
    %c0_90 = arith.constant 0 : index
    %c64 = arith.constant 64 : index
    %c0_91 = arith.constant 0 : index
    %291 = vector.load %arg1[%c0_90, %c64, %c0_91] : memref<1x168x512xf32, #tpu.memory_space<vmem>>, vector<1x8x512xf32>
    %292 = vector.shape_cast %291 : vector<1x8x512xf32> to vector<8x512xf32>
    %cst_92 = arith.constant dense<0.000000e+00> : vector<8x512xf32>
    %293 = tpu.matmul %285, %3, %cst_92 {dimension_numbers = #tpu.dot_dimension_numbers<[1], [0], [0], [1], [0, 0, 1, 1], [], []>} : vector<8x128xbf16>, vector<128x512xbf16>, vector<8x512xf32> -> vector<8x512xf32>
    %294 = arith.addf %292, %293 : vector<8x512xf32>
    %295 = vector.extract_strided_slice %294 {offsets = [0, 0], sizes = [8, 128], strides = [1, 1]} : vector<8x512xf32> to vector<8x128xf32>
    %296 = arith.negf %295 : vector<8x128xf32>
    %297 = math.exp %296 : vector<8x128xf32>
    %cst_93 = arith.constant 1.000000e+00 : f32
    %298 = vector.broadcast %cst_93 : f32 to vector<8x128xf32>
    %299 = arith.addf %298, %297 : vector<8x128xf32>
    %300 = arith.divf %298, %299 : vector<8x128xf32>
    %301 = vector.extract_strided_slice %294 {offsets = [0, 128], sizes = [8, 128], strides = [1, 1]} : vector<8x512xf32> to vector<8x128xf32>
    %302 = arith.negf %301 : vector<8x128xf32>
    %303 = math.exp %302 : vector<8x128xf32>
    %cst_94 = arith.constant 1.000000e+00 : f32
    %304 = vector.broadcast %cst_94 : f32 to vector<8x128xf32>
    %305 = arith.addf %304, %303 : vector<8x128xf32>
    %306 = arith.divf %304, %305 : vector<8x128xf32>
    %307 = vector.extract_strided_slice %294 {offsets = [0, 256], sizes = [8, 128], strides = [1, 1]} : vector<8x512xf32> to vector<8x128xf32>
    %308 = math.tanh %307 : vector<8x128xf32>
    %309 = vector.extract_strided_slice %294 {offsets = [0, 384], sizes = [8, 128], strides = [1, 1]} : vector<8x512xf32> to vector<8x128xf32>
    %310 = arith.negf %309 : vector<8x128xf32>
    %311 = math.exp %310 : vector<8x128xf32>
    %cst_95 = arith.constant 1.000000e+00 : f32
    %312 = vector.broadcast %cst_95 : f32 to vector<8x128xf32>
    %313 = arith.addf %312, %311 : vector<8x128xf32>
    %314 = arith.divf %312, %313 : vector<8x128xf32>
    %315 = arith.mulf %306, %282 : vector<8x128xf32>
    %316 = arith.mulf %300, %308 : vector<8x128xf32>
    %317 = arith.addf %315, %316 : vector<8x128xf32>
    %318 = math.tanh %317 : vector<8x128xf32>
    %319 = arith.mulf %314, %318 : vector<8x128xf32>
    %320 = arith.truncf %319 : vector<8x128xf32> to vector<8x128xbf16>
    %cst_96 = arith.constant dense<0.000000e+00> : vector<8x128xf32>
    %321 = tpu.matmul %320, %4, %cst_96 {dimension_numbers = #tpu.dot_dimension_numbers<[1], [0], [0], [1], [0, 0, 1, 1], [], []>} : vector<8x128xbf16>, vector<128x128xbf16>, vector<8x128xf32> -> vector<8x128xf32>
    %322 = arith.addf %321, %7 : vector<8x128xf32>
    %c0_97 = arith.constant 0 : index
    %c64_98 = arith.constant 64 : index
    %c0_99 = arith.constant 0 : index
    %323 = vector.load %arg7[%c0_97, %c64_98, %c0_99] : memref<1x168x128xf32, #tpu.memory_space<vmem>>, vector<1x8x128xf32>
    %324 = vector.shape_cast %323 : vector<1x8x128xf32> to vector<8x128xf32>
    %325 = vector.shape_cast %322 : vector<8x128xf32> to vector<1x8x128xf32>
    tpu.vector_store %arg7[%c0_97, %c64_98, %c0_99], %325 {strides = array<i32>} : memref<1x168x128xf32, #tpu.memory_space<vmem>>, vector<1x8x128xf32>,
    %c0_100 = arith.constant 0 : index
    %c72 = arith.constant 72 : index
    %c0_101 = arith.constant 0 : index
    %326 = vector.load %arg1[%c0_100, %c72, %c0_101] : memref<1x168x512xf32, #tpu.memory_space<vmem>>, vector<1x8x512xf32>
    %327 = vector.shape_cast %326 : vector<1x8x512xf32> to vector<8x512xf32>
    %cst_102 = arith.constant dense<0.000000e+00> : vector<8x512xf32>
    %328 = tpu.matmul %320, %3, %cst_102 {dimension_numbers = #tpu.dot_dimension_numbers<[1], [0], [0], [1], [0, 0, 1, 1], [], []>} : vector<8x128xbf16>, vector<128x512xbf16>, vector<8x512xf32> -> vector<8x512xf32>
    %329 = arith.addf %327, %328 : vector<8x512xf32>
    %330 = vector.extract_strided_slice %329 {offsets = [0, 0], sizes = [8, 128], strides = [1, 1]} : vector<8x512xf32> to vector<8x128xf32>
    %331 = arith.negf %330 : vector<8x128xf32>
    %332 = math.exp %331 : vector<8x128xf32>
    %cst_103 = arith.constant 1.000000e+00 : f32
    %333 = vector.broadcast %cst_103 : f32 to vector<8x128xf32>
    %334 = arith.addf %333, %332 : vector<8x128xf32>
    %335 = arith.divf %333, %334 : vector<8x128xf32>
    %336 = vector.extract_strided_slice %329 {offsets = [0, 128], sizes = [8, 128], strides = [1, 1]} : vector<8x512xf32> to vector<8x128xf32>
    %337 = arith.negf %336 : vector<8x128xf32>
    %338 = math.exp %337 : vector<8x128xf32>
    %cst_104 = arith.constant 1.000000e+00 : f32
    %339 = vector.broadcast %cst_104 : f32 to vector<8x128xf32>
    %340 = arith.addf %339, %338 : vector<8x128xf32>
    %341 = arith.divf %339, %340 : vector<8x128xf32>
    %342 = vector.extract_strided_slice %329 {offsets = [0, 256], sizes = [8, 128], strides = [1, 1]} : vector<8x512xf32> to vector<8x128xf32>
    %343 = math.tanh %342 : vector<8x128xf32>
    %344 = vector.extract_strided_slice %329 {offsets = [0, 384], sizes = [8, 128], strides = [1, 1]} : vector<8x512xf32> to vector<8x128xf32>
    %345 = arith.negf %344 : vector<8x128xf32>
    %346 = math.exp %345 : vector<8x128xf32>
    %cst_105 = arith.constant 1.000000e+00 : f32
    %347 = vector.broadcast %cst_105 : f32 to vector<8x128xf32>
    %348 = arith.addf %347, %346 : vector<8x128xf32>
    %349 = arith.divf %347, %348 : vector<8x128xf32>
    %350 = arith.mulf %341, %317 : vector<8x128xf32>
    %351 = arith.mulf %335, %343 : vector<8x128xf32>
    %352 = arith.addf %350, %351 : vector<8x128xf32>
    %353 = math.tanh %352 : vector<8x128xf32>
    %354 = arith.mulf %349, %353 : vector<8x128xf32>
    %355 = arith.truncf %354 : vector<8x128xf32> to vector<8x128xbf16>
    %cst_106 = arith.constant dense<0.000000e+00> : vector<8x128xf32>
    %356 = tpu.matmul %355, %4, %cst_106 {dimension_numbers = #tpu.dot_dimension_numbers<[1], [0], [0], [1], [0, 0, 1, 1], [], []>} : vector<8x128xbf16>, vector<128x128xbf16>, vector<8x128xf32> -> vector<8x128xf32>
    %357 = arith.addf %356, %7 : vector<8x128xf32>
    %c0_107 = arith.constant 0 : index
    %c72_108 = arith.constant 72 : index
    %c0_109 = arith.constant 0 : index
    %358 = vector.load %arg7[%c0_107, %c72_108, %c0_109] : memref<1x168x128xf32, #tpu.memory_space<vmem>>, vector<1x8x128xf32>
    %359 = vector.shape_cast %358 : vector<1x8x128xf32> to vector<8x128xf32>
    %360 = vector.shape_cast %357 : vector<8x128xf32> to vector<1x8x128xf32>
    tpu.vector_store %arg7[%c0_107, %c72_108, %c0_109], %360 {strides = array<i32>} : memref<1x168x128xf32, #tpu.memory_space<vmem>>, vector<1x8x128xf32>,
    %c0_110 = arith.constant 0 : index
    %c80 = arith.constant 80 : index
    %c0_111 = arith.constant 0 : index
    %361 = vector.load %arg1[%c0_110, %c80, %c0_111] : memref<1x168x512xf32, #tpu.memory_space<vmem>>, vector<1x8x512xf32>
    %362 = vector.shape_cast %361 : vector<1x8x512xf32> to vector<8x512xf32>
    %cst_112 = arith.constant dense<0.000000e+00> : vector<8x512xf32>
    %363 = tpu.matmul %355, %3, %cst_112 {dimension_numbers = #tpu.dot_dimension_numbers<[1], [0], [0], [1], [0, 0, 1, 1], [], []>} : vector<8x128xbf16>, vector<128x512xbf16>, vector<8x512xf32> -> vector<8x512xf32>
    %364 = arith.addf %362, %363 : vector<8x512xf32>
    %365 = vector.extract_strided_slice %364 {offsets = [0, 0], sizes = [8, 128], strides = [1, 1]} : vector<8x512xf32> to vector<8x128xf32>
    %366 = arith.negf %365 : vector<8x128xf32>
    %367 = math.exp %366 : vector<8x128xf32>
    %cst_113 = arith.constant 1.000000e+00 : f32
    %368 = vector.broadcast %cst_113 : f32 to vector<8x128xf32>
    %369 = arith.addf %368, %367 : vector<8x128xf32>
    %370 = arith.divf %368, %369 : vector<8x128xf32>
    %371 = vector.extract_strided_slice %364 {offsets = [0, 128], sizes = [8, 128], strides = [1, 1]} : vector<8x512xf32> to vector<8x128xf32>
    %372 = arith.negf %371 : vector<8x128xf32>
    %373 = math.exp %372 : vector<8x128xf32>
    %cst_114 = arith.constant 1.000000e+00 : f32
    %374 = vector.broadcast %cst_114 : f32 to vector<8x128xf32>
    %375 = arith.addf %374, %373 : vector<8x128xf32>
    %376 = arith.divf %374, %375 : vector<8x128xf32>
    %377 = vector.extract_strided_slice %364 {offsets = [0, 256], sizes = [8, 128], strides = [1, 1]} : vector<8x512xf32> to vector<8x128xf32>
    %378 = math.tanh %377 : vector<8x128xf32>
    %379 = vector.extract_strided_slice %364 {offsets = [0, 384], sizes = [8, 128], strides = [1, 1]} : vector<8x512xf32> to vector<8x128xf32>
    %380 = arith.negf %379 : vector<8x128xf32>
    %381 = math.exp %380 : vector<8x128xf32>
    %cst_115 = arith.constant 1.000000e+00 : f32
    %382 = vector.broadcast %cst_115 : f32 to vector<8x128xf32>
    %383 = arith.addf %382, %381 : vector<8x128xf32>
    %384 = arith.divf %382, %383 : vector<8x128xf32>
    %385 = arith.mulf %376, %352 : vector<8x128xf32>
    %386 = arith.mulf %370, %378 : vector<8x128xf32>
    %387 = arith.addf %385, %386 : vector<8x128xf32>
    %388 = math.tanh %387 : vector<8x128xf32>
    %389 = arith.mulf %384, %388 : vector<8x128xf32>
    %390 = arith.truncf %389 : vector<8x128xf32> to vector<8x128xbf16>
    %cst_116 = arith.constant dense<0.000000e+00> : vector<8x128xf32>
    %391 = tpu.matmul %390, %4, %cst_116 {dimension_numbers = #tpu.dot_dimension_numbers<[1], [0], [0], [1], [0, 0, 1, 1], [], []>} : vector<8x128xbf16>, vector<128x128xbf16>, vector<8x128xf32> -> vector<8x128xf32>
    %392 = arith.addf %391, %7 : vector<8x128xf32>
    %c0_117 = arith.constant 0 : index
    %c80_118 = arith.constant 80 : index
    %c0_119 = arith.constant 0 : index
    %393 = vector.load %arg7[%c0_117, %c80_118, %c0_119] : memref<1x168x128xf32, #tpu.memory_space<vmem>>, vector<1x8x128xf32>
    %394 = vector.shape_cast %393 : vector<1x8x128xf32> to vector<8x128xf32>
    %395 = vector.shape_cast %392 : vector<8x128xf32> to vector<1x8x128xf32>
    tpu.vector_store %arg7[%c0_117, %c80_118, %c0_119], %395 {strides = array<i32>} : memref<1x168x128xf32, #tpu.memory_space<vmem>>, vector<1x8x128xf32>,
    %c0_120 = arith.constant 0 : index
    %c88 = arith.constant 88 : index
    %c0_121 = arith.constant 0 : index
    %396 = vector.load %arg1[%c0_120, %c88, %c0_121] : memref<1x168x512xf32, #tpu.memory_space<vmem>>, vector<1x8x512xf32>
    %397 = vector.shape_cast %396 : vector<1x8x512xf32> to vector<8x512xf32>
    %cst_122 = arith.constant dense<0.000000e+00> : vector<8x512xf32>
    %398 = tpu.matmul %390, %3, %cst_122 {dimension_numbers = #tpu.dot_dimension_numbers<[1], [0], [0], [1], [0, 0, 1, 1], [], []>} : vector<8x128xbf16>, vector<128x512xbf16>, vector<8x512xf32> -> vector<8x512xf32>
    %399 = arith.addf %397, %398 : vector<8x512xf32>
    %400 = vector.extract_strided_slice %399 {offsets = [0, 0], sizes = [8, 128], strides = [1, 1]} : vector<8x512xf32> to vector<8x128xf32>
    %401 = arith.negf %400 : vector<8x128xf32>
    %402 = math.exp %401 : vector<8x128xf32>
    %cst_123 = arith.constant 1.000000e+00 : f32
    %403 = vector.broadcast %cst_123 : f32 to vector<8x128xf32>
    %404 = arith.addf %403, %402 : vector<8x128xf32>
    %405 = arith.divf %403, %404 : vector<8x128xf32>
    %406 = vector.extract_strided_slice %399 {offsets = [0, 128], sizes = [8, 128], strides = [1, 1]} : vector<8x512xf32> to vector<8x128xf32>
    %407 = arith.negf %406 : vector<8x128xf32>
    %408 = math.exp %407 : vector<8x128xf32>
    %cst_124 = arith.constant 1.000000e+00 : f32
    %409 = vector.broadcast %cst_124 : f32 to vector<8x128xf32>
    %410 = arith.addf %409, %408 : vector<8x128xf32>
    %411 = arith.divf %409, %410 : vector<8x128xf32>
    %412 = vector.extract_strided_slice %399 {offsets = [0, 256], sizes = [8, 128], strides = [1, 1]} : vector<8x512xf32> to vector<8x128xf32>
    %413 = math.tanh %412 : vector<8x128xf32>
    %414 = vector.extract_strided_slice %399 {offsets = [0, 384], sizes = [8, 128], strides = [1, 1]} : vector<8x512xf32> to vector<8x128xf32>
    %415 = arith.negf %414 : vector<8x128xf32>
    %416 = math.exp %415 : vector<8x128xf32>
    %cst_125 = arith.constant 1.000000e+00 : f32
    %417 = vector.broadcast %cst_125 : f32 to vector<8x128xf32>
    %418 = arith.addf %417, %416 : vector<8x128xf32>
    %419 = arith.divf %417, %418 : vector<8x128xf32>
    %420 = arith.mulf %411, %387 : vector<8x128xf32>
    %421 = arith.mulf %405, %413 : vector<8x128xf32>
    %422 = arith.addf %420, %421 : vector<8x128xf32>
    %423 = math.tanh %422 : vector<8x128xf32>
    %424 = arith.mulf %419, %423 : vector<8x128xf32>
    %425 = arith.truncf %424 : vector<8x128xf32> to vector<8x128xbf16>
    %cst_126 = arith.constant dense<0.000000e+00> : vector<8x128xf32>
    %426 = tpu.matmul %425, %4, %cst_126 {dimension_numbers = #tpu.dot_dimension_numbers<[1], [0], [0], [1], [0, 0, 1, 1], [], []>} : vector<8x128xbf16>, vector<128x128xbf16>, vector<8x128xf32> -> vector<8x128xf32>
    %427 = arith.addf %426, %7 : vector<8x128xf32>
    %c0_127 = arith.constant 0 : index
    %c88_128 = arith.constant 88 : index
    %c0_129 = arith.constant 0 : index
    %428 = vector.load %arg7[%c0_127, %c88_128, %c0_129] : memref<1x168x128xf32, #tpu.memory_space<vmem>>, vector<1x8x128xf32>
    %429 = vector.shape_cast %428 : vector<1x8x128xf32> to vector<8x128xf32>
    %430 = vector.shape_cast %427 : vector<8x128xf32> to vector<1x8x128xf32>
    tpu.vector_store %arg7[%c0_127, %c88_128, %c0_129], %430 {strides = array<i32>} : memref<1x168x128xf32, #tpu.memory_space<vmem>>, vector<1x8x128xf32>,
    %c0_130 = arith.constant 0 : index
    %c96 = arith.constant 96 : index
    %c0_131 = arith.constant 0 : index
    %431 = vector.load %arg1[%c0_130, %c96, %c0_131] : memref<1x168x512xf32, #tpu.memory_space<vmem>>, vector<1x8x512xf32>
    %432 = vector.shape_cast %431 : vector<1x8x512xf32> to vector<8x512xf32>
    %cst_132 = arith.constant dense<0.000000e+00> : vector<8x512xf32>
    %433 = tpu.matmul %425, %3, %cst_132 {dimension_numbers = #tpu.dot_dimension_numbers<[1], [0], [0], [1], [0, 0, 1, 1], [], []>} : vector<8x128xbf16>, vector<128x512xbf16>, vector<8x512xf32> -> vector<8x512xf32>
    %434 = arith.addf %432, %433 : vector<8x512xf32>
    %435 = vector.extract_strided_slice %434 {offsets = [0, 0], sizes = [8, 128], strides = [1, 1]} : vector<8x512xf32> to vector<8x128xf32>
    %436 = arith.negf %435 : vector<8x128xf32>
    %437 = math.exp %436 : vector<8x128xf32>
    %cst_133 = arith.constant 1.000000e+00 : f32
    %438 = vector.broadcast %cst_133 : f32 to vector<8x128xf32>
    %439 = arith.addf %438, %437 : vector<8x128xf32>
    %440 = arith.divf %438, %439 : vector<8x128xf32>
    %441 = vector.extract_strided_slice %434 {offsets = [0, 128], sizes = [8, 128], strides = [1, 1]} : vector<8x512xf32> to vector<8x128xf32>
    %442 = arith.negf %441 : vector<8x128xf32>
    %443 = math.exp %442 : vector<8x128xf32>
    %cst_134 = arith.constant 1.000000e+00 : f32
    %444 = vector.broadcast %cst_134 : f32 to vector<8x128xf32>
    %445 = arith.addf %444, %443 : vector<8x128xf32>
    %446 = arith.divf %444, %445 : vector<8x128xf32>
    %447 = vector.extract_strided_slice %434 {offsets = [0, 256], sizes = [8, 128], strides = [1, 1]} : vector<8x512xf32> to vector<8x128xf32>
    %448 = math.tanh %447 : vector<8x128xf32>
    %449 = vector.extract_strided_slice %434 {offsets = [0, 384], sizes = [8, 128], strides = [1, 1]} : vector<8x512xf32> to vector<8x128xf32>
    %450 = arith.negf %449 : vector<8x128xf32>
    %451 = math.exp %450 : vector<8x128xf32>
    %cst_135 = arith.constant 1.000000e+00 : f32
    %452 = vector.broadcast %cst_135 : f32 to vector<8x128xf32>
    %453 = arith.addf %452, %451 : vector<8x128xf32>
    %454 = arith.divf %452, %453 : vector<8x128xf32>
    %455 = arith.mulf %446, %422 : vector<8x128xf32>
    %456 = arith.mulf %440, %448 : vector<8x128xf32>
    %457 = arith.addf %455, %456 : vector<8x128xf32>
    %458 = math.tanh %457 : vector<8x128xf32>
    %459 = arith.mulf %454, %458 : vector<8x128xf32>
    %460 = arith.truncf %459 : vector<8x128xf32> to vector<8x128xbf16>
    %cst_136 = arith.constant dense<0.000000e+00> : vector<8x128xf32>
    %461 = tpu.matmul %460, %4, %cst_136 {dimension_numbers = #tpu.dot_dimension_numbers<[1], [0], [0], [1], [0, 0, 1, 1], [], []>} : vector<8x128xbf16>, vector<128x128xbf16>, vector<8x128xf32> -> vector<8x128xf32>
    %462 = arith.addf %461, %7 : vector<8x128xf32>
    %c0_137 = arith.constant 0 : index
    %c96_138 = arith.constant 96 : index
    %c0_139 = arith.constant 0 : index
    %463 = vector.load %arg7[%c0_137, %c96_138, %c0_139] : memref<1x168x128xf32, #tpu.memory_space<vmem>>, vector<1x8x128xf32>
    %464 = vector.shape_cast %463 : vector<1x8x128xf32> to vector<8x128xf32>
    %465 = vector.shape_cast %462 : vector<8x128xf32> to vector<1x8x128xf32>
    tpu.vector_store %arg7[%c0_137, %c96_138, %c0_139], %465 {strides = array<i32>} : memref<1x168x128xf32, #tpu.memory_space<vmem>>, vector<1x8x128xf32>,
    %c0_140 = arith.constant 0 : index
    %c104 = arith.constant 104 : index
    %c0_141 = arith.constant 0 : index
    %466 = vector.load %arg1[%c0_140, %c104, %c0_141] : memref<1x168x512xf32, #tpu.memory_space<vmem>>, vector<1x8x512xf32>
    %467 = vector.shape_cast %466 : vector<1x8x512xf32> to vector<8x512xf32>
    %cst_142 = arith.constant dense<0.000000e+00> : vector<8x512xf32>
    %468 = tpu.matmul %460, %3, %cst_142 {dimension_numbers = #tpu.dot_dimension_numbers<[1], [0], [0], [1], [0, 0, 1, 1], [], []>} : vector<8x128xbf16>, vector<128x512xbf16>, vector<8x512xf32> -> vector<8x512xf32>
    %469 = arith.addf %467, %468 : vector<8x512xf32>
    %470 = vector.extract_strided_slice %469 {offsets = [0, 0], sizes = [8, 128], strides = [1, 1]} : vector<8x512xf32> to vector<8x128xf32>
    %471 = arith.negf %470 : vector<8x128xf32>
    %472 = math.exp %471 : vector<8x128xf32>
    %cst_143 = arith.constant 1.000000e+00 : f32
    %473 = vector.broadcast %cst_143 : f32 to vector<8x128xf32>
    %474 = arith.addf %473, %472 : vector<8x128xf32>
    %475 = arith.divf %473, %474 : vector<8x128xf32>
    %476 = vector.extract_strided_slice %469 {offsets = [0, 128], sizes = [8, 128], strides = [1, 1]} : vector<8x512xf32> to vector<8x128xf32>
    %477 = arith.negf %476 : vector<8x128xf32>
    %478 = math.exp %477 : vector<8x128xf32>
    %cst_144 = arith.constant 1.000000e+00 : f32
    %479 = vector.broadcast %cst_144 : f32 to vector<8x128xf32>
    %480 = arith.addf %479, %478 : vector<8x128xf32>
    %481 = arith.divf %479, %480 : vector<8x128xf32>
    %482 = vector.extract_strided_slice %469 {offsets = [0, 256], sizes = [8, 128], strides = [1, 1]} : vector<8x512xf32> to vector<8x128xf32>
    %483 = math.tanh %482 : vector<8x128xf32>
    %484 = vector.extract_strided_slice %469 {offsets = [0, 384], sizes = [8, 128], strides = [1, 1]} : vector<8x512xf32> to vector<8x128xf32>
    %485 = arith.negf %484 : vector<8x128xf32>
    %486 = math.exp %485 : vector<8x128xf32>
    %cst_145 = arith.constant 1.000000e+00 : f32
    %487 = vector.broadcast %cst_145 : f32 to vector<8x128xf32>
    %488 = arith.addf %487, %486 : vector<8x128xf32>
    %489 = arith.divf %487, %488 : vector<8x128xf32>
    %490 = arith.mulf %481, %457 : vector<8x128xf32>
    %491 = arith.mulf %475, %483 : vector<8x128xf32>
    %492 = arith.addf %490, %491 : vector<8x128xf32>
    %493 = math.tanh %492 : vector<8x128xf32>
    %494 = arith.mulf %489, %493 : vector<8x128xf32>
    %495 = arith.truncf %494 : vector<8x128xf32> to vector<8x128xbf16>
    %cst_146 = arith.constant dense<0.000000e+00> : vector<8x128xf32>
    %496 = tpu.matmul %495, %4, %cst_146 {dimension_numbers = #tpu.dot_dimension_numbers<[1], [0], [0], [1], [0, 0, 1, 1], [], []>} : vector<8x128xbf16>, vector<128x128xbf16>, vector<8x128xf32> -> vector<8x128xf32>
    %497 = arith.addf %496, %7 : vector<8x128xf32>
    %c0_147 = arith.constant 0 : index
    %c104_148 = arith.constant 104 : index
    %c0_149 = arith.constant 0 : index
    %498 = vector.load %arg7[%c0_147, %c104_148, %c0_149] : memref<1x168x128xf32, #tpu.memory_space<vmem>>, vector<1x8x128xf32>
    %499 = vector.shape_cast %498 : vector<1x8x128xf32> to vector<8x128xf32>
    %500 = vector.shape_cast %497 : vector<8x128xf32> to vector<1x8x128xf32>
    tpu.vector_store %arg7[%c0_147, %c104_148, %c0_149], %500 {strides = array<i32>} : memref<1x168x128xf32, #tpu.memory_space<vmem>>, vector<1x8x128xf32>,
    %c0_150 = arith.constant 0 : index
    %c112 = arith.constant 112 : index
    %c0_151 = arith.constant 0 : index
    %501 = vector.load %arg1[%c0_150, %c112, %c0_151] : memref<1x168x512xf32, #tpu.memory_space<vmem>>, vector<1x8x512xf32>
    %502 = vector.shape_cast %501 : vector<1x8x512xf32> to vector<8x512xf32>
    %cst_152 = arith.constant dense<0.000000e+00> : vector<8x512xf32>
    %503 = tpu.matmul %495, %3, %cst_152 {dimension_numbers = #tpu.dot_dimension_numbers<[1], [0], [0], [1], [0, 0, 1, 1], [], []>} : vector<8x128xbf16>, vector<128x512xbf16>, vector<8x512xf32> -> vector<8x512xf32>
    %504 = arith.addf %502, %503 : vector<8x512xf32>
    %505 = vector.extract_strided_slice %504 {offsets = [0, 0], sizes = [8, 128], strides = [1, 1]} : vector<8x512xf32> to vector<8x128xf32>
    %506 = arith.negf %505 : vector<8x128xf32>
    %507 = math.exp %506 : vector<8x128xf32>
    %cst_153 = arith.constant 1.000000e+00 : f32
    %508 = vector.broadcast %cst_153 : f32 to vector<8x128xf32>
    %509 = arith.addf %508, %507 : vector<8x128xf32>
    %510 = arith.divf %508, %509 : vector<8x128xf32>
    %511 = vector.extract_strided_slice %504 {offsets = [0, 128], sizes = [8, 128], strides = [1, 1]} : vector<8x512xf32> to vector<8x128xf32>
    %512 = arith.negf %511 : vector<8x128xf32>
    %513 = math.exp %512 : vector<8x128xf32>
    %cst_154 = arith.constant 1.000000e+00 : f32
    %514 = vector.broadcast %cst_154 : f32 to vector<8x128xf32>
    %515 = arith.addf %514, %513 : vector<8x128xf32>
    %516 = arith.divf %514, %515 : vector<8x128xf32>
    %517 = vector.extract_strided_slice %504 {offsets = [0, 256], sizes = [8, 128], strides = [1, 1]} : vector<8x512xf32> to vector<8x128xf32>
    %518 = math.tanh %517 : vector<8x128xf32>
    %519 = vector.extract_strided_slice %504 {offsets = [0, 384], sizes = [8, 128], strides = [1, 1]} : vector<8x512xf32> to vector<8x128xf32>
    %520 = arith.negf %519 : vector<8x128xf32>
    %521 = math.exp %520 : vector<8x128xf32>
    %cst_155 = arith.constant 1.000000e+00 : f32
    %522 = vector.broadcast %cst_155 : f32 to vector<8x128xf32>
    %523 = arith.addf %522, %521 : vector<8x128xf32>
    %524 = arith.divf %522, %523 : vector<8x128xf32>
    %525 = arith.mulf %516, %492 : vector<8x128xf32>
    %526 = arith.mulf %510, %518 : vector<8x128xf32>
    %527 = arith.addf %525, %526 : vector<8x128xf32>
    %528 = math.tanh %527 : vector<8x128xf32>
    %529 = arith.mulf %524, %528 : vector<8x128xf32>
    %530 = arith.truncf %529 : vector<8x128xf32> to vector<8x128xbf16>
    %cst_156 = arith.constant dense<0.000000e+00> : vector<8x128xf32>
    %531 = tpu.matmul %530, %4, %cst_156 {dimension_numbers = #tpu.dot_dimension_numbers<[1], [0], [0], [1], [0, 0, 1, 1], [], []>} : vector<8x128xbf16>, vector<128x128xbf16>, vector<8x128xf32> -> vector<8x128xf32>
    %532 = arith.addf %531, %7 : vector<8x128xf32>
    %c0_157 = arith.constant 0 : index
    %c112_158 = arith.constant 112 : index
    %c0_159 = arith.constant 0 : index
    %533 = vector.load %arg7[%c0_157, %c112_158, %c0_159] : memref<1x168x128xf32, #tpu.memory_space<vmem>>, vector<1x8x128xf32>
    %534 = vector.shape_cast %533 : vector<1x8x128xf32> to vector<8x128xf32>
    %535 = vector.shape_cast %532 : vector<8x128xf32> to vector<1x8x128xf32>
    tpu.vector_store %arg7[%c0_157, %c112_158, %c0_159], %535 {strides = array<i32>} : memref<1x168x128xf32, #tpu.memory_space<vmem>>, vector<1x8x128xf32>,
    %c0_160 = arith.constant 0 : index
    %c120 = arith.constant 120 : index
    %c0_161 = arith.constant 0 : index
    %536 = vector.load %arg1[%c0_160, %c120, %c0_161] : memref<1x168x512xf32, #tpu.memory_space<vmem>>, vector<1x8x512xf32>
    %537 = vector.shape_cast %536 : vector<1x8x512xf32> to vector<8x512xf32>
    %cst_162 = arith.constant dense<0.000000e+00> : vector<8x512xf32>
    %538 = tpu.matmul %530, %3, %cst_162 {dimension_numbers = #tpu.dot_dimension_numbers<[1], [0], [0], [1], [0, 0, 1, 1], [], []>} : vector<8x128xbf16>, vector<128x512xbf16>, vector<8x512xf32> -> vector<8x512xf32>
    %539 = arith.addf %537, %538 : vector<8x512xf32>
    %540 = vector.extract_strided_slice %539 {offsets = [0, 0], sizes = [8, 128], strides = [1, 1]} : vector<8x512xf32> to vector<8x128xf32>
    %541 = arith.negf %540 : vector<8x128xf32>
    %542 = math.exp %541 : vector<8x128xf32>
    %cst_163 = arith.constant 1.000000e+00 : f32
    %543 = vector.broadcast %cst_163 : f32 to vector<8x128xf32>
    %544 = arith.addf %543, %542 : vector<8x128xf32>
    %545 = arith.divf %543, %544 : vector<8x128xf32>
    %546 = vector.extract_strided_slice %539 {offsets = [0, 128], sizes = [8, 128], strides = [1, 1]} : vector<8x512xf32> to vector<8x128xf32>
    %547 = arith.negf %546 : vector<8x128xf32>
    %548 = math.exp %547 : vector<8x128xf32>
    %cst_164 = arith.constant 1.000000e+00 : f32
    %549 = vector.broadcast %cst_164 : f32 to vector<8x128xf32>
    %550 = arith.addf %549, %548 : vector<8x128xf32>
    %551 = arith.divf %549, %550 : vector<8x128xf32>
    %552 = vector.extract_strided_slice %539 {offsets = [0, 256], sizes = [8, 128], strides = [1, 1]} : vector<8x512xf32> to vector<8x128xf32>
    %553 = math.tanh %552 : vector<8x128xf32>
    %554 = vector.extract_strided_slice %539 {offsets = [0, 384], sizes = [8, 128], strides = [1, 1]} : vector<8x512xf32> to vector<8x128xf32>
    %555 = arith.negf %554 : vector<8x128xf32>
    %556 = math.exp %555 : vector<8x128xf32>
    %cst_165 = arith.constant 1.000000e+00 : f32
    %557 = vector.broadcast %cst_165 : f32 to vector<8x128xf32>
    %558 = arith.addf %557, %556 : vector<8x128xf32>
    %559 = arith.divf %557, %558 : vector<8x128xf32>
    %560 = arith.mulf %551, %527 : vector<8x128xf32>
    %561 = arith.mulf %545, %553 : vector<8x128xf32>
    %562 = arith.addf %560, %561 : vector<8x128xf32>
    %563 = math.tanh %562 : vector<8x128xf32>
    %564 = arith.mulf %559, %563 : vector<8x128xf32>
    %565 = arith.truncf %564 : vector<8x128xf32> to vector<8x128xbf16>
    %cst_166 = arith.constant dense<0.000000e+00> : vector<8x128xf32>
    %566 = tpu.matmul %565, %4, %cst_166 {dimension_numbers = #tpu.dot_dimension_numbers<[1], [0], [0], [1], [0, 0, 1, 1], [], []>} : vector<8x128xbf16>, vector<128x128xbf16>, vector<8x128xf32> -> vector<8x128xf32>
    %567 = arith.addf %566, %7 : vector<8x128xf32>
    %c0_167 = arith.constant 0 : index
    %c120_168 = arith.constant 120 : index
    %c0_169 = arith.constant 0 : index
    %568 = vector.load %arg7[%c0_167, %c120_168, %c0_169] : memref<1x168x128xf32, #tpu.memory_space<vmem>>, vector<1x8x128xf32>
    %569 = vector.shape_cast %568 : vector<1x8x128xf32> to vector<8x128xf32>
    %570 = vector.shape_cast %567 : vector<8x128xf32> to vector<1x8x128xf32>
    tpu.vector_store %arg7[%c0_167, %c120_168, %c0_169], %570 {strides = array<i32>} : memref<1x168x128xf32, #tpu.memory_space<vmem>>, vector<1x8x128xf32>,
    %c0_170 = arith.constant 0 : index
    %c128 = arith.constant 128 : index
    %c0_171 = arith.constant 0 : index
    %571 = vector.load %arg1[%c0_170, %c128, %c0_171] : memref<1x168x512xf32, #tpu.memory_space<vmem>>, vector<1x8x512xf32>
    %572 = vector.shape_cast %571 : vector<1x8x512xf32> to vector<8x512xf32>
    %cst_172 = arith.constant dense<0.000000e+00> : vector<8x512xf32>
    %573 = tpu.matmul %565, %3, %cst_172 {dimension_numbers = #tpu.dot_dimension_numbers<[1], [0], [0], [1], [0, 0, 1, 1], [], []>} : vector<8x128xbf16>, vector<128x512xbf16>, vector<8x512xf32> -> vector<8x512xf32>
    %574 = arith.addf %572, %573 : vector<8x512xf32>
    %575 = vector.extract_strided_slice %574 {offsets = [0, 0], sizes = [8, 128], strides = [1, 1]} : vector<8x512xf32> to vector<8x128xf32>
    %576 = arith.negf %575 : vector<8x128xf32>
    %577 = math.exp %576 : vector<8x128xf32>
    %cst_173 = arith.constant 1.000000e+00 : f32
    %578 = vector.broadcast %cst_173 : f32 to vector<8x128xf32>
    %579 = arith.addf %578, %577 : vector<8x128xf32>
    %580 = arith.divf %578, %579 : vector<8x128xf32>
    %581 = vector.extract_strided_slice %574 {offsets = [0, 128], sizes = [8, 128], strides = [1, 1]} : vector<8x512xf32> to vector<8x128xf32>
    %582 = arith.negf %581 : vector<8x128xf32>
    %583 = math.exp %582 : vector<8x128xf32>
    %cst_174 = arith.constant 1.000000e+00 : f32
    %584 = vector.broadcast %cst_174 : f32 to vector<8x128xf32>
    %585 = arith.addf %584, %583 : vector<8x128xf32>
    %586 = arith.divf %584, %585 : vector<8x128xf32>
    %587 = vector.extract_strided_slice %574 {offsets = [0, 256], sizes = [8, 128], strides = [1, 1]} : vector<8x512xf32> to vector<8x128xf32>
    %588 = math.tanh %587 : vector<8x128xf32>
    %589 = vector.extract_strided_slice %574 {offsets = [0, 384], sizes = [8, 128], strides = [1, 1]} : vector<8x512xf32> to vector<8x128xf32>
    %590 = arith.negf %589 : vector<8x128xf32>
    %591 = math.exp %590 : vector<8x128xf32>
    %cst_175 = arith.constant 1.000000e+00 : f32
    %592 = vector.broadcast %cst_175 : f32 to vector<8x128xf32>
    %593 = arith.addf %592, %591 : vector<8x128xf32>
    %594 = arith.divf %592, %593 : vector<8x128xf32>
    %595 = arith.mulf %586, %562 : vector<8x128xf32>
    %596 = arith.mulf %580, %588 : vector<8x128xf32>
    %597 = arith.addf %595, %596 : vector<8x128xf32>
    %598 = math.tanh %597 : vector<8x128xf32>
    %599 = arith.mulf %594, %598 : vector<8x128xf32>
    %600 = arith.truncf %599 : vector<8x128xf32> to vector<8x128xbf16>
    %cst_176 = arith.constant dense<0.000000e+00> : vector<8x128xf32>
    %601 = tpu.matmul %600, %4, %cst_176 {dimension_numbers = #tpu.dot_dimension_numbers<[1], [0], [0], [1], [0, 0, 1, 1], [], []>} : vector<8x128xbf16>, vector<128x128xbf16>, vector<8x128xf32> -> vector<8x128xf32>
    %602 = arith.addf %601, %7 : vector<8x128xf32>
    %c0_177 = arith.constant 0 : index
    %c128_178 = arith.constant 128 : index
    %c0_179 = arith.constant 0 : index
    %603 = vector.load %arg7[%c0_177, %c128_178, %c0_179] : memref<1x168x128xf32, #tpu.memory_space<vmem>>, vector<1x8x128xf32>
    %604 = vector.shape_cast %603 : vector<1x8x128xf32> to vector<8x128xf32>
    %605 = vector.shape_cast %602 : vector<8x128xf32> to vector<1x8x128xf32>
    tpu.vector_store %arg7[%c0_177, %c128_178, %c0_179], %605 {strides = array<i32>} : memref<1x168x128xf32, #tpu.memory_space<vmem>>, vector<1x8x128xf32>,
    %c0_180 = arith.constant 0 : index
    %c136 = arith.constant 136 : index
    %c0_181 = arith.constant 0 : index
    %606 = vector.load %arg1[%c0_180, %c136, %c0_181] : memref<1x168x512xf32, #tpu.memory_space<vmem>>, vector<1x8x512xf32>
    %607 = vector.shape_cast %606 : vector<1x8x512xf32> to vector<8x512xf32>
    %cst_182 = arith.constant dense<0.000000e+00> : vector<8x512xf32>
    %608 = tpu.matmul %600, %3, %cst_182 {dimension_numbers = #tpu.dot_dimension_numbers<[1], [0], [0], [1], [0, 0, 1, 1], [], []>} : vector<8x128xbf16>, vector<128x512xbf16>, vector<8x512xf32> -> vector<8x512xf32>
    %609 = arith.addf %607, %608 : vector<8x512xf32>
    %610 = vector.extract_strided_slice %609 {offsets = [0, 0], sizes = [8, 128], strides = [1, 1]} : vector<8x512xf32> to vector<8x128xf32>
    %611 = arith.negf %610 : vector<8x128xf32>
    %612 = math.exp %611 : vector<8x128xf32>
    %cst_183 = arith.constant 1.000000e+00 : f32
    %613 = vector.broadcast %cst_183 : f32 to vector<8x128xf32>
    %614 = arith.addf %613, %612 : vector<8x128xf32>
    %615 = arith.divf %613, %614 : vector<8x128xf32>
    %616 = vector.extract_strided_slice %609 {offsets = [0, 128], sizes = [8, 128], strides = [1, 1]} : vector<8x512xf32> to vector<8x128xf32>
    %617 = arith.negf %616 : vector<8x128xf32>
    %618 = math.exp %617 : vector<8x128xf32>
    %cst_184 = arith.constant 1.000000e+00 : f32
    %619 = vector.broadcast %cst_184 : f32 to vector<8x128xf32>
    %620 = arith.addf %619, %618 : vector<8x128xf32>
    %621 = arith.divf %619, %620 : vector<8x128xf32>
    %622 = vector.extract_strided_slice %609 {offsets = [0, 256], sizes = [8, 128], strides = [1, 1]} : vector<8x512xf32> to vector<8x128xf32>
    %623 = math.tanh %622 : vector<8x128xf32>
    %624 = vector.extract_strided_slice %609 {offsets = [0, 384], sizes = [8, 128], strides = [1, 1]} : vector<8x512xf32> to vector<8x128xf32>
    %625 = arith.negf %624 : vector<8x128xf32>
    %626 = math.exp %625 : vector<8x128xf32>
    %cst_185 = arith.constant 1.000000e+00 : f32
    %627 = vector.broadcast %cst_185 : f32 to vector<8x128xf32>
    %628 = arith.addf %627, %626 : vector<8x128xf32>
    %629 = arith.divf %627, %628 : vector<8x128xf32>
    %630 = arith.mulf %621, %597 : vector<8x128xf32>
    %631 = arith.mulf %615, %623 : vector<8x128xf32>
    %632 = arith.addf %630, %631 : vector<8x128xf32>
    %633 = math.tanh %632 : vector<8x128xf32>
    %634 = arith.mulf %629, %633 : vector<8x128xf32>
    %635 = arith.truncf %634 : vector<8x128xf32> to vector<8x128xbf16>
    %cst_186 = arith.constant dense<0.000000e+00> : vector<8x128xf32>
    %636 = tpu.matmul %635, %4, %cst_186 {dimension_numbers = #tpu.dot_dimension_numbers<[1], [0], [0], [1], [0, 0, 1, 1], [], []>} : vector<8x128xbf16>, vector<128x128xbf16>, vector<8x128xf32> -> vector<8x128xf32>
    %637 = arith.addf %636, %7 : vector<8x128xf32>
    %c0_187 = arith.constant 0 : index
    %c136_188 = arith.constant 136 : index
    %c0_189 = arith.constant 0 : index
    %638 = vector.load %arg7[%c0_187, %c136_188, %c0_189] : memref<1x168x128xf32, #tpu.memory_space<vmem>>, vector<1x8x128xf32>
    %639 = vector.shape_cast %638 : vector<1x8x128xf32> to vector<8x128xf32>
    %640 = vector.shape_cast %637 : vector<8x128xf32> to vector<1x8x128xf32>
    tpu.vector_store %arg7[%c0_187, %c136_188, %c0_189], %640 {strides = array<i32>} : memref<1x168x128xf32, #tpu.memory_space<vmem>>, vector<1x8x128xf32>,
    %c0_190 = arith.constant 0 : index
    %c144 = arith.constant 144 : index
    %c0_191 = arith.constant 0 : index
    %641 = vector.load %arg1[%c0_190, %c144, %c0_191] : memref<1x168x512xf32, #tpu.memory_space<vmem>>, vector<1x8x512xf32>
    %642 = vector.shape_cast %641 : vector<1x8x512xf32> to vector<8x512xf32>
    %cst_192 = arith.constant dense<0.000000e+00> : vector<8x512xf32>
    %643 = tpu.matmul %635, %3, %cst_192 {dimension_numbers = #tpu.dot_dimension_numbers<[1], [0], [0], [1], [0, 0, 1, 1], [], []>} : vector<8x128xbf16>, vector<128x512xbf16>, vector<8x512xf32> -> vector<8x512xf32>
    %644 = arith.addf %642, %643 : vector<8x512xf32>
    %645 = vector.extract_strided_slice %644 {offsets = [0, 0], sizes = [8, 128], strides = [1, 1]} : vector<8x512xf32> to vector<8x128xf32>
    %646 = arith.negf %645 : vector<8x128xf32>
    %647 = math.exp %646 : vector<8x128xf32>
    %cst_193 = arith.constant 1.000000e+00 : f32
    %648 = vector.broadcast %cst_193 : f32 to vector<8x128xf32>
    %649 = arith.addf %648, %647 : vector<8x128xf32>
    %650 = arith.divf %648, %649 : vector<8x128xf32>
    %651 = vector.extract_strided_slice %644 {offsets = [0, 128], sizes = [8, 128], strides = [1, 1]} : vector<8x512xf32> to vector<8x128xf32>
    %652 = arith.negf %651 : vector<8x128xf32>
    %653 = math.exp %652 : vector<8x128xf32>
    %cst_194 = arith.constant 1.000000e+00 : f32
    %654 = vector.broadcast %cst_194 : f32 to vector<8x128xf32>
    %655 = arith.addf %654, %653 : vector<8x128xf32>
    %656 = arith.divf %654, %655 : vector<8x128xf32>
    %657 = vector.extract_strided_slice %644 {offsets = [0, 256], sizes = [8, 128], strides = [1, 1]} : vector<8x512xf32> to vector<8x128xf32>
    %658 = math.tanh %657 : vector<8x128xf32>
    %659 = vector.extract_strided_slice %644 {offsets = [0, 384], sizes = [8, 128], strides = [1, 1]} : vector<8x512xf32> to vector<8x128xf32>
    %660 = arith.negf %659 : vector<8x128xf32>
    %661 = math.exp %660 : vector<8x128xf32>
    %cst_195 = arith.constant 1.000000e+00 : f32
    %662 = vector.broadcast %cst_195 : f32 to vector<8x128xf32>
    %663 = arith.addf %662, %661 : vector<8x128xf32>
    %664 = arith.divf %662, %663 : vector<8x128xf32>
    %665 = arith.mulf %656, %632 : vector<8x128xf32>
    %666 = arith.mulf %650, %658 : vector<8x128xf32>
    %667 = arith.addf %665, %666 : vector<8x128xf32>
    %668 = math.tanh %667 : vector<8x128xf32>
    %669 = arith.mulf %664, %668 : vector<8x128xf32>
    %670 = arith.truncf %669 : vector<8x128xf32> to vector<8x128xbf16>
    %cst_196 = arith.constant dense<0.000000e+00> : vector<8x128xf32>
    %671 = tpu.matmul %670, %4, %cst_196 {dimension_numbers = #tpu.dot_dimension_numbers<[1], [0], [0], [1], [0, 0, 1, 1], [], []>} : vector<8x128xbf16>, vector<128x128xbf16>, vector<8x128xf32> -> vector<8x128xf32>
    %672 = arith.addf %671, %7 : vector<8x128xf32>
    %c0_197 = arith.constant 0 : index
    %c144_198 = arith.constant 144 : index
    %c0_199 = arith.constant 0 : index
    %673 = vector.load %arg7[%c0_197, %c144_198, %c0_199] : memref<1x168x128xf32, #tpu.memory_space<vmem>>, vector<1x8x128xf32>
    %674 = vector.shape_cast %673 : vector<1x8x128xf32> to vector<8x128xf32>
    %675 = vector.shape_cast %672 : vector<8x128xf32> to vector<1x8x128xf32>
    tpu.vector_store %arg7[%c0_197, %c144_198, %c0_199], %675 {strides = array<i32>} : memref<1x168x128xf32, #tpu.memory_space<vmem>>, vector<1x8x128xf32>,
    %c0_200 = arith.constant 0 : index
    %c152 = arith.constant 152 : index
    %c0_201 = arith.constant 0 : index
    %676 = vector.load %arg1[%c0_200, %c152, %c0_201] : memref<1x168x512xf32, #tpu.memory_space<vmem>>, vector<1x8x512xf32>
    %677 = vector.shape_cast %676 : vector<1x8x512xf32> to vector<8x512xf32>
    %cst_202 = arith.constant dense<0.000000e+00> : vector<8x512xf32>
    %678 = tpu.matmul %670, %3, %cst_202 {dimension_numbers = #tpu.dot_dimension_numbers<[1], [0], [0], [1], [0, 0, 1, 1], [], []>} : vector<8x128xbf16>, vector<128x512xbf16>, vector<8x512xf32> -> vector<8x512xf32>
    %679 = arith.addf %677, %678 : vector<8x512xf32>
    %680 = vector.extract_strided_slice %679 {offsets = [0, 0], sizes = [8, 128], strides = [1, 1]} : vector<8x512xf32> to vector<8x128xf32>
    %681 = arith.negf %680 : vector<8x128xf32>
    %682 = math.exp %681 : vector<8x128xf32>
    %cst_203 = arith.constant 1.000000e+00 : f32
    %683 = vector.broadcast %cst_203 : f32 to vector<8x128xf32>
    %684 = arith.addf %683, %682 : vector<8x128xf32>
    %685 = arith.divf %683, %684 : vector<8x128xf32>
    %686 = vector.extract_strided_slice %679 {offsets = [0, 128], sizes = [8, 128], strides = [1, 1]} : vector<8x512xf32> to vector<8x128xf32>
    %687 = arith.negf %686 : vector<8x128xf32>
    %688 = math.exp %687 : vector<8x128xf32>
    %cst_204 = arith.constant 1.000000e+00 : f32
    %689 = vector.broadcast %cst_204 : f32 to vector<8x128xf32>
    %690 = arith.addf %689, %688 : vector<8x128xf32>
    %691 = arith.divf %689, %690 : vector<8x128xf32>
    %692 = vector.extract_strided_slice %679 {offsets = [0, 256], sizes = [8, 128], strides = [1, 1]} : vector<8x512xf32> to vector<8x128xf32>
    %693 = math.tanh %692 : vector<8x128xf32>
    %694 = vector.extract_strided_slice %679 {offsets = [0, 384], sizes = [8, 128], strides = [1, 1]} : vector<8x512xf32> to vector<8x128xf32>
    %695 = arith.negf %694 : vector<8x128xf32>
    %696 = math.exp %695 : vector<8x128xf32>
    %cst_205 = arith.constant 1.000000e+00 : f32
    %697 = vector.broadcast %cst_205 : f32 to vector<8x128xf32>
    %698 = arith.addf %697, %696 : vector<8x128xf32>
    %699 = arith.divf %697, %698 : vector<8x128xf32>
    %700 = arith.mulf %691, %667 : vector<8x128xf32>
    %701 = arith.mulf %685, %693 : vector<8x128xf32>
    %702 = arith.addf %700, %701 : vector<8x128xf32>
    %703 = math.tanh %702 : vector<8x128xf32>
    %704 = arith.mulf %699, %703 : vector<8x128xf32>
    %705 = arith.truncf %704 : vector<8x128xf32> to vector<8x128xbf16>
    %cst_206 = arith.constant dense<0.000000e+00> : vector<8x128xf32>
    %706 = tpu.matmul %705, %4, %cst_206 {dimension_numbers = #tpu.dot_dimension_numbers<[1], [0], [0], [1], [0, 0, 1, 1], [], []>} : vector<8x128xbf16>, vector<128x128xbf16>, vector<8x128xf32> -> vector<8x128xf32>
    %707 = arith.addf %706, %7 : vector<8x128xf32>
    %c0_207 = arith.constant 0 : index
    %c152_208 = arith.constant 152 : index
    %c0_209 = arith.constant 0 : index
    %708 = vector.load %arg7[%c0_207, %c152_208, %c0_209] : memref<1x168x128xf32, #tpu.memory_space<vmem>>, vector<1x8x128xf32>
    %709 = vector.shape_cast %708 : vector<1x8x128xf32> to vector<8x128xf32>
    %710 = vector.shape_cast %707 : vector<8x128xf32> to vector<1x8x128xf32>
    tpu.vector_store %arg7[%c0_207, %c152_208, %c0_209], %710 {strides = array<i32>} : memref<1x168x128xf32, #tpu.memory_space<vmem>>, vector<1x8x128xf32>,
    %c0_210 = arith.constant 0 : index
    %c160 = arith.constant 160 : index
    %c0_211 = arith.constant 0 : index
    %711 = vector.load %arg1[%c0_210, %c160, %c0_211] : memref<1x168x512xf32, #tpu.memory_space<vmem>>, vector<1x8x512xf32>
    %712 = vector.shape_cast %711 : vector<1x8x512xf32> to vector<8x512xf32>
    %cst_212 = arith.constant dense<0.000000e+00> : vector<8x512xf32>
    %713 = tpu.matmul %705, %3, %cst_212 {dimension_numbers = #tpu.dot_dimension_numbers<[1], [0], [0], [1], [0, 0, 1, 1], [], []>} : vector<8x128xbf16>, vector<128x512xbf16>, vector<8x512xf32> -> vector<8x512xf32>
    %714 = arith.addf %712, %713 : vector<8x512xf32>
    %715 = vector.extract_strided_slice %714 {offsets = [0, 0], sizes = [8, 128], strides = [1, 1]} : vector<8x512xf32> to vector<8x128xf32>
    %716 = arith.negf %715 : vector<8x128xf32>
    %717 = math.exp %716 : vector<8x128xf32>
    %cst_213 = arith.constant 1.000000e+00 : f32
    %718 = vector.broadcast %cst_213 : f32 to vector<8x128xf32>
    %719 = arith.addf %718, %717 : vector<8x128xf32>
    %720 = arith.divf %718, %719 : vector<8x128xf32>
    %721 = vector.extract_strided_slice %714 {offsets = [0, 128], sizes = [8, 128], strides = [1, 1]} : vector<8x512xf32> to vector<8x128xf32>
    %722 = arith.negf %721 : vector<8x128xf32>
    %723 = math.exp %722 : vector<8x128xf32>
    %cst_214 = arith.constant 1.000000e+00 : f32
    %724 = vector.broadcast %cst_214 : f32 to vector<8x128xf32>
    %725 = arith.addf %724, %723 : vector<8x128xf32>
    %726 = arith.divf %724, %725 : vector<8x128xf32>
    %727 = vector.extract_strided_slice %714 {offsets = [0, 256], sizes = [8, 128], strides = [1, 1]} : vector<8x512xf32> to vector<8x128xf32>
    %728 = math.tanh %727 : vector<8x128xf32>
    %729 = vector.extract_strided_slice %714 {offsets = [0, 384], sizes = [8, 128], strides = [1, 1]} : vector<8x512xf32> to vector<8x128xf32>
    %730 = arith.negf %729 : vector<8x128xf32>
    %731 = math.exp %730 : vector<8x128xf32>
    %cst_215 = arith.constant 1.000000e+00 : f32
    %732 = vector.broadcast %cst_215 : f32 to vector<8x128xf32>
    %733 = arith.addf %732, %731 : vector<8x128xf32>
    %734 = arith.divf %732, %733 : vector<8x128xf32>
    %735 = arith.mulf %726, %702 : vector<8x128xf32>
    %736 = arith.mulf %720, %728 : vector<8x128xf32>
    %737 = arith.addf %735, %736 : vector<8x128xf32>
    %738 = math.tanh %737 : vector<8x128xf32>
    %739 = arith.mulf %734, %738 : vector<8x128xf32>
    %740 = arith.truncf %739 : vector<8x128xf32> to vector<8x128xbf16>
    %cst_216 = arith.constant dense<0.000000e+00> : vector<8x128xf32>
    %741 = tpu.matmul %740, %4, %cst_216 {dimension_numbers = #tpu.dot_dimension_numbers<[1], [0], [0], [1], [0, 0, 1, 1], [], []>} : vector<8x128xbf16>, vector<128x128xbf16>, vector<8x128xf32> -> vector<8x128xf32>
    %742 = arith.addf %741, %7 : vector<8x128xf32>
    %c0_217 = arith.constant 0 : index
    %c160_218 = arith.constant 160 : index
    %c0_219 = arith.constant 0 : index
    %743 = vector.load %arg7[%c0_217, %c160_218, %c0_219] : memref<1x168x128xf32, #tpu.memory_space<vmem>>, vector<1x8x128xf32>
    %744 = vector.shape_cast %743 : vector<1x8x128xf32> to vector<8x128xf32>
    %745 = vector.shape_cast %742 : vector<8x128xf32> to vector<1x8x128xf32>
    tpu.vector_store %arg7[%c0_217, %c160_218, %c0_219], %745 {strides = array<i32>} : memref<1x168x128xf32, #tpu.memory_space<vmem>>, vector<1x8x128xf32>,
    %c0_220 = arith.constant 0 : index
    %c0_221 = arith.constant 0 : index
    %746 = vector.load %arg8[%c0_220, %c0_221] : memref<8x128xf32, #tpu.memory_space<vmem>>, vector<8x128xf32>
    tpu.vector_store %arg8[%c0_220, %c0_221], %739 {strides = array<i32>} : memref<8x128xf32, #tpu.memory_space<vmem>>, vector<8x128xf32>,
    %c0_222 = arith.constant 0 : index
    %c0_223 = arith.constant 0 : index
    %747 = vector.load %arg9[%c0_222, %c0_223] : memref<8x128xf32, #tpu.memory_space<vmem>>, vector<8x128xf32>
    tpu.vector_store %arg9[%c0_222, %c0_223], %737 {strides = array<i32>} : memref<8x128xf32, #tpu.memory_space<vmem>>, vector<8x128xf32>,
    return
  }
  func.func @transform_0(%arg0: i32) -> (i32, i32, i32) {
    %c0_i32 = arith.constant 0 : i32
    %c0_i32_0 = arith.constant 0 : i32
    %c0_i32_1 = arith.constant 0 : i32
    return %arg0, %c0_i32, %c0_i32_0 : i32, i32, i32
  }
  func.func @transform_1(%arg0: i32) -> (i32, i32) {
    %c0_i32 = arith.constant 0 : i32
    %c0_i32_0 = arith.constant 0 : i32
    %c0_i32_1 = arith.constant 0 : i32
    return %c0_i32, %c0_i32_0 : i32, i32
  }
  func.func @transform_2(%arg0: i32) -> (i32, i32) {
    %c0_i32 = arith.constant 0 : i32
    %c0_i32_0 = arith.constant 0 : i32
    %c0_i32_1 = arith.constant 0 : i32
    return %c0_i32, %c0_i32_0 : i32, i32
  }
  func.func @transform_3(%arg0: i32) -> (i32, i32) {
    %c0_i32 = arith.constant 0 : i32
    %c0_i32_0 = arith.constant 0 : i32
    %c0_i32_1 = arith.constant 0 : i32
    return %c0_i32, %c0_i32_0 : i32, i32
  }
  func.func @transform_4(%arg0: i32) -> (i32, i32) {
    %c0_i32 = arith.constant 0 : i32
    %c0_i32_0 = arith.constant 0 : i32
    %c0_i32_1 = arith.constant 0 : i32
    return %c0_i32, %c0_i32_0 : i32, i32
  }
  func.func @transform_5(%arg0: i32) -> (i32, i32) {
    %c0_i32 = arith.constant 0 : i32
    %c0_i32_0 = arith.constant 0 : i32
    %c0_i32_1 = arith.constant 0 : i32
    return %c0_i32, %c0_i32_0 : i32, i32
  }
  func.func @transform_6(%arg0: i32) -> (i32, i32, i32) {
    %c0_i32 = arith.constant 0 : i32
    %c0_i32_0 = arith.constant 0 : i32
    %c0_i32_1 = arith.constant 0 : i32
    return %arg0, %c0_i32, %c0_i32_0 : i32, i32, i32
  }
  func.func @transform_7(%arg0: i32) -> (i32, i32) {
    %c0_i32 = arith.constant 0 : i32
    %c0_i32_0 = arith.constant 0 : i32
    %c0_i32_1 = arith.constant 0 : i32
    return %c0_i32, %c0_i32_0 : i32, i32
  }
  func.func @transform_8(%arg0: i32) -> (i32, i32) {
    %c0_i32 = arith.constant 0 : i32
    %c0_i32_0 = arith.constant 0 : i32
    %c0_i32_1 = arith.constant 0 : i32
    return %c0_i32, %c0_i32_0 : i32, i32
  }
}

</mosaic_0001>

<bundles_post_ra>
// kernel: tpu_custom_call.1
= control target key start
LH: loop header
LB: loop body
LE: loop exit
PB: predicated region body
PF: predicated region fallthrough
CT: control target
= control target key end

     0   :  { %14 = vsyncpa [#allocation3], 0  ;;  %s6780_s0 = inlined_call_operand.hbm [shape: f32[1,168,512], index: 0, kind: input, shape index: {}]   ;;  %s6781_s1 = inlined_call_operand.hbm [shape: bf16[128,512], index: 1, kind: input, shape index: {}]   ;;  %s6782_s2 = inlined_call_operand.hbm [shape: f32[8,128], index: 2, kind: input, shape index: {}]   ;;  %s6783_s3 = inlined_call_operand.vmem [shape: f32[8,128], index: 3, kind: input, shape index: {}]   ;;  %s6784_s4 = inlined_call_operand.hbm [shape: bf16[128,128], index: 4, kind: input, shape index: {}]   ;;  %s6785_s5 = inlined_call_operand.vmem [shape: f32[1,128], index: 5, kind: input, shape index: {}]   ;;  %s6786_s6 = inlined_call_operand.hbm [shape: f32[1,168,128], index: 6, kind: output, shape index: {0}]   ;;  %s6787_s7 = inlined_call_operand.hbm [shape: f32[8,128], index: 7, kind: output, shape index: {1}]   ;;  %s6788_s8 = inlined_call_operand.hbm [shape: f32[8,128], index: 8, kind: output, shape index: {2}]  }
   0x1   :  { %15 = vsyncpa [#allocation6], 0 }
   0x2   :  { %16 = vsyncpa [#allocation9], 0 }
   0x3   :  { %17 = vsyncpa [#allocation4], 0 }
   0x4   :  { %18 = vsyncpa [#allocation12], 0  ;;  %s5115_s27 = smov [#allocation5]   ;;  %s4951_s9 = scalar_lea.hbm %s6781_s1, 4096 }
   0x5   :  { %s36_s28 = sshll.u32 %s5115_s27, 4  ;;  %p4952_p0 = scmp.ne.s32.totalorder %s6781_s1, %s4951_s9  ;;  %s37_s28 = int_to_ptr.vmem [resolvable:$true] %s36_s28 }
   0x6   :  { %p4955_p1 = scmp.lt.u32.totalorder %s4951_s9, %s6781_s1 }
   0x8   :  { %p4957_p2 = pnand %p4955_p1, %p4952_p0 }
   0xa   :  { %4960 = shalt.err (!%p4957_p2)
}
   0xb   :  { %s4961_s14 = scalar_lea.vmem %s37_s28, 4096  ;;  %p4966_p4 = scmp.lt.s32.totalorder %s37_s28, %s37_s28 }
   0xc   :  { %p4962_p3 = scmp.ne.s32.totalorder %s37_s28, %s4961_s14  ;;  %p4967_p5 = scmp.lt.s32.totalorder %s4961_s14, %s4961_s14 }
   0xe   :  { %p4968_p6 = por %p4967_p5, %p4966_p4 }
  0x10   :  { %p4969_p7 = pnand %p4968_p6, %p4962_p3 }
  0x12   :  { %4972 = shalt.err (!%p4969_p7)
}
  0x13   :  { %s5116_s15 = smov 256   ;;  %s5117_s16 = smov 16  }
  0x14   :  { %42 = dma.hbm_to_vmem [thread:$0]  %s6781_s1, 4096, %s37_s28, [#allocation6], %s5116_s15, %s5116_s15, %s5117_s16  }
  0x15   :  { %s5118_s19 = smov [#allocation2]   ;;  %s4973_s23 = scalar_lea.hbm %s6780_s0, 10752 }
  0x16   :  { %s24_s20 = sshll.u32 %s5118_s19, 4  ;;  %p4974_p8 = scmp.ne.s32.totalorder %s6780_s0, %s4973_s23  ;;  %s25_s20 = int_to_ptr.vmem [resolvable:$true] %s24_s20 }
  0x17   :  { %p4977_p9 = scmp.lt.u32.totalorder %s4973_s23, %s6780_s0 }
  0x19   :  { %p4979_p10 = pnand %p4977_p9, %p4974_p8 }
  0x1b   :  { %4982 = shalt.err (!%p4979_p10)
}
  0x1c   :  { %s4983_s29 = scalar_lea.vmem %s25_s20, 10752  ;;  %p4988_p12 = scmp.lt.s32.totalorder %s25_s20, %s25_s20 }
  0x1d   :  { %p4984_p11 = scmp.ne.s32.totalorder %s25_s20, %s4983_s29  ;;  %p4989_p13 = scmp.lt.s32.totalorder %s4983_s29, %s4983_s29 }
  0x1f   :  { %p4990_p0 = por %p4989_p13, %p4988_p12 }
  0x21   :  { %p4991_p1 = pnand %p4990_p0, %p4984_p11 }
  0x23   :  { %4994 = shalt.err (!%p4991_p1)
}
  0x24   :  { %s5119_s1 = smov 512   ;;  %s5120_s28 = smov 32  }
  0x25   :  { %30 = dma.hbm_to_vmem [thread:$0]  %s6780_s0, 10752, %s25_s20, [#allocation3], %s5119_s1, %s5119_s1, %s5120_s28  }
  0x26   :  { %s5121_s10 = smov [#allocation7]   ;;  %s5122_s12 = smov [#allocation8]  }
  0x27   :  { %s49_s11 = sshll.u32 %s5121_s10, 4  ;;  %s60_s13 = sshll.u32 %s5122_s12, 4  ;;  %s50_s11 = int_to_ptr.vmem [resolvable:$true] %s49_s11  ;;  %s5202_s13 = int_to_ptr.vmem [resolvable:$true] %s60_s13 }
  0x28   :  { %s4995_s16 = scalar_lea.hbm %s6782_s2, 128 }
  0x29   :  { %p4996_p2 = scmp.ne.s32.totalorder %s6782_s2, %s4995_s16  ;;  %p4999_p3 = scmp.lt.u32.totalorder %s4995_s16, %s6782_s2 }
  0x2b   :  { %p5001_p4 = pnand %p4999_p3, %p4996_p2 }
  0x2d   :  { %5004 = shalt.err (!%p5001_p4)
}
  0x2e   :  { %s5005_s0 = scalar_lea.vmem %s50_s11, 128  ;;  %p5010_p6 = scmp.lt.s32.totalorder %s50_s11, %s50_s11 }
  0x2f   :  { %p5006_p5 = scmp.ne.s32.totalorder %s50_s11, %s5005_s0  ;;  %p5011_p7 = scmp.lt.s32.totalorder %s5005_s0, %s5005_s0 }
  0x31   :  { %p5012_p8 = por %p5011_p7, %p5010_p6 }
  0x33   :  { %p5013_p9 = pnand %p5012_p8, %p5006_p5 }
  0x35   :  { %5016 = shalt.err (!%p5013_p9)
}
  0x36   :  { %52 = dma.hbm_to_vmem [thread:$0]  %s6782_s2, 128, %s50_s11, [#allocation6]  }
  0x37   :  { %s5017_s25 = scalar_lea.hbm %s6784_s4, 1024 }
  0x38   :  { %p5018_p10 = scmp.ne.s32.totalorder %s6784_s4, %s5017_s25  ;;  %p5021_p11 = scmp.lt.u32.totalorder %s5017_s25, %s6784_s4 }
  0x3a   :  { %p5023_p12 = pnand %p5021_p11, %p5018_p10 }
  0x3c   :  { %5026 = shalt.err (!%p5023_p12)
}
  0x3d   :  { %s5027_s28 = scalar_lea.vmem %s5202_s13, 1024  ;;  %p5032_p0 = scmp.lt.s32.totalorder %s5202_s13, %s5202_s13 }
  0x3e   :  { %p5028_p13 = scmp.ne.s32.totalorder %s5202_s13, %s5027_s28  ;;  %p5033_p1 = scmp.lt.s32.totalorder %s5027_s28, %s5027_s28 }
  0x40   :  { %p5034_p2 = por %p5033_p1, %p5032_p0 }
  0x42   :  { %p5035_p3 = pnand %p5034_p2, %p5028_p13 }
  0x44   :  { %5038 = shalt.err (!%p5035_p3)
}
  0x45   :  { %s5123_s2 = smov 64   ;;  %s5124_s30 = smov 4  }
  0x46   :  { %66 = dma.hbm_to_vmem [thread:$0]  %s6784_s4, 1024, %s5202_s13, [#allocation9], %s5123_s2, %s5123_s2, %s5124_s30  }
  0x47   :  { %5105 = dma.done.wait [#allocation3], 10752  }
  0x48   :  { %5106 = vsyncadd [#allocation3], 4294956544 }
  0x49   :  { %5107 = dma.done.wait [#allocation6], 4224  }
  0x4a   :  { %5108 = vsyncadd [#allocation6], 4294963072 }
  0x4b   :  { %5109 = dma.done.wait [#allocation9], 1024  }
  0x4c   :  { %5110 = vsyncadd [#allocation9], 4294966272  ;;  %v5125_v0 = vmov 0   ;;  %v5235_v1 = vld [vmem:[#allocation5 + $0x4] ss:$16 sps:$4 sm:$0xff]   ;;  %v5348_v35 = vld [vmem:[#allocation8] sm:$0xff]  }
  0x4d   :  { %344 = vmatprep.mubr.bf16.mxu0 %v5125_v0  ;;  %385 = vmatprep.mubr.bf16.mxu1 %v5125_v0  ;;  %v5237_v2 = vld [vmem:[#allocation5] ss:$16 sps:$4 sm:$0xff]   ;;  %v5240_v3 = vld [vmem:[#allocation5 + $0x24] ss:$16 sps:$4 sm:$0xff]   ;;  %v5248_v6 = vld [vmem:[#allocation5 + $0xc] ss:$16 sps:$4 sm:$0xff]  }
  0x4e   :  { %312 = vmatprep.subr.bf16.mxu0 %v5235_v1  ;;  %v5243_v4 = vld [vmem:[#allocation5 + $0x20] ss:$16 sps:$4 sm:$0xff]   ;;  %v5246_v5 = vld [vmem:[#allocation5 + $0x44] ss:$16 sps:$4 sm:$0xff]   ;;  %v5250_v7 = vld [vmem:[#allocation5 + $0x8] ss:$16 sps:$4 sm:$0xff]   ;;  %353 = vmatprep.subr.bf16.mxu1 %v5248_v6 }
  0x4f   :  { %313 = vmatpush1.bf16.msra.mxu0 %v5237_v2  ;;  %v5253_v8 = vld [vmem:[#allocation5 + $0x40] ss:$16 sps:$4 sm:$0xff]   ;;  %v5257_v9 = vld [vmem:[#allocation5 + $0x64] ss:$16 sps:$4 sm:$0xff]   ;;  %354 = vmatpush1.bf16.msra.mxu1 %v5250_v7  ;;  %v5260_v10 = vld [vmem:[#allocation5 + $0x2c] ss:$16 sps:$4 sm:$0xff]  }
  0x50   :  { %314 = vmatprep.subr.bf16.mxu0 %v5240_v3  ;;  %v5262_v11 = vld [vmem:[#allocation5 + $0x28] ss:$16 sps:$4 sm:$0xff]   ;;  %355 = vmatprep.subr.bf16.mxu1 %v5260_v10  ;;  %v5266_v12 = vld [vmem:[#allocation5 + $0x60] ss:$16 sps:$4 sm:$0xff]   ;;  %v5268_v13 = vld [vmem:[#allocation5 + $0x84] ss:$16 sps:$4 sm:$0xff]  }
  0x51   :  { %v5270_v14 = vld [vmem:[#allocation5 + $0x4c] ss:$16 sps:$4 sm:$0xff]   ;;  %v5274_v15 = vld [vmem:[#allocation5 + $0x48] ss:$16 sps:$4 sm:$0xff]   ;;  %v5280_v17 = vld [vmem:[#allocation5 + $0x80] ss:$16 sps:$4 sm:$0xff]  }
  0x52   :  { %v5277_v16 = vld [vmem:[#allocation5 + $0x6c] ss:$16 sps:$4 sm:$0xff]   ;;  %v5283_v18 = vld [vmem:[#allocation5 + $0xa4] ss:$16 sps:$4 sm:$0xff]   ;;  %v5286_v19 = vld [vmem:[#allocation5 + $0x68] ss:$16 sps:$4 sm:$0xff]  }
  0x53   :  { %315 = vmatpush1.bf16.msra.mxu0 %v5243_v4  ;;  %356 = vmatpush1.bf16.msra.mxu1 %v5262_v11  ;;  %v5289_v20 = vld [vmem:[#allocation5 + $0x8c] ss:$16 sps:$4 sm:$0xff]   ;;  %v5291_v21 = vld [vmem:[#allocation5 + $0xa0] ss:$16 sps:$4 sm:$0xff]   ;;  %v5294_v22 = vld [vmem:[#allocation5 + $0xc4] ss:$16 sps:$4 sm:$0xff]  }
  0x54   :  { %316 = vmatprep.subr.bf16.mxu0 %v5246_v5  ;;  %357 = vmatprep.subr.bf16.mxu1 %v5270_v14  ;;  %v5298_v23 = vld [vmem:[#allocation5 + $0x88] ss:$16 sps:$4 sm:$0xff]   ;;  %v5300_v24 = vld [vmem:[#allocation5 + $0xc0] ss:$16 sps:$4 sm:$0xff]   ;;  %v5303_v25 = vld [vmem:[#allocation5 + $0xac] ss:$16 sps:$4 sm:$0xff]  }
  0x55   :  { %v5305_v26 = vld [vmem:[#allocation5 + $0xe4] ss:$16 sps:$4 sm:$0xff]   ;;  %v5307_v27 = vld [vmem:[#allocation5 + $0xa8] ss:$16 sps:$4 sm:$0xff]   ;;  %v5310_v28 = vld [vmem:[#allocation5 + $0xcc] ss:$16 sps:$4 sm:$0xff]  }
  0x56   :  { %v5316_v29 = vld [vmem:[#allocation5 + $0xe0] ss:$16 sps:$4 sm:$0xff]   ;;  %v5320_v31 = vld [vmem:[#allocation5 + $0xc8] ss:$16 sps:$4 sm:$0xff]   ;;  %v5323_v32 = vld [vmem:[#allocation5 + $0xec] ss:$16 sps:$4 sm:$0xff]  }
  0x57   :  { %317 = vmatpush1.bf16.msra.mxu0 %v5253_v8  ;;  %358 = vmatpush1.bf16.msra.mxu1 %v5274_v15  ;;  %v86_v30 = vld [vmem:[#allocation7] sm:$0xff]  ;;  %v5327_v34 = vld [vmem:[#allocation5 + $0xe8] ss:$16 sps:$4 sm:$0xff]   ;;  %v5126_v36 = vmov 0.0   ;;  %v5354_v37 = vld [vmem:[#allocation8 + $0x8] sm:$0xff]   ;;  %vm5127_vm0 = vmmov 0  }
  0x58   :  { %318 = vmatprep.subr.bf16.mxu0 %v5257_v9  ;;  %359 = vmatprep.subr.bf16.mxu1 %v5277_v16  ;;  %v147_v33 = vpack.c.bf16 %v86_v30, %v86_v30  ;;  %v5358_v38 = vld [vmem:[#allocation8 + $0x10] sm:$0xff]   ;;  %v5362_v39 = vld [vmem:[#allocation8 + $0x18] sm:$0xff]   ;;  %v5366_v40 = vld [vmem:[#allocation8 + $0x20] sm:$0xff]  }
  0x59   :  { %v5370_v41 = vld [vmem:[#allocation8 + $0x28] sm:$0xff]   ;;  %v5375_v42 = vld [vmem:[#allocation8 + $0x30] sm:$0xff]   ;;  %v5379_v43 = vld [vmem:[#allocation8 + $0x38] sm:$0xff]  }
  0x5a   :  { %v148_v44 = vld [vmem:[#allocation2] sm:$0xff]  ;;  %v149_v45 = vld [vmem:[#allocation2 + $0x8] sm:$0xff]  ;;  %v151_v54 = vld [vmem:[#allocation2 + $0x18] sm:$0xff] }
  0x5b   :  { %319 = vmatpush1.bf16.msra.mxu0 %v5266_v12  ;;  %360 = vmatpush1.bf16.msra.mxu1 %v5286_v19  ;;  %v150_v60 = vld [vmem:[#allocation2 + $0x10] sm:$0xff] }
  0x5c   :  { %320 = vmatprep.subr.bf16.mxu0 %v5268_v13  ;;  %361 = vmatprep.subr.bf16.mxu1 %v5289_v20 }
  0x5f   :  { %321 = vmatpush1.bf16.msra.mxu0 %v5280_v17  ;;  %362 = vmatpush1.bf16.msra.mxu1 %v5298_v23 }
  0x60   :  { %322 = vmatprep.subr.bf16.mxu0 %v5283_v18  ;;  %363 = vmatprep.subr.bf16.mxu1 %v5303_v25 }
  0x63   :  { %323 = vmatpush1.bf16.msra.mxu0 %v5291_v21  ;;  %364 = vmatpush1.bf16.msra.mxu1 %v5307_v27 }
  0x64   :  { %324 = vmatprep.subr.bf16.mxu0 %v5294_v22  ;;  %365 = vmatprep.subr.bf16.mxu1 %v5310_v28 }
  0x67   :  { %325 = vmatpush1.bf16.msra.mxu0 %v5300_v24  ;;  %366 = vmatpush1.bf16.msra.mxu1 %v5320_v31 }
  0x68   :  { %326 = vmatprep.subr.bf16.mxu0 %v5305_v26  ;;  %367 = vmatprep.subr.bf16.mxu1 %v5323_v32 }
  0x6b   :  { %327 = vmatpush1.bf16.msra.mxu0 %v5316_v29  ;;  %368 = vmatpush1.bf16.msra.mxu1 %v5327_v34 }
  0x6c   :  { %516 = vmatprep.subr.bf16.mxu1 %v5235_v1  ;;  %3973 = vmatprep.subr.bf16.mxu0 %v5126_v36 }
  0x6e   :  { %345 = vmatmul.mubr.bf16.vlgmr.msra.gmra.mrb[0].mxu0 %v147_v33  ;;  %386 = vmatmul.mubr.bf16.vlgmr.msra.gmra.mrb[0].mxu1 %v147_v33 }
  0x6f   :  { %517 = vmatpush1.bf16.msra.mxu1 %v5237_v2  ;;  %548 = vmatprep.mubr.bf16.mxu1 %v5125_v0 }
  0x70   :  { %518 = vmatprep.subr.bf16.mxu1 %v5240_v3  ;;  %3974 = vmatpush3.bf16.msra.mxu0 %v5348_v35 }
  0x71   :  { %3975 = vmatprep.subr.bf16.mxu0 %v5126_v36  ;;  %3989 = vmatprep.mubr.msk.bf16.mxu0 %vm5127_vm0, %v5126_v36 }
  0x73   :  { %519 = vmatpush1.bf16.msra.mxu1 %v5243_v4 }
  0x74   :  { %520 = vmatprep.subr.bf16.mxu1 %v5246_v5  ;;  %3976 = vmatpush3.bf16.msra.mxu0 %v5354_v37 }
  0x75   :  { %3977 = vmatprep.subr.bf16.mxu0 %v5126_v36 }
  0x77   :  { %521 = vmatpush1.bf16.msra.mxu1 %v5253_v8 }
  0x78   :  { %522 = vmatprep.subr.bf16.mxu1 %v5257_v9  ;;  %3978 = vmatpush3.bf16.msra.mxu0 %v5358_v38 }
  0x79   :  { %3979 = vmatprep.subr.bf16.mxu0 %v5126_v36 }
  0x7b   :  { %523 = vmatpush1.bf16.msra.mxu1 %v5266_v12 }
  0x7c   :  { %524 = vmatprep.subr.bf16.mxu1 %v5268_v13  ;;  %3980 = vmatpush3.bf16.msra.mxu0 %v5362_v39 }
  0x7d   :  { %3981 = vmatprep.subr.bf16.mxu0 %v5126_v36 }
  0x7f   :  { %525 = vmatpush1.bf16.msra.mxu1 %v5280_v17 }
  0x80   :  { %526 = vmatprep.subr.bf16.mxu1 %v5283_v18  ;;  %3982 = vmatpush3.bf16.msra.mxu0 %v5366_v40 }
  0x81   :  { %3983 = vmatprep.subr.bf16.mxu0 %v5126_v36 }
  0x83   :  { %527 = vmatpush1.bf16.msra.mxu1 %v5291_v21 }
  0x84   :  { %528 = vmatprep.subr.bf16.mxu1 %v5294_v22  ;;  %3984 = vmatpush3.bf16.msra.mxu0 %v5370_v41 }
  0x85   :  { %3985 = vmatprep.subr.bf16.mxu0 %v5126_v36 }
  0x87   :  { %529 = vmatpush1.bf16.msra.mxu1 %v5300_v24 }
  0x88   :  { %530 = vmatprep.subr.bf16.mxu1 %v5305_v26  ;;  %3986 = vmatpush3.bf16.msra.mxu0 %v5375_v42 }
  0x89   :  { %3987 = vmatprep.subr.bf16.mxu0 %v5126_v36 }
  0x8b   :  { %531 = vmatpush1.bf16.msra.mxu1 %v5316_v29 }
  0x8c   :  { %3993 = vmatprep.subr.bf16.mxu1 %v5126_v36  ;;  %3988 = vmatpush3.bf16.msra.mxu0 %v5379_v43 }
  0x8d   :  { %557 = vmatprep.subr.bf16.mxu0 %v5248_v6 }
 0x141   :  { %v346_v46 = vpop.f32.mrb[0].mxu0  ;;  %v387_v55 = vpop.f32.mrb[0].mxu1 }
 0x142   :  { %v394_v47 = vadd.f32 %v346_v46, %v148_v44  ;;  %v348_v48 = vpop.f32.mrb[1].mxu0  ;;  %v389_v56 = vpop.f32.mrb[1].mxu1  ;;  %v396_v62 = vadd.f32 %v387_v55, %v150_v60 }
 0x143   :  { %v395_v49 = vadd.f32 %v348_v48, %v149_v45  ;;  %v350_v50 = vpop.f32.mrb[2].mxu0  ;;  %v397_v57 = vadd.f32 %v389_v56, %v151_v54  ;;  %v391_v58 = vpop.f32.mrb[2].mxu1 }
 0x144   :  { %v3713_v51 = vmul.f32 -1.442695, %v394_v47  ;;  %v351_v52 = vpop.f32.mrb[3].mxu0  ;;  %v392_v59 = vpop.f32.mrb[3].mxu1  ;;  %v88_v47 = vld [vmem:[%s6783_s3] sm:$0xff] }
 0x145   :  { %v3714_v53 = vmul.f32 -1.442695, %v395_v49  ;;  %v3715_v61 = vmul.f32 -1.442695, %v397_v57  ;;  %v5445_v58 = vld [vmem:[%s6785_s5] ss:$0 sm:$0xff] }
 0x146   :  { %4467 = vpow2.f32 %v3713_v51 }
 0x147   :  { %4469 = vpow2.f32 %v3714_v53 }
 0x148   :  { %4471 = vpow2.f32 %v3715_v61 }
 0x149   :  { %4473 = vtanh.f32 %v396_v62 }
 0x150   :  { %v4468_v63 = vpop.eup %4467 }
 0x151   :  { %v4470_v30 = vpop.eup %4469  ;;  %v401_v33 = vadd.f32 1.0, %v4468_v63 }
 0x152   :  { %v407_v44 = vadd.f32 1.0, %v4470_v30  ;;  %v4472_v45 = vpop.eup %4471 }
 0x153   :  { %4475 = vrcp.f32 %v401_v33  ;;  %v4474_v46 = vpop.eup %4473  ;;  %v414_v49 = vadd.f32 1.0, %v4472_v45 }
 0x154   :  { %4477 = vrcp.f32 %v407_v44 }
 0x155   :  { %4479 = vrcp.f32 %v414_v49 }
 0x15d   :  { %v4476_v48 = vpop.eup %4475 }
 0x15e   :  { %v4478_v50 = vpop.eup %4477  ;;  %v418_v51 = vmul.f32 %v4476_v48, %v4474_v46  ;;  %v513_v46 = vld [vmem:[#allocation2 + $0x28] sm:$0xff] }
 0x15f   :  { %v417_v52 = vmul.f32 %v4478_v50, %v88_v47  ;;  %v4480_v54 = vpop.eup %4479  ;;  %v512_v47 = vld [vmem:[#allocation2 + $0x20] sm:$0xff] }
 0x161   :  { %v5387_v53 = vadd.f32 %v418_v51, %v417_v52 }
 0x163   :  { %4481 = vtanh.f32 %v5387_v53 }
 0x16d   :  { %v4482_v55 = vpop.eup %4481 }
 0x16e   :  { %v421_v56 = vmul.f32 %v4482_v55, %v4480_v54 }
 0x170   :  { %v422_v57 = vpack.c.bf16 %v421_v56, %v421_v56 }
 0x172   :  { %3990 = vmatmul.mubr.bf16.vlgmr.msra.gmra.mrb[4].mxu0 %v422_v57  ;;  %549 = vmatmul.mubr.bf16.vlgmr.msra.gmra.mrb[4].mxu1 %v422_v57 }
 0x173   :  { %558 = vmatpush1.bf16.msra.mxu0 %v5250_v7  ;;  %589 = vmatprep.mubr.bf16.mxu0 %v5125_v0 }
 0x174   :  { %559 = vmatprep.subr.bf16.mxu0 %v5260_v10  ;;  %3994 = vmatpush3.bf16.msra.mxu1 %v5348_v35 }
 0x175   :  { %3995 = vmatprep.subr.bf16.mxu1 %v5126_v36  ;;  %4009 = vmatprep.mubr.msk.bf16.mxu1 %vm5127_vm0, %v5126_v36 }
 0x177   :  { %560 = vmatpush1.bf16.msra.mxu0 %v5262_v11 }
 0x178   :  { %561 = vmatprep.subr.bf16.mxu0 %v5270_v14  ;;  %3996 = vmatpush3.bf16.msra.mxu1 %v5354_v37 }
 0x179   :  { %3997 = vmatprep.subr.bf16.mxu1 %v5126_v36 }
 0x17b   :  { %562 = vmatpush1.bf16.msra.mxu0 %v5274_v15 }
 0x17c   :  { %563 = vmatprep.subr.bf16.mxu0 %v5277_v16  ;;  %3998 = vmatpush3.bf16.msra.mxu1 %v5358_v38 }
 0x17d   :  { %3999 = vmatprep.subr.bf16.mxu1 %v5126_v36 }
 0x17f   :  { %564 = vmatpush1.bf16.msra.mxu0 %v5286_v19 }
 0x180   :  { %565 = vmatprep.subr.bf16.mxu0 %v5289_v20  ;;  %4000 = vmatpush3.bf16.msra.mxu1 %v5362_v39 }
 0x181   :  { %4001 = vmatprep.subr.bf16.mxu1 %v5126_v36 }
 0x183   :  { %566 = vmatpush1.bf16.msra.mxu0 %v5298_v23 }
 0x184   :  { %567 = vmatprep.subr.bf16.mxu0 %v5303_v25  ;;  %4002 = vmatpush3.bf16.msra.mxu1 %v5366_v40 }
 0x185   :  { %4003 = vmatprep.subr.bf16.mxu1 %v5126_v36 }
 0x187   :  { %568 = vmatpush1.bf16.msra.mxu0 %v5307_v27 }
 0x188   :  { %569 = vmatprep.subr.bf16.mxu0 %v5310_v28  ;;  %4004 = vmatpush3.bf16.msra.mxu1 %v5370_v41 }
 0x189   :  { %4005 = vmatprep.subr.bf16.mxu1 %v5126_v36 }
 0x18b   :  { %570 = vmatpush1.bf16.msra.mxu0 %v5320_v31 }
 0x18c   :  { %571 = vmatprep.subr.bf16.mxu0 %v5323_v32  ;;  %4006 = vmatpush3.bf16.msra.mxu1 %v5375_v42 }
 0x18d   :  { %4007 = vmatprep.subr.bf16.mxu1 %v5126_v36 }
 0x18f   :  { %572 = vmatpush1.bf16.msra.mxu0 %v5327_v34 }
 0x190   :  { %672 = vmatprep.subr.bf16.mxu0 %v5235_v1  ;;  %4008 = vmatpush3.bf16.msra.mxu1 %v5379_v43 }
 0x191   :  { %713 = vmatprep.subr.bf16.mxu1 %v5248_v6 }
 0x192   :  { %590 = vmatmul.mubr.bf16.vlgmr.msra.gmra.mrb[8].mxu0 %v422_v57  ;;  %v514_v57 = vld [vmem:[#allocation2 + $0x30] sm:$0xff] }
 0x193   :  { %673 = vmatpush1.bf16.msra.mxu0 %v5237_v2  ;;  %704 = vmatprep.mubr.bf16.mxu0 %v5125_v0 }
 0x194   :  { %674 = vmatprep.subr.bf16.mxu0 %v5240_v3 }
 0x197   :  { %675 = vmatpush1.bf16.msra.mxu0 %v5243_v4 }
 0x198   :  { %676 = vmatprep.subr.bf16.mxu0 %v5246_v5 }
 0x19b   :  { %677 = vmatpush1.bf16.msra.mxu0 %v5253_v8 }
 0x19c   :  { %678 = vmatprep.subr.bf16.mxu0 %v5257_v9 }
 0x19f   :  { %679 = vmatpush1.bf16.msra.mxu0 %v5266_v12 }
 0x1a0   :  { %680 = vmatprep.subr.bf16.mxu0 %v5268_v13 }
 0x1a3   :  { %681 = vmatpush1.bf16.msra.mxu0 %v5280_v17 }
 0x1a4   :  { %682 = vmatprep.subr.bf16.mxu0 %v5283_v18 }
 0x1a7   :  { %683 = vmatpush1.bf16.msra.mxu0 %v5291_v21 }
 0x1a8   :  { %684 = vmatprep.subr.bf16.mxu0 %v5294_v22 }
 0x1ab   :  { %685 = vmatpush1.bf16.msra.mxu0 %v5300_v24 }
 0x1ac   :  { %686 = vmatprep.subr.bf16.mxu0 %v5305_v26 }
 0x1af   :  { %687 = vmatpush1.bf16.msra.mxu0 %v5316_v29 }
 0x1b0   :  { %4013 = vmatprep.subr.bf16.mxu0 %v5126_v36 }
 0x245   :  { %v505_v59 = vpop.f32.mrb[4].mxu0  ;;  %v550_v60 = vpop.f32.mrb[4].mxu1 }
 0x246   :  { %v506_v61 = vadd.f32 %v5445_v58, %v505_v59  ;;  %v3991_v62 = vpop.f32.mrb[5].mxu0  ;;  %v552_v63 = vpop.f32.mrb[5].mxu1  ;;  %v598_v49 = vadd.f32 %v550_v60, %v512_v47  ;;  %v515_v59 = vld [vmem:[#allocation2 + $0x38] sm:$0xff] }
 0x247   :  { %v508_v30 = vpop.f32.mrb[6].mxu0  ;;  %v554_v33 = vpop.f32.mrb[6].mxu1  ;;  %v599_v48 = vadd.f32 %v552_v63, %v513_v46 }
 0x248   :  { %511 = vst [vmem:[#allocation10] sm:$0xff] %v506_v61  ;;  %v3992_v44 = vpop.f32.mrb[7].mxu0  ;;  %v555_v45 = vpop.f32.mrb[7].mxu1  ;;  %v3724_v51 = vmul.f32 -1.442695, %v598_v49 }
 0x249   :  { %v3725_v50 = vmul.f32 -1.442695, %v599_v48 }
 0x24b   :  { %4483 = vpow2.f32 %v3725_v50 }
 0x24c   :  { %4485 = vpow2.f32 %v3724_v51 }
 0x255   :  { %v4484_v52 = vpop.eup %4483 }
 0x256   :  { %v4486_v54 = vpop.eup %4485  ;;  %v611_v55 = vadd.f32 1.0, %v4484_v52 }
 0x257   :  { %v605_v56 = vadd.f32 1.0, %v4486_v54 }
 0x258   :  { %4487 = vrcp.f32 %v611_v55 }
 0x259   :  { %4489 = vrcp.f32 %v605_v56 }
 0x262   :  { %v4488_v45 = vpop.eup %4487 }
 0x263   :  { %v4490_v46 = vpop.eup %4489  ;;  %v621_v48 = vmul.f32 %v4488_v45, %v5387_v53  ;;  %v669_v45 = vld [vmem:[#allocation2 + $0x48] sm:$0xff] }
 0x265   :  { %v591_v62 = vpop.f32.mrb[8].mxu0 }
 0x266   :  { %v600_v30 = vadd.f32 %v591_v62, %v514_v57  ;;  %v593_v61 = vpop.f32.mrb[9].mxu0 }
 0x267   :  { %v601_v33 = vadd.f32 %v593_v61, %v515_v59  ;;  %v595_v44 = vpop.f32.mrb[10].mxu0 }
 0x268   :  { %4491 = vtanh.f32 %v600_v30  ;;  %v596_v63 = vpop.f32.mrb[11].mxu0 }
 0x269   :  { %v3726_v60 = vmul.f32 -1.442695, %v601_v33 }
 0x26b   :  { %4493 = vpow2.f32 %v3726_v60 }
 0x272   :  { %v4492_v47 = vpop.eup %4491 }
 0x273   :  { %v622_v49 = vmul.f32 %v4492_v47, %v4490_v46  ;;  %v668_v46 = vld [vmem:[#allocation2 + $0x40] sm:$0xff] }
 0x275   :  { %v4494_v50 = vpop.eup %4493  ;;  %v5449_v51 = vadd.f32 %v622_v49, %v621_v48 }
 0x276   :  { %v618_v52 = vadd.f32 1.0, %v4494_v50 }
 0x277   :  { %4495 = vtanh.f32 %v5449_v51 }
 0x278   :  { %4497 = vrcp.f32 %v618_v52 }
 0x281   :  { %v4496_v54 = vpop.eup %4495 }
 0x282   :  { %v4498_v55 = vpop.eup %4497 }
 0x283   :  { %v625_v56 = vmul.f32 %v4498_v55, %v4496_v54 }
 0x285   :  { %v626_v57 = vpack.c.bf16 %v625_v56, %v625_v56 }
 0x287   :  { %4010 = vmatmul.mubr.bf16.vlgmr.msra.gmra.mrb[8].mxu1 %v626_v57  ;;  %705 = vmatmul.mubr.bf16.vlgmr.msra.gmra.mrb[12].mxu0 %v626_v57 }
 0x288   :  { %714 = vmatpush1.bf16.msra.mxu1 %v5250_v7  ;;  %745 = vmatprep.mubr.bf16.mxu1 %v5125_v0 }
 0x289   :  { %715 = vmatprep.subr.bf16.mxu1 %v5260_v10  ;;  %4014 = vmatpush3.bf16.msra.mxu0 %v5348_v35 }
 0x28a   :  { %4015 = vmatprep.subr.bf16.mxu0 %v5126_v36  ;;  %4029 = vmatprep.mubr.msk.bf16.mxu0 %vm5127_vm0, %v5126_v36 }
 0x28c   :  { %716 = vmatpush1.bf16.msra.mxu1 %v5262_v11 }
 0x28d   :  { %717 = vmatprep.subr.bf16.mxu1 %v5270_v14  ;;  %4016 = vmatpush3.bf16.msra.mxu0 %v5354_v37 }
 0x28e   :  { %4017 = vmatprep.subr.bf16.mxu0 %v5126_v36 }
 0x290   :  { %718 = vmatpush1.bf16.msra.mxu1 %v5274_v15 }
 0x291   :  { %719 = vmatprep.subr.bf16.mxu1 %v5277_v16  ;;  %4018 = vmatpush3.bf16.msra.mxu0 %v5358_v38 }
 0x292   :  { %4019 = vmatprep.subr.bf16.mxu0 %v5126_v36 }
 0x294   :  { %720 = vmatpush1.bf16.msra.mxu1 %v5286_v19 }
 0x295   :  { %721 = vmatprep.subr.bf16.mxu1 %v5289_v20  ;;  %4020 = vmatpush3.bf16.msra.mxu0 %v5362_v39 }
 0x296   :  { %4021 = vmatprep.subr.bf16.mxu0 %v5126_v36 }
 0x298   :  { %722 = vmatpush1.bf16.msra.mxu1 %v5298_v23 }
 0x299   :  { %723 = vmatprep.subr.bf16.mxu1 %v5303_v25  ;;  %4022 = vmatpush3.bf16.msra.mxu0 %v5366_v40 }
 0x29a   :  { %4023 = vmatprep.subr.bf16.mxu0 %v5126_v36 }
 0x29c   :  { %724 = vmatpush1.bf16.msra.mxu1 %v5307_v27 }
 0x29d   :  { %725 = vmatprep.subr.bf16.mxu1 %v5310_v28  ;;  %4024 = vmatpush3.bf16.msra.mxu0 %v5370_v41 }
 0x29e   :  { %4025 = vmatprep.subr.bf16.mxu0 %v5126_v36 }
 0x2a0   :  { %726 = vmatpush1.bf16.msra.mxu1 %v5320_v31 }
 0x2a1   :  { %727 = vmatprep.subr.bf16.mxu1 %v5323_v32  ;;  %4026 = vmatpush3.bf16.msra.mxu0 %v5375_v42 }
 0x2a2   :  { %4027 = vmatprep.subr.bf16.mxu0 %v5126_v36 }
 0x2a4   :  { %728 = vmatpush1.bf16.msra.mxu1 %v5327_v34 }
 0x2a5   :  { %828 = vmatprep.subr.bf16.mxu1 %v5235_v1  ;;  %4028 = vmatpush3.bf16.msra.mxu0 %v5379_v43 }
 0x2a6   :  { %869 = vmatprep.subr.bf16.mxu0 %v5248_v6 }
 0x2a7   :  { %746 = vmatmul.mubr.bf16.vlgmr.msra.gmra.mrb[12].mxu1 %v626_v57  ;;  %v670_v57 = vld [vmem:[#allocation2 + $0x50] sm:$0xff] }
 0x2a8   :  { %829 = vmatpush1.bf16.msra.mxu1 %v5237_v2  ;;  %860 = vmatprep.mubr.bf16.mxu1 %v5125_v0 }
 0x2a9   :  { %830 = vmatprep.subr.bf16.mxu1 %v5240_v3 }
 0x2ac   :  { %831 = vmatpush1.bf16.msra.mxu1 %v5243_v4 }
 0x2ad   :  { %832 = vmatprep.subr.bf16.mxu1 %v5246_v5 }
 0x2b0   :  { %833 = vmatpush1.bf16.msra.mxu1 %v5253_v8 }
 0x2b1   :  { %834 = vmatprep.subr.bf16.mxu1 %v5257_v9 }
 0x2b4   :  { %835 = vmatpush1.bf16.msra.mxu1 %v5266_v12 }
 0x2b5   :  { %836 = vmatprep.subr.bf16.mxu1 %v5268_v13 }
 0x2b8   :  { %837 = vmatpush1.bf16.msra.mxu1 %v5280_v17 }
 0x2b9   :  { %838 = vmatprep.subr.bf16.mxu1 %v5283_v18 }
 0x2bc   :  { %839 = vmatpush1.bf16.msra.mxu1 %v5291_v21 }
 0x2bd   :  { %840 = vmatprep.subr.bf16.mxu1 %v5294_v22 }
 0x2c0   :  { %841 = vmatpush1.bf16.msra.mxu1 %v5300_v24 }
 0x2c1   :  { %842 = vmatprep.subr.bf16.mxu1 %v5305_v26 }
 0x2c4   :  { %843 = vmatpush1.bf16.msra.mxu1 %v5316_v29 }
 0x2c5   :  { %4033 = vmatprep.subr.bf16.mxu1 %v5126_v36 }
 0x35a   :  { %v661_v53 = vpop.f32.mrb[8].mxu1  ;;  %v706_v59 = vpop.f32.mrb[12].mxu0 }
 0x35b   :  { %v662_v62 = vadd.f32 %v5445_v58, %v661_v53  ;;  %v4011_v30 = vpop.f32.mrb[9].mxu1  ;;  %v708_v61 = vpop.f32.mrb[13].mxu0  ;;  %v754_v48 = vadd.f32 %v706_v59, %v668_v46  ;;  %v671_v53 = vld [vmem:[#allocation2 + $0x58] sm:$0xff] }
 0x35c   :  { %v664_v33 = vpop.f32.mrb[10].mxu1  ;;  %v710_v44 = vpop.f32.mrb[14].mxu0  ;;  %v755_v47 = vadd.f32 %v708_v61, %v669_v45 }
 0x35d   :  { %667 = vst [vmem:[#allocation10 + $0x8] sm:$0xff] %v662_v62  ;;  %v4012_v63 = vpop.f32.mrb[11].mxu1  ;;  %v711_v60 = vpop.f32.mrb[15].mxu0  ;;  %v3727_v50 = vmul.f32 -1.442695, %v754_v48 }
 0x35e   :  { %v3728_v49 = vmul.f32 -1.442695, %v755_v47 }
 0x360   :  { %4499 = vpow2.f32 %v3728_v49 }
 0x361   :  { %4501 = vpow2.f32 %v3727_v50 }
 0x36a   :  { %v4500_v52 = vpop.eup %4499 }
 0x36b   :  { %v4502_v54 = vpop.eup %4501  ;;  %v767_v55 = vadd.f32 1.0, %v4500_v52 }
 0x36c   :  { %v761_v56 = vadd.f32 1.0, %v4502_v54 }
 0x36d   :  { %4503 = vrcp.f32 %v767_v55 }
 0x36e   :  { %4505 = vrcp.f32 %v761_v56 }
 0x377   :  { %v4504_v60 = vpop.eup %4503 }
 0x378   :  { %v4506_v45 = vpop.eup %4505  ;;  %v777_v47 = vmul.f32 %v4504_v60, %v5449_v51  ;;  %v824_v51 = vld [vmem:[#allocation2 + $0x60] sm:$0xff]  ;;  %v826_v60 = vld [vmem:[#allocation2 + $0x70] sm:$0xff] }
 0x37a   :  { %v747_v30 = vpop.f32.mrb[12].mxu1 }
 0x37b   :  { %v756_v33 = vadd.f32 %v747_v30, %v670_v57  ;;  %v749_v62 = vpop.f32.mrb[13].mxu1 }
 0x37c   :  { %v757_v44 = vadd.f32 %v749_v62, %v671_v53  ;;  %v751_v63 = vpop.f32.mrb[14].mxu1 }
 0x37d   :  { %4507 = vtanh.f32 %v756_v33  ;;  %v752_v61 = vpop.f32.mrb[15].mxu1 }
 0x37e   :  { %v3729_v59 = vmul.f32 -1.442695, %v757_v44 }
 0x380   :  { %4509 = vpow2.f32 %v3729_v59 }
 0x387   :  { %v4508_v46 = vpop.eup %4507 }
 0x388   :  { %v778_v48 = vmul.f32 %v4508_v46, %v4506_v45  ;;  %v827_v45 = vld [vmem:[#allocation2 + $0x78] sm:$0xff] }
 0x38a   :  { %v4510_v49 = vpop.eup %4509  ;;  %v5506_v50 = vadd.f32 %v778_v48, %v777_v47 }
 0x38b   :  { %v774_v52 = vadd.f32 1.0, %v4510_v49 }
 0x38c   :  { %4511 = vtanh.f32 %v5506_v50 }
 0x38d   :  { %4513 = vrcp.f32 %v774_v52 }
 0x396   :  { %v4512_v54 = vpop.eup %4511 }
 0x397   :  { %v4514_v55 = vpop.eup %4513 }
 0x398   :  { %v781_v56 = vmul.f32 %v4514_v55, %v4512_v54 }
 0x39a   :  { %v782_v57 = vpack.c.bf16 %v781_v56, %v781_v56 }
 0x39c   :  { %4030 = vmatmul.mubr.bf16.vlgmr.msra.gmra.mrb[16].mxu0 %v782_v57  ;;  %861 = vmatmul.mubr.bf16.vlgmr.msra.gmra.mrb[16].mxu1 %v782_v57 }
 0x39d   :  { %870 = vmatpush1.bf16.msra.mxu0 %v5250_v7  ;;  %901 = vmatprep.mubr.bf16.mxu0 %v5125_v0 }
 0x39e   :  { %871 = vmatprep.subr.bf16.mxu0 %v5260_v10  ;;  %4034 = vmatpush3.bf16.msra.mxu1 %v5348_v35 }
 0x39f   :  { %4035 = vmatprep.subr.bf16.mxu1 %v5126_v36  ;;  %4049 = vmatprep.mubr.msk.bf16.mxu1 %vm5127_vm0, %v5126_v36 }
 0x3a1   :  { %872 = vmatpush1.bf16.msra.mxu0 %v5262_v11 }
 0x3a2   :  { %873 = vmatprep.subr.bf16.mxu0 %v5270_v14  ;;  %4036 = vmatpush3.bf16.msra.mxu1 %v5354_v37 }
 0x3a3   :  { %4037 = vmatprep.subr.bf16.mxu1 %v5126_v36 }
 0x3a5   :  { %874 = vmatpush1.bf16.msra.mxu0 %v5274_v15 }
 0x3a6   :  { %875 = vmatprep.subr.bf16.mxu0 %v5277_v16  ;;  %4038 = vmatpush3.bf16.msra.mxu1 %v5358_v38 }
 0x3a7   :  { %4039 = vmatprep.subr.bf16.mxu1 %v5126_v36 }
 0x3a9   :  { %876 = vmatpush1.bf16.msra.mxu0 %v5286_v19 }
 0x3aa   :  { %877 = vmatprep.subr.bf16.mxu0 %v5289_v20  ;;  %4040 = vmatpush3.bf16.msra.mxu1 %v5362_v39 }
 0x3ab   :  { %4041 = vmatprep.subr.bf16.mxu1 %v5126_v36 }
 0x3ad   :  { %878 = vmatpush1.bf16.msra.mxu0 %v5298_v23 }
 0x3ae   :  { %879 = vmatprep.subr.bf16.mxu0 %v5303_v25  ;;  %4042 = vmatpush3.bf16.msra.mxu1 %v5366_v40 }
 0x3af   :  { %4043 = vmatprep.subr.bf16.mxu1 %v5126_v36 }
 0x3b1   :  { %880 = vmatpush1.bf16.msra.mxu0 %v5307_v27 }
 0x3b2   :  { %881 = vmatprep.subr.bf16.mxu0 %v5310_v28  ;;  %4044 = vmatpush3.bf16.msra.mxu1 %v5370_v41 }
 0x3b3   :  { %4045 = vmatprep.subr.bf16.mxu1 %v5126_v36 }
 0x3b5   :  { %882 = vmatpush1.bf16.msra.mxu0 %v5320_v31 }
 0x3b6   :  { %883 = vmatprep.subr.bf16.mxu0 %v5323_v32  ;;  %4046 = vmatpush3.bf16.msra.mxu1 %v5375_v42 }
 0x3b7   :  { %4047 = vmatprep.subr.bf16.mxu1 %v5126_v36 }
 0x3b9   :  { %884 = vmatpush1.bf16.msra.mxu0 %v5327_v34 }
 0x3ba   :  { %984 = vmatprep.subr.bf16.mxu0 %v5235_v1  ;;  %4048 = vmatpush3.bf16.msra.mxu1 %v5379_v43 }
 0x3bb   :  { %1025 = vmatprep.subr.bf16.mxu1 %v5248_v6 }
 0x3bc   :  { %902 = vmatmul.mubr.bf16.vlgmr.msra.gmra.mrb[20].mxu0 %v782_v57 }
 0x3bd   :  { %985 = vmatpush1.bf16.msra.mxu0 %v5237_v2  ;;  %1016 = vmatprep.mubr.bf16.mxu0 %v5125_v0 }
 0x3be   :  { %986 = vmatprep.subr.bf16.mxu0 %v5240_v3 }
 0x3c1   :  { %987 = vmatpush1.bf16.msra.mxu0 %v5243_v4 }
 0x3c2   :  { %988 = vmatprep.subr.bf16.mxu0 %v5246_v5 }
 0x3c5   :  { %989 = vmatpush1.bf16.msra.mxu0 %v5253_v8 }
 0x3c6   :  { %990 = vmatprep.subr.bf16.mxu0 %v5257_v9 }
 0x3c9   :  { %991 = vmatpush1.bf16.msra.mxu0 %v5266_v12 }
 0x3ca   :  { %992 = vmatprep.subr.bf16.mxu0 %v5268_v13  ;;  %v825_v13 = vld [vmem:[#allocation2 + $0x68] sm:$0xff] }
 0x3cd   :  { %993 = vmatpush1.bf16.msra.mxu0 %v5280_v17 }
 0x3ce   :  { %994 = vmatprep.subr.bf16.mxu0 %v5283_v18 }
 0x3d1   :  { %995 = vmatpush1.bf16.msra.mxu0 %v5291_v21 }
 0x3d2   :  { %996 = vmatprep.subr.bf16.mxu0 %v5294_v22 }
 0x3d5   :  { %997 = vmatpush1.bf16.msra.mxu0 %v5300_v24 }
 0x3d6   :  { %998 = vmatprep.subr.bf16.mxu0 %v5305_v26 }
 0x3d9   :  { %999 = vmatpush1.bf16.msra.mxu0 %v5316_v29 }
 0x3da   :  { %4053 = vmatprep.subr.bf16.mxu0 %v5126_v36 }
 0x46f   :  { %v817_v1 = vpop.f32.mrb[16].mxu0  ;;  %v862_v2 = vpop.f32.mrb[16].mxu1 }
 0x470   :  { %v818_v3 = vadd.f32 %v5445_v58, %v817_v1  ;;  %v4031_v4 = vpop.f32.mrb[17].mxu0  ;;  %v864_v5 = vpop.f32.mrb[17].mxu1  ;;  %v910_v30 = vadd.f32 %v862_v2, %v824_v51  ;;  %v980_v51 = vld [vmem:[#allocation2 + $0x80] sm:$0xff] }
 0x471   :  { %v820_v6 = vpop.f32.mrb[18].mxu0  ;;  %v866_v8 = vpop.f32.mrb[18].mxu1  ;;  %v911_v53 = vadd.f32 %v864_v5, %v825_v13 }
 0x472   :  { %823 = vst [vmem:[#allocation10 + $0x10] sm:$0xff] %v818_v3  ;;  %v4032_v9 = vpop.f32.mrb[19].mxu0  ;;  %v867_v12 = vpop.f32.mrb[19].mxu1  ;;  %v3730_v62 = vmul.f32 -1.442695, %v910_v30 }
 0x473   :  { %v3731_v33 = vmul.f32 -1.442695, %v911_v53 }
 0x475   :  { %4515 = vpow2.f32 %v3731_v33 }
 0x476   :  { %4517 = vpow2.f32 %v3730_v62 }
 0x47f   :  { %v4516_v44 = vpop.eup %4515 }
 0x480   :  { %v4518_v63 = vpop.eup %4517  ;;  %v923_v61 = vadd.f32 1.0, %v4516_v44 }
 0x481   :  { %v917_v59 = vadd.f32 1.0, %v4518_v63  ;;  %v982_v63 = vld [vmem:[#allocation2 + $0x90] sm:$0xff] }
 0x482   :  { %4519 = vrcp.f32 %v923_v61  ;;  %v983_v61 = vld [vmem:[#allocation2 + $0x98] sm:$0xff] }
 0x483   :  { %4521 = vrcp.f32 %v917_v59 }
 0x48c   :  { %v4520_v56 = vpop.eup %4519 }
 0x48d   :  { %v4522_v57 = vpop.eup %4521  ;;  %v933_v2 = vmul.f32 %v4520_v56, %v5506_v50 }
 0x48f   :  { %v903_v46 = vpop.f32.mrb[20].mxu0 }
 0x490   :  { %v912_v47 = vadd.f32 %v903_v46, %v826_v60  ;;  %v905_v48 = vpop.f32.mrb[21].mxu0 }
 0x491   :  { %v913_v49 = vadd.f32 %v905_v48, %v827_v45  ;;  %v907_v52 = vpop.f32.mrb[22].mxu0 }
 0x492   :  { %4523 = vtanh.f32 %v912_v47  ;;  %v908_v54 = vpop.f32.mrb[23].mxu0 }
 0x493   :  { %v3732_v55 = vmul.f32 -1.442695, %v913_v49 }
 0x495   :  { %4525 = vpow2.f32 %v3732_v55 }
 0x49c   :  { %v4524_v1 = vpop.eup %4523 }
 0x49d   :  { %v934_v3 = vmul.f32 %v4524_v1, %v4522_v57 }
 0x49f   :  { %v4526_v4 = vpop.eup %4525  ;;  %v5563_v5 = vadd.f32 %v934_v3, %v933_v2 }
 0x4a0   :  { %v930_v6 = vadd.f32 1.0, %v4526_v4 }
 0x4a1   :  { %4527 = vtanh.f32 %v5563_v5 }
 0x4a2   :  { %4529 = vrcp.f32 %v930_v6 }
 0x4ab   :  { %v4528_v8 = vpop.eup %4527 }
 0x4ac   :  { %v4530_v9 = vpop.eup %4529 }
 0x4ad   :  { %v937_v12 = vmul.f32 %v4530_v9, %v4528_v8 }
 0x4af   :  { %v938_v13 = vpack.c.bf16 %v937_v12, %v937_v12  ;;  %v5643_v12 = vld [vmem:[#allocation5 + $0x8] ss:$16 sps:$4 sm:$0xff]  }
 0x4b1   :  { %4050 = vmatmul.mubr.bf16.vlgmr.msra.gmra.mrb[20].mxu1 %v938_v13  ;;  %1017 = vmatmul.mubr.bf16.vlgmr.msra.gmra.mrb[24].mxu0 %v938_v13 }
 0x4b2   :  { %1026 = vmatpush1.bf16.msra.mxu1 %v5250_v7  ;;  %1057 = vmatprep.mubr.bf16.mxu1 %v5125_v0  ;;  %v5598_v7 = vld [vmem:[#allocation5 + $0x4] ss:$16 sps:$4 sm:$0xff]  }
 0x4b3   :  { %1027 = vmatprep.subr.bf16.mxu1 %v5260_v10  ;;  %4054 = vmatpush3.bf16.msra.mxu0 %v5348_v35  ;;  %v5602_v10 = vld [vmem:[#allocation5 + $0xc] ss:$16 sps:$4 sm:$0xff]  }
 0x4b4   :  { %4055 = vmatprep.subr.bf16.mxu0 %v5126_v36  ;;  %4069 = vmatprep.mubr.msk.bf16.mxu0 %vm5127_vm0, %v5126_v36 }
 0x4b6   :  { %1028 = vmatpush1.bf16.msra.mxu1 %v5262_v11  ;;  %v5605_v11 = vld [vmem:[#allocation5] ss:$16 sps:$4 sm:$0xff]  }
 0x4b7   :  { %1029 = vmatprep.subr.bf16.mxu1 %v5270_v14  ;;  %4056 = vmatpush3.bf16.msra.mxu0 %v5354_v37  ;;  %v5609_v14 = vld [vmem:[#allocation5 + $0x24] ss:$16 sps:$4 sm:$0xff]  }
 0x4b8   :  { %4057 = vmatprep.subr.bf16.mxu0 %v5126_v36 }
 0x4ba   :  { %1030 = vmatpush1.bf16.msra.mxu1 %v5274_v15  ;;  %v5612_v15 = vld [vmem:[#allocation5 + $0x20] ss:$16 sps:$4 sm:$0xff]  }
 0x4bb   :  { %1031 = vmatprep.subr.bf16.mxu1 %v5277_v16  ;;  %4058 = vmatpush3.bf16.msra.mxu0 %v5358_v38  ;;  %v5615_v16 = vld [vmem:[#allocation5 + $0x44] ss:$16 sps:$4 sm:$0xff]  }
 0x4bc   :  { %4059 = vmatprep.subr.bf16.mxu0 %v5126_v36 }
 0x4be   :  { %1032 = vmatpush1.bf16.msra.mxu1 %v5286_v19  ;;  %v5618_v19 = vld [vmem:[#allocation5 + $0x40] ss:$16 sps:$4 sm:$0xff]  }
 0x4bf   :  { %1033 = vmatprep.subr.bf16.mxu1 %v5289_v20  ;;  %4060 = vmatpush3.bf16.msra.mxu0 %v5362_v39  ;;  %v5621_v20 = vld [vmem:[#allocation5 + $0x64] ss:$16 sps:$4 sm:$0xff]  }
 0x4c0   :  { %4061 = vmatprep.subr.bf16.mxu0 %v5126_v36 }
 0x4c2   :  { %1034 = vmatpush1.bf16.msra.mxu1 %v5298_v23  ;;  %v5624_v23 = vld [vmem:[#allocation5 + $0x60] ss:$16 sps:$4 sm:$0xff]  }
 0x4c3   :  { %1035 = vmatprep.subr.bf16.mxu1 %v5303_v25  ;;  %4062 = vmatpush3.bf16.msra.mxu0 %v5366_v40  ;;  %v5627_v25 = vld [vmem:[#allocation5 + $0x84] ss:$16 sps:$4 sm:$0xff]  }
 0x4c4   :  { %4063 = vmatprep.subr.bf16.mxu0 %v5126_v36 }
 0x4c6   :  { %1036 = vmatpush1.bf16.msra.mxu1 %v5307_v27 }
 0x4c7   :  { %1037 = vmatprep.subr.bf16.mxu1 %v5310_v28  ;;  %4064 = vmatpush3.bf16.msra.mxu0 %v5370_v41 }
 0x4c8   :  { %4065 = vmatprep.subr.bf16.mxu0 %v5126_v36 }
 0x4ca   :  { %1038 = vmatpush1.bf16.msra.mxu1 %v5320_v31 }
 0x4cb   :  { %1039 = vmatprep.subr.bf16.mxu1 %v5323_v32  ;;  %4066 = vmatpush3.bf16.msra.mxu0 %v5375_v42 }
 0x4cc   :  { %4067 = vmatprep.subr.bf16.mxu0 %v5126_v36 }
 0x4ce   :  { %1040 = vmatpush1.bf16.msra.mxu1 %v5327_v34 }
 0x4cf   :  { %1140 = vmatprep.subr.bf16.mxu1 %v5598_v7  ;;  %4068 = vmatpush3.bf16.msra.mxu0 %v5379_v43 }
 0x4d0   :  { %1181 = vmatprep.subr.bf16.mxu0 %v5602_v10 }
 0x4d1   :  { %1058 = vmatmul.mubr.bf16.vlgmr.msra.gmra.mrb[24].mxu1 %v938_v13  ;;  %v5654_v13 = vld [vmem:[#allocation5 + $0x28] ss:$16 sps:$4 sm:$0xff]  }
 0x4d2   :  { %1141 = vmatpush1.bf16.msra.mxu1 %v5605_v11  ;;  %1172 = vmatprep.mubr.bf16.mxu1 %v5125_v0 }
 0x4d3   :  { %1142 = vmatprep.subr.bf16.mxu1 %v5609_v14 }
 0x4d6   :  { %1143 = vmatpush1.bf16.msra.mxu1 %v5612_v15 }
 0x4d7   :  { %1144 = vmatprep.subr.bf16.mxu1 %v5615_v16 }
 0x4da   :  { %1145 = vmatpush1.bf16.msra.mxu1 %v5618_v19 }
 0x4db   :  { %1146 = vmatprep.subr.bf16.mxu1 %v5621_v20 }
 0x4de   :  { %1147 = vmatpush1.bf16.msra.mxu1 %v5624_v23 }
 0x4df   :  { %1148 = vmatprep.subr.bf16.mxu1 %v5627_v25 }
 0x4e2   :  { %1149 = vmatpush1.bf16.msra.mxu1 %v5280_v17 }
 0x4e3   :  { %1150 = vmatprep.subr.bf16.mxu1 %v5283_v18 }
 0x4e6   :  { %1151 = vmatpush1.bf16.msra.mxu1 %v5291_v21 }
 0x4e7   :  { %1152 = vmatprep.subr.bf16.mxu1 %v5294_v22  ;;  %v981_v22 = vld [vmem:[#allocation2 + $0x88] sm:$0xff] }
 0x4ea   :  { %1153 = vmatpush1.bf16.msra.mxu1 %v5300_v24 }
 0x4eb   :  { %1154 = vmatprep.subr.bf16.mxu1 %v5305_v26 }
 0x4ee   :  { %1155 = vmatpush1.bf16.msra.mxu1 %v5316_v29 }
 0x4ef   :  { %4073 = vmatprep.subr.bf16.mxu1 %v5126_v36 }
 0x584   :  { %v973_v27 = vpop.f32.mrb[20].mxu1  ;;  %v1018_v28 = vpop.f32.mrb[24].mxu0 }
 0x585   :  { %v974_v31 = vadd.f32 %v5445_v58, %v973_v27  ;;  %v4051_v32 = vpop.f32.mrb[21].mxu1  ;;  %v1020_v17 = vpop.f32.mrb[25].mxu0  ;;  %v1066_v53 = vadd.f32 %v1018_v28, %v980_v51  ;;  %v5657_v27 = vld [vmem:[#allocation5 + $0x4c] ss:$16 sps:$4 sm:$0xff]   ;;  %v5662_v28 = vld [vmem:[#allocation5 + $0x48] ss:$16 sps:$4 sm:$0xff]  }
 0x586   :  { %v976_v34 = vpop.f32.mrb[22].mxu1  ;;  %v1022_v18 = vpop.f32.mrb[26].mxu0  ;;  %v1067_v24 = vadd.f32 %v1020_v17, %v981_v22  ;;  %v5673_v32 = vld [vmem:[#allocation5 + $0x8c] ss:$16 sps:$4 sm:$0xff]   ;;  %v5732_v22 = vld [vmem:[#allocation5 + $0xe4] ss:$16 sps:$4 sm:$0xff]  }
 0x587   :  { %979 = vst [vmem:[#allocation10 + $0x18] sm:$0xff] %v974_v31  ;;  %v4052_v21 = vpop.f32.mrb[23].mxu1  ;;  %v1023_v50 = vpop.f32.mrb[27].mxu0  ;;  %v3733_v30 = vmul.f32 -1.442695, %v1066_v53 }
 0x588   :  { %v3734_v26 = vmul.f32 -1.442695, %v1067_v24  ;;  %v5670_v31 = vld [vmem:[#allocation5 + $0x68] ss:$16 sps:$4 sm:$0xff]   ;;  %v5681_v17 = vld [vmem:[#allocation5 + $0xac] ss:$16 sps:$4 sm:$0xff]  }
 0x589   :  { %v5689_v34 = vld [vmem:[#allocation5 + $0xcc] ss:$16 sps:$4 sm:$0xff]   ;;  %v5726_v21 = vld [vmem:[#allocation5 + $0xc4] ss:$16 sps:$4 sm:$0xff]   ;;  %v5729_v50 = vld [vmem:[#allocation5 + $0xc0] ss:$16 sps:$4 sm:$0xff]  }
 0x58a   :  { %4531 = vpow2.f32 %v3734_v26  ;;  %v5697_v18 = vld [vmem:[#allocation5 + $0xec] ss:$16 sps:$4 sm:$0xff]   ;;  %v5735_v51 = vld [vmem:[#allocation5 + $0xe0] ss:$16 sps:$4 sm:$0xff]  }
 0x58b   :  { %4533 = vpow2.f32 %v3733_v30 }
 0x594   :  { %v4532_v29 = vpop.eup %4531 }
 0x595   :  { %v4534_v33 = vpop.eup %4533  ;;  %v1079_v62 = vadd.f32 1.0, %v4532_v29 }
 0x596   :  { %v1073_v44 = vadd.f32 1.0, %v4534_v33 }
 0x597   :  { %4535 = vrcp.f32 %v1079_v62 }
 0x598   :  { %4537 = vrcp.f32 %v1073_v44 }
 0x5a1   :  { %v4536_v52 = vpop.eup %4535 }
 0x5a2   :  { %v4538_v54 = vpop.eup %4537  ;;  %v1089_v56 = vmul.f32 %v4536_v52, %v5563_v5  ;;  %v5647_v5 = vld [vmem:[#allocation5 + $0x2c] ss:$16 sps:$4 sm:$0xff]  }
 0x5a4   :  { %v1059_v59 = vpop.f32.mrb[24].mxu1 }
 0x5a5   :  { %v1068_v60 = vadd.f32 %v1059_v59, %v982_v63  ;;  %v1061_v45 = vpop.f32.mrb[25].mxu1  ;;  %v1136_v59 = vld [vmem:[#allocation2 + $0xa0] sm:$0xff] }
 0x5a6   :  { %v1069_v46 = vadd.f32 %v1061_v45, %v983_v61  ;;  %v1063_v47 = vpop.f32.mrb[26].mxu1  ;;  %v1137_v61 = vld [vmem:[#allocation2 + $0xa8] sm:$0xff] }
 0x5a7   :  { %4539 = vtanh.f32 %v1068_v60  ;;  %v1064_v48 = vpop.f32.mrb[27].mxu1 }
 0x5a8   :  { %v3735_v49 = vmul.f32 -1.442695, %v1069_v46 }
 0x5aa   :  { %4541 = vpow2.f32 %v3735_v49 }
 0x5b1   :  { %v4540_v55 = vpop.eup %4539 }
 0x5b2   :  { %v1090_v57 = vmul.f32 %v4540_v55, %v4538_v54  ;;  %v1139_v55 = vld [vmem:[#allocation2 + $0xb8] sm:$0xff] }
 0x5b4   :  { %v4542_v1 = vpop.eup %4541  ;;  %v5640_v2 = vadd.f32 %v1090_v57, %v1089_v56 }
 0x5b5   :  { %v1086_v3 = vadd.f32 1.0, %v4542_v1 }
 0x5b6   :  { %4543 = vtanh.f32 %v5640_v2 }
 0x5b7   :  { %4545 = vrcp.f32 %v1086_v3 }
 0x5c0   :  { %v4544_v4 = vpop.eup %4543 }
 0x5c1   :  { %v4546_v6 = vpop.eup %4545 }
 0x5c2   :  { %v1093_v8 = vmul.f32 %v4546_v6, %v4544_v4 }
 0x5c4   :  { %v1094_v9 = vpack.c.bf16 %v1093_v8, %v1093_v8 }
 0x5c6   :  { %4070 = vmatmul.mubr.bf16.vlgmr.msra.gmra.mrb[28].mxu0 %v1094_v9  ;;  %1173 = vmatmul.mubr.bf16.vlgmr.msra.gmra.mrb[28].mxu1 %v1094_v9 }
 0x5c7   :  { %1182 = vmatpush1.bf16.msra.mxu0 %v5643_v12  ;;  %1213 = vmatprep.mubr.bf16.mxu0 %v5125_v0 }
 0x5c8   :  { %1183 = vmatprep.subr.bf16.mxu0 %v5647_v5  ;;  %4074 = vmatpush3.bf16.msra.mxu1 %v5348_v35  ;;  %v5665_v35 = vld [vmem:[#allocation5 + $0x6c] ss:$16 sps:$4 sm:$0xff]  }
 0x5c9   :  { %4075 = vmatprep.subr.bf16.mxu1 %v5126_v36  ;;  %4089 = vmatprep.mubr.msk.bf16.mxu1 %vm5127_vm0, %v5126_v36 }
 0x5cb   :  { %1184 = vmatpush1.bf16.msra.mxu0 %v5654_v13 }
 0x5cc   :  { %1185 = vmatprep.subr.bf16.mxu0 %v5657_v27  ;;  %4076 = vmatpush3.bf16.msra.mxu1 %v5354_v37  ;;  %v5678_v37 = vld [vmem:[#allocation5 + $0x88] ss:$16 sps:$4 sm:$0xff]  }
 0x5cd   :  { %4077 = vmatprep.subr.bf16.mxu1 %v5126_v36 }
 0x5cf   :  { %1186 = vmatpush1.bf16.msra.mxu0 %v5662_v28 }
 0x5d0   :  { %1187 = vmatprep.subr.bf16.mxu0 %v5665_v35  ;;  %4078 = vmatpush3.bf16.msra.mxu1 %v5358_v38  ;;  %v5686_v38 = vld [vmem:[#allocation5 + $0xa8] ss:$16 sps:$4 sm:$0xff]  }
 0x5d1   :  { %4079 = vmatprep.subr.bf16.mxu1 %v5126_v36 }
 0x5d3   :  { %1188 = vmatpush1.bf16.msra.mxu0 %v5670_v31 }
 0x5d4   :  { %1189 = vmatprep.subr.bf16.mxu0 %v5673_v32  ;;  %4080 = vmatpush3.bf16.msra.mxu1 %v5362_v39  ;;  %v5694_v39 = vld [vmem:[#allocation5 + $0xc8] ss:$16 sps:$4 sm:$0xff]  }
 0x5d5   :  { %4081 = vmatprep.subr.bf16.mxu1 %v5126_v36 }
 0x5d7   :  { %1190 = vmatpush1.bf16.msra.mxu0 %v5678_v37 }
 0x5d8   :  { %1191 = vmatprep.subr.bf16.mxu0 %v5681_v17  ;;  %4082 = vmatpush3.bf16.msra.mxu1 %v5366_v40  ;;  %v5702_v40 = vld [vmem:[#allocation5 + $0xe8] ss:$16 sps:$4 sm:$0xff]  }
 0x5d9   :  { %4083 = vmatprep.subr.bf16.mxu1 %v5126_v36 }
 0x5db   :  { %1192 = vmatpush1.bf16.msra.mxu0 %v5686_v38 }
 0x5dc   :  { %1193 = vmatprep.subr.bf16.mxu0 %v5689_v34  ;;  %4084 = vmatpush3.bf16.msra.mxu1 %v5370_v41  ;;  %v5717_v41 = vld [vmem:[#allocation5 + $0x80] ss:$16 sps:$4 sm:$0xff]  }
 0x5dd   :  { %4085 = vmatprep.subr.bf16.mxu1 %v5126_v36 }
 0x5df   :  { %1194 = vmatpush1.bf16.msra.mxu0 %v5694_v39 }
 0x5e0   :  { %1195 = vmatprep.subr.bf16.mxu0 %v5697_v18  ;;  %4086 = vmatpush3.bf16.msra.mxu1 %v5375_v42  ;;  %v5720_v42 = vld [vmem:[#allocation5 + $0xa4] ss:$16 sps:$4 sm:$0xff]  }
 0x5e1   :  { %4087 = vmatprep.subr.bf16.mxu1 %v5126_v36 }
 0x5e3   :  { %1196 = vmatpush1.bf16.msra.mxu0 %v5702_v40 }
 0x5e4   :  { %1296 = vmatprep.subr.bf16.mxu0 %v5598_v7  ;;  %4088 = vmatpush3.bf16.msra.mxu1 %v5379_v43  ;;  %v5723_v43 = vld [vmem:[#allocation5 + $0xa0] ss:$16 sps:$4 sm:$0xff]  }
 0x5e5   :  { %1337 = vmatprep.subr.bf16.mxu1 %v5602_v10 }
 0x5e6   :  { %1214 = vmatmul.mubr.bf16.vlgmr.msra.gmra.mrb[32].mxu0 %v1094_v9 }
 0x5e7   :  { %1297 = vmatpush1.bf16.msra.mxu0 %v5605_v11  ;;  %1328 = vmatprep.mubr.bf16.mxu0 %v5125_v0 }
 0x5e8   :  { %1298 = vmatprep.subr.bf16.mxu0 %v5609_v14 }
 0x5eb   :  { %1299 = vmatpush1.bf16.msra.mxu0 %v5612_v15 }
 0x5ec   :  { %1300 = vmatprep.subr.bf16.mxu0 %v5615_v16 }
 0x5ef   :  { %1301 = vmatpush1.bf16.msra.mxu0 %v5618_v19 }
 0x5f0   :  { %1302 = vmatprep.subr.bf16.mxu0 %v5621_v20 }
 0x5f3   :  { %1303 = vmatpush1.bf16.msra.mxu0 %v5624_v23 }
 0x5f4   :  { %1304 = vmatprep.subr.bf16.mxu0 %v5627_v25 }
 0x5f7   :  { %1305 = vmatpush1.bf16.msra.mxu0 %v5717_v41 }
 0x5f8   :  { %1306 = vmatprep.subr.bf16.mxu0 %v5720_v42 }
 0x5fb   :  { %1307 = vmatpush1.bf16.msra.mxu0 %v5723_v43 }
 0x5fc   :  { %1308 = vmatprep.subr.bf16.mxu0 %v5726_v21 }
 0x5ff   :  { %1309 = vmatpush1.bf16.msra.mxu0 %v5729_v50 }
 0x600   :  { %1310 = vmatprep.subr.bf16.mxu0 %v5732_v22 }
 0x603   :  { %1311 = vmatpush1.bf16.msra.mxu0 %v5735_v51 }
 0x604   :  { %4093 = vmatprep.subr.bf16.mxu0 %v5126_v36 }
 0x699   :  { %v1129_v24 = vpop.f32.mrb[28].mxu0  ;;  %v1174_v53 = vpop.f32.mrb[28].mxu1 }
 0x69a   :  { %v1130_v26 = vadd.f32 %v5445_v58, %v1129_v24  ;;  %v4071_v30 = vpop.f32.mrb[29].mxu0  ;;  %v1176_v29 = vpop.f32.mrb[29].mxu1  ;;  %v1222_v45 = vadd.f32 %v1174_v53, %v1136_v59  ;;  %v1138_v58 = vld [vmem:[#allocation2 + $0xb0] sm:$0xff] }
 0x69b   :  { %v1132_v33 = vpop.f32.mrb[30].mxu0  ;;  %v1178_v62 = vpop.f32.mrb[30].mxu1  ;;  %v1223_v60 = vadd.f32 %v1176_v29, %v1137_v61 }
 0x69c   :  { %1135 = vst [vmem:[#allocation10 + $0x20] sm:$0xff] %v1130_v26  ;;  %v4072_v44 = vpop.f32.mrb[31].mxu0  ;;  %v1179_v63 = vpop.f32.mrb[31].mxu1  ;;  %v3736_v47 = vmul.f32 -1.442695, %v1222_v45  ;;  %v5761_v45 = vld [vmem:[#allocation8 + $0x10] sm:$0xff]  }
 0x69d   :  { %v3737_v46 = vmul.f32 -1.442695, %v1223_v60  ;;  %v5755_v60 = vld [vmem:[#allocation8 + $0x8] sm:$0xff]  }
 0x69f   :  { %4547 = vpow2.f32 %v3737_v46  ;;  %v5767_v46 = vld [vmem:[#allocation8 + $0x18] sm:$0xff]  }
 0x6a0   :  { %4549 = vpow2.f32 %v3736_v47  ;;  %v5773_v47 = vld [vmem:[#allocation8 + $0x20] sm:$0xff]  }
 0x6a9   :  { %v4548_v48 = vpop.eup %4547 }
 0x6aa   :  { %v4550_v49 = vpop.eup %4549  ;;  %v1235_v52 = vadd.f32 1.0, %v4548_v48  ;;  %v5779_v48 = vld [vmem:[#allocation8 + $0x28] sm:$0xff]  }
 0x6ab   :  { %v1229_v54 = vadd.f32 1.0, %v4550_v49  ;;  %v5785_v49 = vld [vmem:[#allocation8 + $0x30] sm:$0xff]  }
 0x6ac   :  { %4551 = vrcp.f32 %v1235_v52  ;;  %v5791_v52 = vld [vmem:[#allocation8 + $0x38] sm:$0xff]  }
 0x6ad   :  { %4553 = vrcp.f32 %v1229_v54 }
 0x6b6   :  { %v4552_v9 = vpop.eup %4551 }
 0x6b7   :  { %v4554_v24 = vpop.eup %4553  ;;  %v1245_v26 = vmul.f32 %v4552_v9, %v5640_v2  ;;  %v5747_v2 = vld [vmem:[#allocation8] sm:$0xff]  }
 0x6b8   :  { %v1293_v9 = vld [vmem:[#allocation2 + $0xc8] sm:$0xff] }
 0x6b9   :  { %v1215_v56 = vpop.f32.mrb[32].mxu0 }
 0x6ba   :  { %v1224_v57 = vadd.f32 %v1215_v56, %v1138_v58  ;;  %v1217_v1 = vpop.f32.mrb[33].mxu0 }
 0x6bb   :  { %v1225_v3 = vadd.f32 %v1217_v1, %v1139_v55  ;;  %v1219_v4 = vpop.f32.mrb[34].mxu0  ;;  %v5815_v55 = vld [vmem:[%s6785_s5] ss:$0 sm:$0xff] }
 0x6bc   :  { %4555 = vtanh.f32 %v1224_v57  ;;  %v1220_v6 = vpop.f32.mrb[35].mxu0 }
 0x6bd   :  { %v3738_v8 = vmul.f32 -1.442695, %v1225_v3 }
 0x6bf   :  { %4557 = vpow2.f32 %v3738_v8 }
 0x6c6   :  { %v4556_v53 = vpop.eup %4555 }
 0x6c7   :  { %v1246_v30 = vmul.f32 %v4556_v53, %v4554_v24  ;;  %v1292_v24 = vld [vmem:[#allocation2 + $0xc0] sm:$0xff] }
 0x6c9   :  { %v4558_v29 = vpop.eup %4557  ;;  %v5741_v33 = vadd.f32 %v1246_v30, %v1245_v26 }
 0x6ca   :  { %v1242_v62 = vadd.f32 1.0, %v4558_v29 }
 0x6cb   :  { %4559 = vtanh.f32 %v5741_v33 }
 0x6cc   :  { %4561 = vrcp.f32 %v1242_v62 }
 0x6d5   :  { %v4560_v44 = vpop.eup %4559 }
 0x6d6   :  { %v4562_v63 = vpop.eup %4561 }
 0x6d7   :  { %v1249_v61 = vmul.f32 %v4562_v63, %v4560_v44 }
 0x6d9   :  { %v1250_v59 = vpack.c.bf16 %v1249_v61, %v1249_v61 }
 0x6db   :  { %4090 = vmatmul.mubr.bf16.vlgmr.msra.gmra.mrb[32].mxu1 %v1250_v59  ;;  %1329 = vmatmul.mubr.bf16.vlgmr.msra.gmra.mrb[36].mxu0 %v1250_v59 }
 0x6dc   :  { %1338 = vmatpush1.bf16.msra.mxu1 %v5643_v12  ;;  %1369 = vmatprep.mubr.bf16.mxu1 %v5125_v0 }
 0x6dd   :  { %1339 = vmatprep.subr.bf16.mxu1 %v5647_v5  ;;  %4094 = vmatpush3.bf16.msra.mxu0 %v5747_v2 }
 0x6de   :  { %4095 = vmatprep.subr.bf16.mxu0 %v5126_v36  ;;  %4109 = vmatprep.mubr.msk.bf16.mxu0 %vm5127_vm0, %v5126_v36 }
 0x6e0   :  { %1340 = vmatpush1.bf16.msra.mxu1 %v5654_v13 }
 0x6e1   :  { %1341 = vmatprep.subr.bf16.mxu1 %v5657_v27  ;;  %4096 = vmatpush3.bf16.msra.mxu0 %v5755_v60 }
 0x6e2   :  { %4097 = vmatprep.subr.bf16.mxu0 %v5126_v36 }
 0x6e4   :  { %1342 = vmatpush1.bf16.msra.mxu1 %v5662_v28 }
 0x6e5   :  { %1343 = vmatprep.subr.bf16.mxu1 %v5665_v35  ;;  %4098 = vmatpush3.bf16.msra.mxu0 %v5761_v45 }
 0x6e6   :  { %4099 = vmatprep.subr.bf16.mxu0 %v5126_v36 }
 0x6e8   :  { %1344 = vmatpush1.bf16.msra.mxu1 %v5670_v31 }
 0x6e9   :  { %1345 = vmatprep.subr.bf16.mxu1 %v5673_v32  ;;  %4100 = vmatpush3.bf16.msra.mxu0 %v5767_v46 }
 0x6ea   :  { %4101 = vmatprep.subr.bf16.mxu0 %v5126_v36 }
 0x6ec   :  { %1346 = vmatpush1.bf16.msra.mxu1 %v5678_v37 }
 0x6ed   :  { %1347 = vmatprep.subr.bf16.mxu1 %v5681_v17  ;;  %4102 = vmatpush3.bf16.msra.mxu0 %v5773_v47 }
 0x6ee   :  { %4103 = vmatprep.subr.bf16.mxu0 %v5126_v36 }
 0x6f0   :  { %1348 = vmatpush1.bf16.msra.mxu1 %v5686_v38 }
 0x6f1   :  { %1349 = vmatprep.subr.bf16.mxu1 %v5689_v34  ;;  %4104 = vmatpush3.bf16.msra.mxu0 %v5779_v48 }
 0x6f2   :  { %4105 = vmatprep.subr.bf16.mxu0 %v5126_v36 }
 0x6f4   :  { %1350 = vmatpush1.bf16.msra.mxu1 %v5694_v39 }
 0x6f5   :  { %1351 = vmatprep.subr.bf16.mxu1 %v5697_v18  ;;  %4106 = vmatpush3.bf16.msra.mxu0 %v5785_v49 }
 0x6f6   :  { %4107 = vmatprep.subr.bf16.mxu0 %v5126_v36 }
 0x6f8   :  { %1352 = vmatpush1.bf16.msra.mxu1 %v5702_v40 }
 0x6f9   :  { %1452 = vmatprep.subr.bf16.mxu1 %v5598_v7  ;;  %4108 = vmatpush3.bf16.msra.mxu0 %v5791_v52 }
 0x6fa   :  { %1493 = vmatprep.subr.bf16.mxu0 %v5602_v10 }
 0x6fb   :  { %1370 = vmatmul.mubr.bf16.vlgmr.msra.gmra.mrb[36].mxu1 %v1250_v59  ;;  %v1294_v59 = vld [vmem:[#allocation2 + $0xd0] sm:$0xff] }
 0x6fc   :  { %1453 = vmatpush1.bf16.msra.mxu1 %v5605_v11  ;;  %1484 = vmatprep.mubr.bf16.mxu1 %v5125_v0 }
 0x6fd   :  { %1454 = vmatprep.subr.bf16.mxu1 %v5609_v14 }
 0x700   :  { %1455 = vmatpush1.bf16.msra.mxu1 %v5612_v15 }
 0x701   :  { %1456 = vmatprep.subr.bf16.mxu1 %v5615_v16 }
 0x704   :  { %1457 = vmatpush1.bf16.msra.mxu1 %v5618_v19 }
 0x705   :  { %1458 = vmatprep.subr.bf16.mxu1 %v5621_v20 }
 0x708   :  { %1459 = vmatpush1.bf16.msra.mxu1 %v5624_v23 }
 0x709   :  { %1460 = vmatprep.subr.bf16.mxu1 %v5627_v25 }
 0x70c   :  { %1461 = vmatpush1.bf16.msra.mxu1 %v5717_v41 }
 0x70d   :  { %1462 = vmatprep.subr.bf16.mxu1 %v5720_v42 }
 0x710   :  { %1463 = vmatpush1.bf16.msra.mxu1 %v5723_v43 }
 0x711   :  { %1464 = vmatprep.subr.bf16.mxu1 %v5726_v21 }
 0x714   :  { %1465 = vmatpush1.bf16.msra.mxu1 %v5729_v50 }
 0x715   :  { %1466 = vmatprep.subr.bf16.mxu1 %v5732_v22 }
 0x718   :  { %1467 = vmatpush1.bf16.msra.mxu1 %v5735_v51 }
 0x719   :  { %4113 = vmatprep.subr.bf16.mxu1 %v5126_v36 }
 0x7ae   :  { %v1285_v54 = vpop.f32.mrb[32].mxu1  ;;  %v1330_v58 = vpop.f32.mrb[36].mxu0 }
 0x7af   :  { %v1286_v56 = vadd.f32 %v5815_v55, %v1285_v54  ;;  %v4091_v57 = vpop.f32.mrb[33].mxu1  ;;  %v1332_v1 = vpop.f32.mrb[37].mxu0  ;;  %v1378_v26 = vadd.f32 %v1330_v58, %v1292_v24  ;;  %v1295_v54 = vld [vmem:[#allocation2 + $0xd8] sm:$0xff] }
 0x7b0   :  { %v1288_v3 = vpop.f32.mrb[34].mxu1  ;;  %v1334_v4 = vpop.f32.mrb[38].mxu0  ;;  %v1379_v53 = vadd.f32 %v1332_v1, %v1293_v9 }
 0x7b1   :  { %1291 = vst [vmem:[#allocation10 + $0x28] sm:$0xff] %v1286_v56  ;;  %v4092_v6 = vpop.f32.mrb[35].mxu1  ;;  %v1335_v8 = vpop.f32.mrb[39].mxu0  ;;  %v3739_v29 = vmul.f32 -1.442695, %v1378_v26 }
 0x7b2   :  { %v3740_v30 = vmul.f32 -1.442695, %v1379_v53 }
 0x7b4   :  { %4563 = vpow2.f32 %v3740_v30 }
 0x7b5   :  { %4565 = vpow2.f32 %v3739_v29 }
 0x7be   :  { %v4564_v62 = vpop.eup %4563 }
 0x7bf   :  { %v4566_v44 = vpop.eup %4565  ;;  %v1391_v63 = vadd.f32 1.0, %v4564_v62 }
 0x7c0   :  { %v1385_v61 = vadd.f32 1.0, %v4566_v44 }
 0x7c1   :  { %4567 = vrcp.f32 %v1391_v63 }
 0x7c2   :  { %4569 = vrcp.f32 %v1385_v61 }
 0x7cb   :  { %v4568_v8 = vpop.eup %4567 }
 0x7cc   :  { %v4570_v9 = vpop.eup %4569  ;;  %v1401_v53 = vmul.f32 %v4568_v8, %v5741_v33  ;;  %v1449_v8 = vld [vmem:[#allocation2 + $0xe8] sm:$0xff] }
 0x7ce   :  { %v1371_v57 = vpop.f32.mrb[36].mxu1 }
 0x7cf   :  { %v1380_v3 = vadd.f32 %v1371_v57, %v1294_v59  ;;  %v1373_v56 = vpop.f32.mrb[37].mxu1 }
 0x7d0   :  { %v1381_v4 = vadd.f32 %v1373_v56, %v1295_v54  ;;  %v1375_v6 = vpop.f32.mrb[38].mxu1 }
 0x7d1   :  { %4571 = vtanh.f32 %v1380_v3  ;;  %v1376_v1 = vpop.f32.mrb[39].mxu1 }
 0x7d2   :  { %v3741_v58 = vmul.f32 -1.442695, %v1381_v4 }
 0x7d4   :  { %4573 = vpow2.f32 %v3741_v58 }
 0x7db   :  { %v4572_v24 = vpop.eup %4571 }
 0x7dc   :  { %v1402_v26 = vmul.f32 %v4572_v24, %v4570_v9  ;;  %v1448_v9 = vld [vmem:[#allocation2 + $0xe0] sm:$0xff] }
 0x7de   :  { %v4574_v30 = vpop.eup %4573  ;;  %v5819_v29 = vadd.f32 %v1402_v26, %v1401_v53 }
 0x7df   :  { %v1398_v62 = vadd.f32 1.0, %v4574_v30 }
 0x7e0   :  { %4575 = vtanh.f32 %v5819_v29 }
 0x7e1   :  { %4577 = vrcp.f32 %v1398_v62 }
 0x7ea   :  { %v4576_v44 = vpop.eup %4575 }
 0x7eb   :  { %v4578_v63 = vpop.eup %4577 }
 0x7ec   :  { %v1405_v61 = vmul.f32 %v4578_v63, %v4576_v44 }
 0x7ee   :  { %v1406_v59 = vpack.c.bf16 %v1405_v61, %v1405_v61 }
 0x7f0   :  { %4110 = vmatmul.mubr.bf16.vlgmr.msra.gmra.mrb[40].mxu0 %v1406_v59  ;;  %1485 = vmatmul.mubr.bf16.vlgmr.msra.gmra.mrb[40].mxu1 %v1406_v59 }
 0x7f1   :  { %1494 = vmatpush1.bf16.msra.mxu0 %v5643_v12  ;;  %1525 = vmatprep.mubr.bf16.mxu0 %v5125_v0 }
 0x7f2   :  { %1495 = vmatprep.subr.bf16.mxu0 %v5647_v5  ;;  %4114 = vmatpush3.bf16.msra.mxu1 %v5747_v2 }
 0x7f3   :  { %4115 = vmatprep.subr.bf16.mxu1 %v5126_v36  ;;  %4129 = vmatprep.mubr.msk.bf16.mxu1 %vm5127_vm0, %v5126_v36 }
 0x7f5   :  { %1496 = vmatpush1.bf16.msra.mxu0 %v5654_v13 }
 0x7f6   :  { %1497 = vmatprep.subr.bf16.mxu0 %v5657_v27  ;;  %4116 = vmatpush3.bf16.msra.mxu1 %v5755_v60 }
 0x7f7   :  { %4117 = vmatprep.subr.bf16.mxu1 %v5126_v36 }
 0x7f9   :  { %1498 = vmatpush1.bf16.msra.mxu0 %v5662_v28 }
 0x7fa   :  { %1499 = vmatprep.subr.bf16.mxu0 %v5665_v35  ;;  %4118 = vmatpush3.bf16.msra.mxu1 %v5761_v45 }
 0x7fb   :  { %4119 = vmatprep.subr.bf16.mxu1 %v5126_v36 }
 0x7fd   :  { %1500 = vmatpush1.bf16.msra.mxu0 %v5670_v31 }
 0x7fe   :  { %1501 = vmatprep.subr.bf16.mxu0 %v5673_v32  ;;  %4120 = vmatpush3.bf16.msra.mxu1 %v5767_v46 }
 0x7ff   :  { %4121 = vmatprep.subr.bf16.mxu1 %v5126_v36 }
 0x801   :  { %1502 = vmatpush1.bf16.msra.mxu0 %v5678_v37 }
 0x802   :  { %1503 = vmatprep.subr.bf16.mxu0 %v5681_v17  ;;  %4122 = vmatpush3.bf16.msra.mxu1 %v5773_v47 }
 0x803   :  { %4123 = vmatprep.subr.bf16.mxu1 %v5126_v36 }
 0x805   :  { %1504 = vmatpush1.bf16.msra.mxu0 %v5686_v38 }
 0x806   :  { %1505 = vmatprep.subr.bf16.mxu0 %v5689_v34  ;;  %4124 = vmatpush3.bf16.msra.mxu1 %v5779_v48 }
 0x807   :  { %4125 = vmatprep.subr.bf16.mxu1 %v5126_v36 }
 0x809   :  { %1506 = vmatpush1.bf16.msra.mxu0 %v5694_v39 }
 0x80a   :  { %1507 = vmatprep.subr.bf16.mxu0 %v5697_v18  ;;  %4126 = vmatpush3.bf16.msra.mxu1 %v5785_v49 }
 0x80b   :  { %4127 = vmatprep.subr.bf16.mxu1 %v5126_v36 }
 0x80d   :  { %1508 = vmatpush1.bf16.msra.mxu0 %v5702_v40 }
 0x80e   :  { %1608 = vmatprep.subr.bf16.mxu0 %v5598_v7  ;;  %4128 = vmatpush3.bf16.msra.mxu1 %v5791_v52 }
 0x80f   :  { %1649 = vmatprep.subr.bf16.mxu1 %v5602_v10 }
 0x810   :  { %1526 = vmatmul.mubr.bf16.vlgmr.msra.gmra.mrb[44].mxu0 %v1406_v59  ;;  %v1450_v59 = vld [vmem:[#allocation2 + $0xf0] sm:$0xff] }
 0x811   :  { %1609 = vmatpush1.bf16.msra.mxu0 %v5605_v11  ;;  %1640 = vmatprep.mubr.bf16.mxu0 %v5125_v0 }
 0x812   :  { %1610 = vmatprep.subr.bf16.mxu0 %v5609_v14 }
 0x815   :  { %1611 = vmatpush1.bf16.msra.mxu0 %v5612_v15 }
 0x816   :  { %1612 = vmatprep.subr.bf16.mxu0 %v5615_v16 }
 0x819   :  { %1613 = vmatpush1.bf16.msra.mxu0 %v5618_v19 }
 0x81a   :  { %1614 = vmatprep.subr.bf16.mxu0 %v5621_v20 }
 0x81d   :  { %1615 = vmatpush1.bf16.msra.mxu0 %v5624_v23 }
 0x81e   :  { %1616 = vmatprep.subr.bf16.mxu0 %v5627_v25 }
 0x821   :  { %1617 = vmatpush1.bf16.msra.mxu0 %v5717_v41 }
 0x822   :  { %1618 = vmatprep.subr.bf16.mxu0 %v5720_v42 }
 0x825   :  { %1619 = vmatpush1.bf16.msra.mxu0 %v5723_v43 }
 0x826   :  { %1620 = vmatprep.subr.bf16.mxu0 %v5726_v21 }
 0x829   :  { %1621 = vmatpush1.bf16.msra.mxu0 %v5729_v50 }
 0x82a   :  { %1622 = vmatprep.subr.bf16.mxu0 %v5732_v22 }
 0x82d   :  { %1623 = vmatpush1.bf16.msra.mxu0 %v5735_v51 }
 0x82e   :  { %4133 = vmatprep.subr.bf16.mxu0 %v5126_v36 }
 0x8c3   :  { %v1441_v33 = vpop.f32.mrb[40].mxu0  ;;  %v1486_v54 = vpop.f32.mrb[40].mxu1 }
 0x8c4   :  { %v1442_v57 = vadd.f32 %v5815_v55, %v1441_v33  ;;  %v4111_v3 = vpop.f32.mrb[41].mxu0  ;;  %v1488_v56 = vpop.f32.mrb[41].mxu1  ;;  %v1534_v53 = vadd.f32 %v1486_v54, %v1448_v9  ;;  %v1451_v33 = vld [vmem:[#allocation2 + $0xf8] sm:$0xff] }
 0x8c5   :  { %v1444_v4 = vpop.f32.mrb[42].mxu0  ;;  %v1490_v6 = vpop.f32.mrb[42].mxu1  ;;  %v1535_v24 = vadd.f32 %v1488_v56, %v1449_v8 }
 0x8c6   :  { %1447 = vst [vmem:[#allocation10 + $0x30] sm:$0xff] %v1442_v57  ;;  %v4112_v1 = vpop.f32.mrb[43].mxu0  ;;  %v1491_v58 = vpop.f32.mrb[43].mxu1  ;;  %v3742_v30 = vmul.f32 -1.442695, %v1534_v53 }
 0x8c7   :  { %v3743_v26 = vmul.f32 -1.442695, %v1535_v24 }
 0x8c9   :  { %4579 = vpow2.f32 %v3743_v26 }
 0x8ca   :  { %4581 = vpow2.f32 %v3742_v30 }
 0x8d3   :  { %v4580_v62 = vpop.eup %4579 }
 0x8d4   :  { %v4582_v44 = vpop.eup %4581  ;;  %v1547_v63 = vadd.f32 1.0, %v4580_v62 }
 0x8d5   :  { %v1541_v61 = vadd.f32 1.0, %v4582_v44 }
 0x8d6   :  { %4583 = vrcp.f32 %v1547_v63 }
 0x8d7   :  { %4585 = vrcp.f32 %v1541_v61 }
 0x8e0   :  { %v4584_v58 = vpop.eup %4583 }
 0x8e1   :  { %v4586_v8 = vpop.eup %4585  ;;  %v1557_v24 = vmul.f32 %v4584_v58, %v5819_v29  ;;  %v1604_v29 = vld [vmem:[#allocation2 + $0x100] sm:$0xff]  ;;  %v1606_v58 = vld [vmem:[#allocation2 + $0x110] sm:$0xff] }
 0x8e3   :  { %v1527_v3 = vpop.f32.mrb[44].mxu0 }
 0x8e4   :  { %v1536_v4 = vadd.f32 %v1527_v3, %v1450_v59  ;;  %v1529_v57 = vpop.f32.mrb[45].mxu0 }
 0x8e5   :  { %v1537_v6 = vadd.f32 %v1529_v57, %v1451_v33  ;;  %v1531_v1 = vpop.f32.mrb[46].mxu0 }
 0x8e6   :  { %4587 = vtanh.f32 %v1536_v4  ;;  %v1532_v56 = vpop.f32.mrb[47].mxu0 }
 0x8e7   :  { %v3744_v54 = vmul.f32 -1.442695, %v1537_v6 }
 0x8e9   :  { %4589 = vpow2.f32 %v3744_v54 }
 0x8f0   :  { %v4588_v9 = vpop.eup %4587 }
 0x8f1   :  { %v1558_v53 = vmul.f32 %v4588_v9, %v4586_v8  ;;  %v1607_v8 = vld [vmem:[#allocation2 + $0x118] sm:$0xff] }
 0x8f3   :  { %v4590_v26 = vpop.eup %4589  ;;  %v5876_v30 = vadd.f32 %v1558_v53, %v1557_v24 }
 0x8f4   :  { %v1554_v62 = vadd.f32 1.0, %v4590_v26 }
 0x8f5   :  { %4591 = vtanh.f32 %v5876_v30 }
 0x8f6   :  { %4593 = vrcp.f32 %v1554_v62 }
 0x8ff   :  { %v4592_v44 = vpop.eup %4591 }
 0x900   :  { %v4594_v63 = vpop.eup %4593 }
 0x901   :  { %v1561_v61 = vmul.f32 %v4594_v63, %v4592_v44 }
 0x903   :  { %v1562_v59 = vpack.c.bf16 %v1561_v61, %v1561_v61 }
 0x905   :  { %4130 = vmatmul.mubr.bf16.vlgmr.msra.gmra.mrb[44].mxu1 %v1562_v59  ;;  %1641 = vmatmul.mubr.bf16.vlgmr.msra.gmra.mrb[48].mxu0 %v1562_v59 }
 0x906   :  { %1650 = vmatpush1.bf16.msra.mxu1 %v5643_v12  ;;  %1681 = vmatprep.mubr.bf16.mxu1 %v5125_v0 }
 0x907   :  { %1651 = vmatprep.subr.bf16.mxu1 %v5647_v5  ;;  %4134 = vmatpush3.bf16.msra.mxu0 %v5747_v2 }
 0x908   :  { %4135 = vmatprep.subr.bf16.mxu0 %v5126_v36  ;;  %4149 = vmatprep.mubr.msk.bf16.mxu0 %vm5127_vm0, %v5126_v36 }
 0x90a   :  { %1652 = vmatpush1.bf16.msra.mxu1 %v5654_v13 }
 0x90b   :  { %1653 = vmatprep.subr.bf16.mxu1 %v5657_v27  ;;  %4136 = vmatpush3.bf16.msra.mxu0 %v5755_v60 }
 0x90c   :  { %4137 = vmatprep.subr.bf16.mxu0 %v5126_v36 }
 0x90e   :  { %1654 = vmatpush1.bf16.msra.mxu1 %v5662_v28 }
 0x90f   :  { %1655 = vmatprep.subr.bf16.mxu1 %v5665_v35  ;;  %4138 = vmatpush3.bf16.msra.mxu0 %v5761_v45 }
 0x910   :  { %4139 = vmatprep.subr.bf16.mxu0 %v5126_v36 }
 0x912   :  { %1656 = vmatpush1.bf16.msra.mxu1 %v5670_v31 }
 0x913   :  { %1657 = vmatprep.subr.bf16.mxu1 %v5673_v32  ;;  %4140 = vmatpush3.bf16.msra.mxu0 %v5767_v46 }
 0x914   :  { %4141 = vmatprep.subr.bf16.mxu0 %v5126_v36 }
 0x916   :  { %1658 = vmatpush1.bf16.msra.mxu1 %v5678_v37 }
 0x917   :  { %1659 = vmatprep.subr.bf16.mxu1 %v5681_v17  ;;  %4142 = vmatpush3.bf16.msra.mxu0 %v5773_v47 }
 0x918   :  { %4143 = vmatprep.subr.bf16.mxu0 %v5126_v36 }
 0x91a   :  { %1660 = vmatpush1.bf16.msra.mxu1 %v5686_v38 }
 0x91b   :  { %1661 = vmatprep.subr.bf16.mxu1 %v5689_v34  ;;  %4144 = vmatpush3.bf16.msra.mxu0 %v5779_v48 }
 0x91c   :  { %4145 = vmatprep.subr.bf16.mxu0 %v5126_v36 }
 0x91e   :  { %1662 = vmatpush1.bf16.msra.mxu1 %v5694_v39 }
 0x91f   :  { %1663 = vmatprep.subr.bf16.mxu1 %v5697_v18  ;;  %4146 = vmatpush3.bf16.msra.mxu0 %v5785_v49 }
 0x920   :  { %4147 = vmatprep.subr.bf16.mxu0 %v5126_v36 }
 0x922   :  { %1664 = vmatpush1.bf16.msra.mxu1 %v5702_v40 }
 0x923   :  { %1764 = vmatprep.subr.bf16.mxu1 %v5598_v7  ;;  %4148 = vmatpush3.bf16.msra.mxu0 %v5791_v52 }
 0x924   :  { %1805 = vmatprep.subr.bf16.mxu0 %v5602_v10 }
 0x925   :  { %1682 = vmatmul.mubr.bf16.vlgmr.msra.gmra.mrb[48].mxu1 %v1562_v59 }
 0x926   :  { %1765 = vmatpush1.bf16.msra.mxu1 %v5605_v11  ;;  %1796 = vmatprep.mubr.bf16.mxu1 %v5125_v0 }
 0x927   :  { %1766 = vmatprep.subr.bf16.mxu1 %v5609_v14 }
 0x92a   :  { %1767 = vmatpush1.bf16.msra.mxu1 %v5612_v15 }
 0x92b   :  { %1768 = vmatprep.subr.bf16.mxu1 %v5615_v16 }
 0x92e   :  { %1769 = vmatpush1.bf16.msra.mxu1 %v5618_v19 }
 0x92f   :  { %1770 = vmatprep.subr.bf16.mxu1 %v5621_v20 }
 0x932   :  { %1771 = vmatpush1.bf16.msra.mxu1 %v5624_v23 }
 0x933   :  { %1772 = vmatprep.subr.bf16.mxu1 %v5627_v25  ;;  %v1605_v25 = vld [vmem:[#allocation2 + $0x108] sm:$0xff] }
 0x936   :  { %1773 = vmatpush1.bf16.msra.mxu1 %v5717_v41 }
 0x937   :  { %1774 = vmatprep.subr.bf16.mxu1 %v5720_v42 }
 0x93a   :  { %1775 = vmatpush1.bf16.msra.mxu1 %v5723_v43 }
 0x93b   :  { %1776 = vmatprep.subr.bf16.mxu1 %v5726_v21 }
 0x93e   :  { %1777 = vmatpush1.bf16.msra.mxu1 %v5729_v50 }
 0x93f   :  { %1778 = vmatprep.subr.bf16.mxu1 %v5732_v22 }
 0x942   :  { %1779 = vmatpush1.bf16.msra.mxu1 %v5735_v51 }
 0x943   :  { %4153 = vmatprep.subr.bf16.mxu1 %v5126_v36 }
 0x9d8   :  { %v1597_v7 = vpop.f32.mrb[44].mxu1  ;;  %v1642_v10 = vpop.f32.mrb[48].mxu0 }
 0x9d9   :  { %v1598_v11 = vadd.f32 %v5815_v55, %v1597_v7  ;;  %v4131_v14 = vpop.f32.mrb[45].mxu1  ;;  %v1644_v15 = vpop.f32.mrb[49].mxu0  ;;  %v1690_v3 = vadd.f32 %v1642_v10, %v1604_v29  ;;  %v1760_v29 = vld [vmem:[#allocation2 + $0x120] sm:$0xff] }
 0x9da   :  { %v1600_v16 = vpop.f32.mrb[46].mxu1  ;;  %v1646_v19 = vpop.f32.mrb[50].mxu0  ;;  %v1691_v33 = vadd.f32 %v1644_v15, %v1605_v25 }
 0x9db   :  { %1603 = vst [vmem:[#allocation10 + $0x38] sm:$0xff] %v1598_v11  ;;  %v4132_v20 = vpop.f32.mrb[47].mxu1  ;;  %v1647_v23 = vpop.f32.mrb[51].mxu0  ;;  %v3745_v57 = vmul.f32 -1.442695, %v1690_v3 }
 0x9dc   :  { %v3746_v4 = vmul.f32 -1.442695, %v1691_v33 }
 0x9de   :  { %4595 = vpow2.f32 %v3746_v4 }
 0x9df   :  { %4597 = vpow2.f32 %v3745_v57 }
 0x9e8   :  { %v4596_v6 = vpop.eup %4595 }
 0x9e9   :  { %v4598_v1 = vpop.eup %4597  ;;  %v1703_v56 = vadd.f32 1.0, %v4596_v6 }
 0x9ea   :  { %v1697_v54 = vadd.f32 1.0, %v4598_v1  ;;  %v1762_v1 = vld [vmem:[#allocation2 + $0x130] sm:$0xff] }
 0x9eb   :  { %4599 = vrcp.f32 %v1703_v56  ;;  %v1763_v56 = vld [vmem:[#allocation2 + $0x138] sm:$0xff] }
 0x9ec   :  { %4601 = vrcp.f32 %v1697_v54 }
 0x9f5   :  { %v4600_v61 = vpop.eup %4599 }
 0x9f6   :  { %v4602_v59 = vpop.eup %4601  ;;  %v1713_v10 = vmul.f32 %v4600_v61, %v5876_v30 }
 0x9f8   :  { %v1683_v9 = vpop.f32.mrb[48].mxu1 }
 0x9f9   :  { %v1692_v24 = vadd.f32 %v1683_v9, %v1606_v58  ;;  %v1685_v53 = vpop.f32.mrb[49].mxu1 }
 0x9fa   :  { %v1693_v26 = vadd.f32 %v1685_v53, %v1607_v8  ;;  %v1687_v62 = vpop.f32.mrb[50].mxu1 }
 0x9fb   :  { %4603 = vtanh.f32 %v1692_v24  ;;  %v1688_v44 = vpop.f32.mrb[51].mxu1 }
 0x9fc   :  { %v3747_v63 = vmul.f32 -1.442695, %v1693_v26 }
 0x9fe   :  { %4605 = vpow2.f32 %v3747_v63 }
 0xa05   :  { %v4604_v7 = vpop.eup %4603 }
 0xa06   :  { %v1714_v11 = vmul.f32 %v4604_v7, %v4602_v59 }
 0xa08   :  { %v4606_v14 = vpop.eup %4605  ;;  %v5933_v15 = vadd.f32 %v1714_v11, %v1713_v10 }
 0xa09   :  { %v1710_v16 = vadd.f32 1.0, %v4606_v14 }
 0xa0a   :  { %4607 = vtanh.f32 %v5933_v15 }
 0xa0b   :  { %4609 = vrcp.f32 %v1710_v16 }
 0xa14   :  { %v4608_v19 = vpop.eup %4607 }
 0xa15   :  { %v4610_v20 = vpop.eup %4609 }
 0xa16   :  { %v1717_v23 = vmul.f32 %v4610_v20, %v4608_v19 }
 0xa18   :  { %v1718_v25 = vpack.c.bf16 %v1717_v23, %v1717_v23  ;;  %v6013_v23 = vld [vmem:[#allocation5 + $0x8] ss:$16 sps:$4 sm:$0xff]  }
 0xa1a   :  { %4150 = vmatmul.mubr.bf16.vlgmr.msra.gmra.mrb[52].mxu0 %v1718_v25  ;;  %1797 = vmatmul.mubr.bf16.vlgmr.msra.gmra.mrb[52].mxu1 %v1718_v25 }
 0xa1b   :  { %1806 = vmatpush1.bf16.msra.mxu0 %v5643_v12  ;;  %1837 = vmatprep.mubr.bf16.mxu0 %v5125_v0  ;;  %v5968_v12 = vld [vmem:[#allocation5 + $0x4] ss:$16 sps:$4 sm:$0xff]  }
 0xa1c   :  { %1807 = vmatprep.subr.bf16.mxu0 %v5647_v5  ;;  %4154 = vmatpush3.bf16.msra.mxu1 %v5747_v2  ;;  %v5972_v5 = vld [vmem:[#allocation5 + $0xc] ss:$16 sps:$4 sm:$0xff]  }
 0xa1d   :  { %4155 = vmatprep.subr.bf16.mxu1 %v5126_v36  ;;  %4169 = vmatprep.mubr.msk.bf16.mxu1 %vm5127_vm0, %v5126_v36 }
 0xa1f   :  { %1808 = vmatpush1.bf16.msra.mxu0 %v5654_v13  ;;  %v5975_v13 = vld [vmem:[#allocation5] ss:$16 sps:$4 sm:$0xff]  }
 0xa20   :  { %1809 = vmatprep.subr.bf16.mxu0 %v5657_v27  ;;  %4156 = vmatpush3.bf16.msra.mxu1 %v5755_v60  ;;  %v5979_v27 = vld [vmem:[#allocation5 + $0x24] ss:$16 sps:$4 sm:$0xff]  }
 0xa21   :  { %4157 = vmatprep.subr.bf16.mxu1 %v5126_v36 }
 0xa23   :  { %1810 = vmatpush1.bf16.msra.mxu0 %v5662_v28  ;;  %v5982_v28 = vld [vmem:[#allocation5 + $0x20] ss:$16 sps:$4 sm:$0xff]  }
 0xa24   :  { %1811 = vmatprep.subr.bf16.mxu0 %v5665_v35  ;;  %4158 = vmatpush3.bf16.msra.mxu1 %v5761_v45  ;;  %v5985_v35 = vld [vmem:[#allocation5 + $0x44] ss:$16 sps:$4 sm:$0xff]  }
 0xa25   :  { %4159 = vmatprep.subr.bf16.mxu1 %v5126_v36 }
 0xa27   :  { %1812 = vmatpush1.bf16.msra.mxu0 %v5670_v31  ;;  %v5988_v31 = vld [vmem:[#allocation5 + $0x40] ss:$16 sps:$4 sm:$0xff]  }
 0xa28   :  { %1813 = vmatprep.subr.bf16.mxu0 %v5673_v32  ;;  %4160 = vmatpush3.bf16.msra.mxu1 %v5767_v46  ;;  %v5991_v32 = vld [vmem:[#allocation5 + $0x64] ss:$16 sps:$4 sm:$0xff]  }
 0xa29   :  { %4161 = vmatprep.subr.bf16.mxu1 %v5126_v36 }
 0xa2b   :  { %1814 = vmatpush1.bf16.msra.mxu0 %v5678_v37  ;;  %v5994_v37 = vld [vmem:[#allocation5 + $0x60] ss:$16 sps:$4 sm:$0xff]  }
 0xa2c   :  { %1815 = vmatprep.subr.bf16.mxu0 %v5681_v17  ;;  %4162 = vmatpush3.bf16.msra.mxu1 %v5773_v47  ;;  %v5997_v17 = vld [vmem:[#allocation5 + $0x84] ss:$16 sps:$4 sm:$0xff]  }
 0xa2d   :  { %4163 = vmatprep.subr.bf16.mxu1 %v5126_v36 }
 0xa2f   :  { %1816 = vmatpush1.bf16.msra.mxu0 %v5686_v38 }
 0xa30   :  { %1817 = vmatprep.subr.bf16.mxu0 %v5689_v34  ;;  %4164 = vmatpush3.bf16.msra.mxu1 %v5779_v48 }
 0xa31   :  { %4165 = vmatprep.subr.bf16.mxu1 %v5126_v36 }
 0xa33   :  { %1818 = vmatpush1.bf16.msra.mxu0 %v5694_v39 }
 0xa34   :  { %1819 = vmatprep.subr.bf16.mxu0 %v5697_v18  ;;  %4166 = vmatpush3.bf16.msra.mxu1 %v5785_v49 }
 0xa35   :  { %4167 = vmatprep.subr.bf16.mxu1 %v5126_v36 }
 0xa37   :  { %1820 = vmatpush1.bf16.msra.mxu0 %v5702_v40 }
 0xa38   :  { %1920 = vmatprep.subr.bf16.mxu0 %v5968_v12  ;;  %4168 = vmatpush3.bf16.msra.mxu1 %v5791_v52 }
 0xa39   :  { %1961 = vmatprep.subr.bf16.mxu1 %v5972_v5 }
 0xa3a   :  { %1838 = vmatmul.mubr.bf16.vlgmr.msra.gmra.mrb[56].mxu0 %v1718_v25  ;;  %v6024_v25 = vld [vmem:[#allocation5 + $0x28] ss:$16 sps:$4 sm:$0xff]  }
 0xa3b   :  { %1921 = vmatpush1.bf16.msra.mxu0 %v5975_v13  ;;  %1952 = vmatprep.mubr.bf16.mxu0 %v5125_v0 }
 0xa3c   :  { %1922 = vmatprep.subr.bf16.mxu0 %v5979_v27 }
 0xa3f   :  { %1923 = vmatpush1.bf16.msra.mxu0 %v5982_v28 }
 0xa40   :  { %1924 = vmatprep.subr.bf16.mxu0 %v5985_v35 }
 0xa43   :  { %1925 = vmatpush1.bf16.msra.mxu0 %v5988_v31 }
 0xa44   :  { %1926 = vmatprep.subr.bf16.mxu0 %v5991_v32 }
 0xa47   :  { %1927 = vmatpush1.bf16.msra.mxu0 %v5994_v37 }
 0xa48   :  { %1928 = vmatprep.subr.bf16.mxu0 %v5997_v17 }
 0xa4b   :  { %1929 = vmatpush1.bf16.msra.mxu0 %v5717_v41 }
 0xa4c   :  { %1930 = vmatprep.subr.bf16.mxu0 %v5720_v42 }
 0xa4f   :  { %1931 = vmatpush1.bf16.msra.mxu0 %v5723_v43 }
 0xa50   :  { %1932 = vmatprep.subr.bf16.mxu0 %v5726_v21  ;;  %v1761_v21 = vld [vmem:[#allocation2 + $0x128] sm:$0xff] }
 0xa53   :  { %1933 = vmatpush1.bf16.msra.mxu0 %v5729_v50 }
 0xa54   :  { %1934 = vmatprep.subr.bf16.mxu0 %v5732_v22 }
 0xa57   :  { %1935 = vmatpush1.bf16.msra.mxu0 %v5735_v51 }
 0xa58   :  { %4173 = vmatprep.subr.bf16.mxu0 %v5126_v36 }
 0xaed   :  { %v1753_v38 = vpop.f32.mrb[52].mxu0  ;;  %v1798_v34 = vpop.f32.mrb[52].mxu1 }
 0xaee   :  { %v1754_v39 = vadd.f32 %v5815_v55, %v1753_v38  ;;  %v4151_v18 = vpop.f32.mrb[53].mxu0  ;;  %v1800_v40 = vpop.f32.mrb[53].mxu1  ;;  %v1846_v33 = vadd.f32 %v1798_v34, %v1760_v29  ;;  %v6027_v38 = vld [vmem:[#allocation5 + $0x4c] ss:$16 sps:$4 sm:$0xff]   ;;  %v6032_v34 = vld [vmem:[#allocation5 + $0x48] ss:$16 sps:$4 sm:$0xff]  }
 0xaef   :  { %v1756_v41 = vpop.f32.mrb[54].mxu0  ;;  %v1802_v42 = vpop.f32.mrb[54].mxu1  ;;  %v1847_v50 = vadd.f32 %v1800_v40, %v1761_v21  ;;  %v6043_v18 = vld [vmem:[#allocation5 + $0x8c] ss:$16 sps:$4 sm:$0xff]   ;;  %v6102_v21 = vld [vmem:[#allocation5 + $0xe4] ss:$16 sps:$4 sm:$0xff]  }
 0xaf0   :  { %1759 = vst [vmem:[#allocation10 + $0x40] sm:$0xff] %v1754_v39  ;;  %v4152_v43 = vpop.f32.mrb[55].mxu0  ;;  %v1803_v30 = vpop.f32.mrb[55].mxu1  ;;  %v3748_v3 = vmul.f32 -1.442695, %v1846_v33 }
 0xaf1   :  { %v3749_v22 = vmul.f32 -1.442695, %v1847_v50  ;;  %v6040_v39 = vld [vmem:[#allocation5 + $0x68] ss:$16 sps:$4 sm:$0xff]   ;;  %v6051_v40 = vld [vmem:[#allocation5 + $0xac] ss:$16 sps:$4 sm:$0xff]  }
 0xaf2   :  { %v6059_v41 = vld [vmem:[#allocation5 + $0xcc] ss:$16 sps:$4 sm:$0xff]   ;;  %v6096_v43 = vld [vmem:[#allocation5 + $0xc4] ss:$16 sps:$4 sm:$0xff]   ;;  %v6099_v30 = vld [vmem:[#allocation5 + $0xc0] ss:$16 sps:$4 sm:$0xff]  }
 0xaf3   :  { %4611 = vpow2.f32 %v3749_v22  ;;  %v6067_v42 = vld [vmem:[#allocation5 + $0xec] ss:$16 sps:$4 sm:$0xff]   ;;  %v6105_v29 = vld [vmem:[#allocation5 + $0xe0] ss:$16 sps:$4 sm:$0xff]  }
 0xaf4   :  { %4613 = vpow2.f32 %v3748_v3 }
 0xafd   :  { %v4612_v51 = vpop.eup %4611 }
 0xafe   :  { %v4614_v4 = vpop.eup %4613  ;;  %v1859_v57 = vadd.f32 1.0, %v4612_v51 }
 0xaff   :  { %v1853_v6 = vadd.f32 1.0, %v4614_v4 }
 0xb00   :  { %4615 = vrcp.f32 %v1859_v57 }
 0xb01   :  { %4617 = vrcp.f32 %v1853_v6 }
 0xb0a   :  { %v4616_v62 = vpop.eup %4615 }
 0xb0b   :  { %v4618_v44 = vpop.eup %4617  ;;  %v1869_v61 = vmul.f32 %v4616_v62, %v5933_v15  ;;  %v6017_v15 = vld [vmem:[#allocation5 + $0x2c] ss:$16 sps:$4 sm:$0xff]  }
 0xb0d   :  { %v1839_v54 = vpop.f32.mrb[56].mxu0 }
 0xb0e   :  { %v1848_v58 = vadd.f32 %v1839_v54, %v1762_v1  ;;  %v1841_v8 = vpop.f32.mrb[57].mxu0  ;;  %v1916_v54 = vld [vmem:[#allocation2 + $0x140] sm:$0xff] }
 0xb0f   :  { %v1849_v9 = vadd.f32 %v1841_v8, %v1763_v56  ;;  %v1843_v24 = vpop.f32.mrb[58].mxu0  ;;  %v1917_v56 = vld [vmem:[#allocation2 + $0x148] sm:$0xff] }
 0xb10   :  { %4619 = vtanh.f32 %v1848_v58  ;;  %v1844_v53 = vpop.f32.mrb[59].mxu0 }
 0xb11   :  { %v3750_v26 = vmul.f32 -1.442695, %v1849_v9 }
 0xb13   :  { %4621 = vpow2.f32 %v3750_v26 }
 0xb1a   :  { %v4620_v63 = vpop.eup %4619 }
 0xb1b   :  { %v1870_v59 = vmul.f32 %v4620_v63, %v4618_v44  ;;  %v1919_v63 = vld [vmem:[#allocation2 + $0x158] sm:$0xff] }
 0xb1d   :  { %v4622_v7 = vpop.eup %4621  ;;  %v6010_v10 = vadd.f32 %v1870_v59, %v1869_v61 }
 0xb1e   :  { %v1866_v11 = vadd.f32 1.0, %v4622_v7 }
 0xb1f   :  { %4623 = vtanh.f32 %v6010_v10 }
 0xb20   :  { %4625 = vrcp.f32 %v1866_v11 }
 0xb29   :  { %v4624_v14 = vpop.eup %4623 }
 0xb2a   :  { %v4626_v16 = vpop.eup %4625 }
 0xb2b   :  { %v1873_v19 = vmul.f32 %v4626_v16, %v4624_v14 }
 0xb2d   :  { %v1874_v20 = vpack.c.bf16 %v1873_v19, %v1873_v19 }
 0xb2f   :  { %4170 = vmatmul.mubr.bf16.vlgmr.msra.gmra.mrb[56].mxu1 %v1874_v20  ;;  %1953 = vmatmul.mubr.bf16.vlgmr.msra.gmra.mrb[60].mxu0 %v1874_v20 }
 0xb30   :  { %1962 = vmatpush1.bf16.msra.mxu1 %v6013_v23  ;;  %1993 = vmatprep.mubr.bf16.mxu1 %v5125_v0 }
 0xb31   :  { %1963 = vmatprep.subr.bf16.mxu1 %v6017_v15  ;;  %4174 = vmatpush3.bf16.msra.mxu0 %v5747_v2  ;;  %v6035_v2 = vld [vmem:[#allocation5 + $0x6c] ss:$16 sps:$4 sm:$0xff]  }
 0xb32   :  { %4175 = vmatprep.subr.bf16.mxu0 %v5126_v36  ;;  %4189 = vmatprep.mubr.msk.bf16.mxu0 %vm5127_vm0, %v5126_v36 }
 0xb34   :  { %1964 = vmatpush1.bf16.msra.mxu1 %v6024_v25 }
 0xb35   :  { %1965 = vmatprep.subr.bf16.mxu1 %v6027_v38  ;;  %4176 = vmatpush3.bf16.msra.mxu0 %v5755_v60  ;;  %v6048_v60 = vld [vmem:[#allocation5 + $0x88] ss:$16 sps:$4 sm:$0xff]  }
 0xb36   :  { %4177 = vmatprep.subr.bf16.mxu0 %v5126_v36 }
 0xb38   :  { %1966 = vmatpush1.bf16.msra.mxu1 %v6032_v34 }
 0xb39   :  { %1967 = vmatprep.subr.bf16.mxu1 %v6035_v2  ;;  %4178 = vmatpush3.bf16.msra.mxu0 %v5761_v45  ;;  %v6056_v45 = vld [vmem:[#allocation5 + $0xa8] ss:$16 sps:$4 sm:$0xff]  }
 0xb3a   :  { %4179 = vmatprep.subr.bf16.mxu0 %v5126_v36 }
 0xb3c   :  { %1968 = vmatpush1.bf16.msra.mxu1 %v6040_v39 }
 0xb3d   :  { %1969 = vmatprep.subr.bf16.mxu1 %v6043_v18  ;;  %4180 = vmatpush3.bf16.msra.mxu0 %v5767_v46  ;;  %v6064_v46 = vld [vmem:[#allocation5 + $0xc8] ss:$16 sps:$4 sm:$0xff]  }
 0xb3e   :  { %4181 = vmatprep.subr.bf16.mxu0 %v5126_v36 }
 0xb40   :  { %1970 = vmatpush1.bf16.msra.mxu1 %v6048_v60 }
 0xb41   :  { %1971 = vmatprep.subr.bf16.mxu1 %v6051_v40  ;;  %4182 = vmatpush3.bf16.msra.mxu0 %v5773_v47  ;;  %v6072_v47 = vld [vmem:[#allocation5 + $0xe8] ss:$16 sps:$4 sm:$0xff]  }
 0xb42   :  { %4183 = vmatprep.subr.bf16.mxu0 %v5126_v36 }
 0xb44   :  { %1972 = vmatpush1.bf16.msra.mxu1 %v6056_v45 }
 0xb45   :  { %1973 = vmatprep.subr.bf16.mxu1 %v6059_v41  ;;  %4184 = vmatpush3.bf16.msra.mxu0 %v5779_v48  ;;  %v6087_v48 = vld [vmem:[#allocation5 + $0x80] ss:$16 sps:$4 sm:$0xff]  }
 0xb46   :  { %4185 = vmatprep.subr.bf16.mxu0 %v5126_v36 }
 0xb48   :  { %1974 = vmatpush1.bf16.msra.mxu1 %v6064_v46 }
 0xb49   :  { %1975 = vmatprep.subr.bf16.mxu1 %v6067_v42  ;;  %4186 = vmatpush3.bf16.msra.mxu0 %v5785_v49  ;;  %v6090_v49 = vld [vmem:[#allocation5 + $0xa4] ss:$16 sps:$4 sm:$0xff]  }
 0xb4a   :  { %4187 = vmatprep.subr.bf16.mxu0 %v5126_v36 }
 0xb4c   :  { %1976 = vmatpush1.bf16.msra.mxu1 %v6072_v47 }
 0xb4d   :  { %2076 = vmatprep.subr.bf16.mxu1 %v5968_v12  ;;  %4188 = vmatpush3.bf16.msra.mxu0 %v5791_v52  ;;  %v6093_v52 = vld [vmem:[#allocation5 + $0xa0] ss:$16 sps:$4 sm:$0xff]  }
 0xb4e   :  { %2117 = vmatprep.subr.bf16.mxu0 %v5972_v5 }
 0xb4f   :  { %1994 = vmatmul.mubr.bf16.vlgmr.msra.gmra.mrb[60].mxu1 %v1874_v20 }
 0xb50   :  { %2077 = vmatpush1.bf16.msra.mxu1 %v5975_v13  ;;  %2108 = vmatprep.mubr.bf16.mxu1 %v5125_v0 }
 0xb51   :  { %2078 = vmatprep.subr.bf16.mxu1 %v5979_v27 }
 0xb54   :  { %2079 = vmatpush1.bf16.msra.mxu1 %v5982_v28 }
 0xb55   :  { %2080 = vmatprep.subr.bf16.mxu1 %v5985_v35 }
 0xb58   :  { %2081 = vmatpush1.bf16.msra.mxu1 %v5988_v31 }
 0xb59   :  { %2082 = vmatprep.subr.bf16.mxu1 %v5991_v32 }
 0xb5c   :  { %2083 = vmatpush1.bf16.msra.mxu1 %v5994_v37 }
 0xb5d   :  { %2084 = vmatprep.subr.bf16.mxu1 %v5997_v17 }
 0xb60   :  { %2085 = vmatpush1.bf16.msra.mxu1 %v6087_v48 }
 0xb61   :  { %2086 = vmatprep.subr.bf16.mxu1 %v6090_v49 }
 0xb64   :  { %2087 = vmatpush1.bf16.msra.mxu1 %v6093_v52 }
 0xb65   :  { %2088 = vmatprep.subr.bf16.mxu1 %v6096_v43 }
 0xb68   :  { %2089 = vmatpush1.bf16.msra.mxu1 %v6099_v30 }
 0xb69   :  { %2090 = vmatprep.subr.bf16.mxu1 %v6102_v21 }
 0xb6c   :  { %2091 = vmatpush1.bf16.msra.mxu1 %v6105_v29 }
 0xb6d   :  { %4193 = vmatprep.subr.bf16.mxu1 %v5126_v36 }
 0xc02   :  { %v1909_v50 = vpop.f32.mrb[56].mxu1  ;;  %v1954_v33 = vpop.f32.mrb[60].mxu0 }
 0xc03   :  { %v1910_v22 = vadd.f32 %v5815_v55, %v1909_v50  ;;  %v4171_v3 = vpop.f32.mrb[57].mxu1  ;;  %v1956_v51 = vpop.f32.mrb[61].mxu0  ;;  %v2002_v8 = vadd.f32 %v1954_v33, %v1916_v54  ;;  %v1918_v55 = vld [vmem:[#allocation2 + $0x150] sm:$0xff] }
 0xc04   :  { %v1912_v4 = vpop.f32.mrb[58].mxu1  ;;  %v1958_v57 = vpop.f32.mrb[62].mxu0  ;;  %v2003_v58 = vadd.f32 %v1956_v51, %v1917_v56 }
 0xc05   :  { %1915 = vst [vmem:[#allocation10 + $0x48] sm:$0xff] %v1910_v22  ;;  %v4172_v6 = vpop.f32.mrb[59].mxu1  ;;  %v1959_v1 = vpop.f32.mrb[63].mxu0  ;;  %v3751_v24 = vmul.f32 -1.442695, %v2002_v8  ;;  %v6131_v8 = vld [vmem:[#allocation8 + $0x10] sm:$0xff]  }
 0xc06   :  { %v3752_v9 = vmul.f32 -1.442695, %v2003_v58  ;;  %v6125_v58 = vld [vmem:[#allocation8 + $0x8] sm:$0xff]  }
 0xc08   :  { %4627 = vpow2.f32 %v3752_v9  ;;  %v6137_v9 = vld [vmem:[#allocation8 + $0x18] sm:$0xff]  }
 0xc09   :  { %4629 = vpow2.f32 %v3751_v24  ;;  %v6143_v24 = vld [vmem:[#allocation8 + $0x20] sm:$0xff]  }
 0xc12   :  { %v4628_v53 = vpop.eup %4627 }
 0xc13   :  { %v4630_v26 = vpop.eup %4629  ;;  %v2015_v62 = vadd.f32 1.0, %v4628_v53  ;;  %v6149_v53 = vld [vmem:[#allocation8 + $0x28] sm:$0xff]  }
 0xc14   :  { %v2009_v44 = vadd.f32 1.0, %v4630_v26  ;;  %v6155_v26 = vld [vmem:[#allocation8 + $0x30] sm:$0xff]  }
 0xc15   :  { %4631 = vrcp.f32 %v2015_v62  ;;  %v6161_v62 = vld [vmem:[#allocation8 + $0x38] sm:$0xff]  }
 0xc16   :  { %4633 = vrcp.f32 %v2009_v44 }
 0xc1f   :  { %v4632_v20 = vpop.eup %4631 }
 0xc20   :  { %v4634_v50 = vpop.eup %4633  ;;  %v2025_v22 = vmul.f32 %v4632_v20, %v6010_v10  ;;  %v6117_v10 = vld [vmem:[#allocation8] sm:$0xff]  }
 0xc21   :  { %v2073_v20 = vld [vmem:[#allocation2 + $0x168] sm:$0xff] }
 0xc22   :  { %v1995_v61 = vpop.f32.mrb[60].mxu1 }
 0xc23   :  { %v2004_v59 = vadd.f32 %v1995_v61, %v1918_v55  ;;  %v1997_v7 = vpop.f32.mrb[61].mxu1 }
 0xc24   :  { %v2005_v11 = vadd.f32 %v1997_v7, %v1919_v63  ;;  %v1999_v14 = vpop.f32.mrb[62].mxu1  ;;  %v6185_v63 = vld [vmem:[%s6785_s5] ss:$0 sm:$0xff] }
 0xc25   :  { %4635 = vtanh.f32 %v2004_v59  ;;  %v2000_v16 = vpop.f32.mrb[63].mxu1 }
 0xc26   :  { %v3753_v19 = vmul.f32 -1.442695, %v2005_v11 }
 0xc28   :  { %4637 = vpow2.f32 %v3753_v19 }
 0xc2f   :  { %v4636_v33 = vpop.eup %4635 }
 0xc30   :  { %v2026_v3 = vmul.f32 %v4636_v33, %v4634_v50  ;;  %v2072_v50 = vld [vmem:[#allocation2 + $0x160] sm:$0xff] }
 0xc32   :  { %v4638_v51 = vpop.eup %4637  ;;  %v6111_v4 = vadd.f32 %v2026_v3, %v2025_v22 }
 0xc33   :  { %v2022_v57 = vadd.f32 1.0, %v4638_v51 }
 0xc34   :  { %4639 = vtanh.f32 %v6111_v4 }
 0xc35   :  { %4641 = vrcp.f32 %v2022_v57 }
 0xc3e   :  { %v4640_v6 = vpop.eup %4639 }
 0xc3f   :  { %v4642_v1 = vpop.eup %4641 }
 0xc40   :  { %v2029_v56 = vmul.f32 %v4642_v1, %v4640_v6 }
 0xc42   :  { %v2030_v54 = vpack.c.bf16 %v2029_v56, %v2029_v56 }
 0xc44   :  { %4190 = vmatmul.mubr.bf16.vlgmr.msra.gmra.mrb[64].mxu0 %v2030_v54  ;;  %2109 = vmatmul.mubr.bf16.vlgmr.msra.gmra.mrb[64].mxu1 %v2030_v54 }
 0xc45   :  { %2118 = vmatpush1.bf16.msra.mxu0 %v6013_v23  ;;  %2149 = vmatprep.mubr.bf16.mxu0 %v5125_v0 }
 0xc46   :  { %2119 = vmatprep.subr.bf16.mxu0 %v6017_v15  ;;  %4194 = vmatpush3.bf16.msra.mxu1 %v6117_v10 }
 0xc47   :  { %4195 = vmatprep.subr.bf16.mxu1 %v5126_v36  ;;  %4209 = vmatprep.mubr.msk.bf16.mxu1 %vm5127_vm0, %v5126_v36 }
 0xc49   :  { %2120 = vmatpush1.bf16.msra.mxu0 %v6024_v25 }
 0xc4a   :  { %2121 = vmatprep.subr.bf16.mxu0 %v6027_v38  ;;  %4196 = vmatpush3.bf16.msra.mxu1 %v6125_v58 }
 0xc4b   :  { %4197 = vmatprep.subr.bf16.mxu1 %v5126_v36 }
 0xc4d   :  { %2122 = vmatpush1.bf16.msra.mxu0 %v6032_v34 }
 0xc4e   :  { %2123 = vmatprep.subr.bf16.mxu0 %v6035_v2  ;;  %4198 = vmatpush3.bf16.msra.mxu1 %v6131_v8 }
 0xc4f   :  { %4199 = vmatprep.subr.bf16.mxu1 %v5126_v36 }
 0xc51   :  { %2124 = vmatpush1.bf16.msra.mxu0 %v6040_v39 }
 0xc52   :  { %2125 = vmatprep.subr.bf16.mxu0 %v6043_v18  ;;  %4200 = vmatpush3.bf16.msra.mxu1 %v6137_v9 }
 0xc53   :  { %4201 = vmatprep.subr.bf16.mxu1 %v5126_v36 }
 0xc55   :  { %2126 = vmatpush1.bf16.msra.mxu0 %v6048_v60 }
 0xc56   :  { %2127 = vmatprep.subr.bf16.mxu0 %v6051_v40  ;;  %4202 = vmatpush3.bf16.msra.mxu1 %v6143_v24 }
 0xc57   :  { %4203 = vmatprep.subr.bf16.mxu1 %v5126_v36 }
 0xc59   :  { %2128 = vmatpush1.bf16.msra.mxu0 %v6056_v45 }
 0xc5a   :  { %2129 = vmatprep.subr.bf16.mxu0 %v6059_v41  ;;  %4204 = vmatpush3.bf16.msra.mxu1 %v6149_v53 }
 0xc5b   :  { %4205 = vmatprep.subr.bf16.mxu1 %v5126_v36 }
 0xc5d   :  { %2130 = vmatpush1.bf16.msra.mxu0 %v6064_v46 }
 0xc5e   :  { %2131 = vmatprep.subr.bf16.mxu0 %v6067_v42  ;;  %4206 = vmatpush3.bf16.msra.mxu1 %v6155_v26 }
 0xc5f   :  { %4207 = vmatprep.subr.bf16.mxu1 %v5126_v36 }
 0xc61   :  { %2132 = vmatpush1.bf16.msra.mxu0 %v6072_v47 }
 0xc62   :  { %2232 = vmatprep.subr.bf16.mxu0 %v5968_v12  ;;  %4208 = vmatpush3.bf16.msra.mxu1 %v6161_v62 }
 0xc63   :  { %2273 = vmatprep.subr.bf16.mxu1 %v5972_v5 }
 0xc64   :  { %2150 = vmatmul.mubr.bf16.vlgmr.msra.gmra.mrb[68].mxu0 %v2030_v54  ;;  %v2074_v54 = vld [vmem:[#allocation2 + $0x170] sm:$0xff] }
 0xc65   :  { %2233 = vmatpush1.bf16.msra.mxu0 %v5975_v13  ;;  %2264 = vmatprep.mubr.bf16.mxu0 %v5125_v0 }
 0xc66   :  { %2234 = vmatprep.subr.bf16.mxu0 %v5979_v27 }
 0xc69   :  { %2235 = vmatpush1.bf16.msra.mxu0 %v5982_v28 }
 0xc6a   :  { %2236 = vmatprep.subr.bf16.mxu0 %v5985_v35 }
 0xc6d   :  { %2237 = vmatpush1.bf16.msra.mxu0 %v5988_v31 }
 0xc6e   :  { %2238 = vmatprep.subr.bf16.mxu0 %v5991_v32 }
 0xc71   :  { %2239 = vmatpush1.bf16.msra.mxu0 %v5994_v37 }
 0xc72   :  { %2240 = vmatprep.subr.bf16.mxu0 %v5997_v17 }
 0xc75   :  { %2241 = vmatpush1.bf16.msra.mxu0 %v6087_v48 }
 0xc76   :  { %2242 = vmatprep.subr.bf16.mxu0 %v6090_v49 }
 0xc79   :  { %2243 = vmatpush1.bf16.msra.mxu0 %v6093_v52 }
 0xc7a   :  { %2244 = vmatprep.subr.bf16.mxu0 %v6096_v43 }
 0xc7d   :  { %2245 = vmatpush1.bf16.msra.mxu0 %v6099_v30 }
 0xc7e   :  { %2246 = vmatprep.subr.bf16.mxu0 %v6102_v21 }
 0xc81   :  { %2247 = vmatpush1.bf16.msra.mxu0 %v6105_v29 }
 0xc82   :  { %4213 = vmatprep.subr.bf16.mxu0 %v5126_v36 }
 0xd17   :  { %v2065_v44 = vpop.f32.mrb[64].mxu0  ;;  %v2110_v55 = vpop.f32.mrb[64].mxu1 }
 0xd18   :  { %v2066_v61 = vadd.f32 %v6185_v63, %v2065_v44  ;;  %v4191_v59 = vpop.f32.mrb[65].mxu0  ;;  %v2112_v7 = vpop.f32.mrb[65].mxu1  ;;  %v2158_v22 = vadd.f32 %v2110_v55, %v2072_v50  ;;  %v2075_v44 = vld [vmem:[#allocation2 + $0x178] sm:$0xff] }
 0xd19   :  { %v2068_v11 = vpop.f32.mrb[66].mxu0  ;;  %v2114_v14 = vpop.f32.mrb[66].mxu1  ;;  %v2159_v33 = vadd.f32 %v2112_v7, %v2073_v20 }
 0xd1a   :  { %2071 = vst [vmem:[#allocation10 + $0x50] sm:$0xff] %v2066_v61  ;;  %v4192_v16 = vpop.f32.mrb[67].mxu0  ;;  %v2115_v19 = vpop.f32.mrb[67].mxu1  ;;  %v3754_v51 = vmul.f32 -1.442695, %v2158_v22 }
 0xd1b   :  { %v3755_v3 = vmul.f32 -1.442695, %v2159_v33 }
 0xd1d   :  { %4643 = vpow2.f32 %v3755_v3 }
 0xd1e   :  { %4645 = vpow2.f32 %v3754_v51 }
 0xd27   :  { %v4644_v57 = vpop.eup %4643 }
 0xd28   :  { %v4646_v6 = vpop.eup %4645  ;;  %v2171_v1 = vadd.f32 1.0, %v4644_v57 }
 0xd29   :  { %v2165_v56 = vadd.f32 1.0, %v4646_v6 }
 0xd2a   :  { %4647 = vrcp.f32 %v2171_v1 }
 0xd2b   :  { %4649 = vrcp.f32 %v2165_v56 }
 0xd34   :  { %v4648_v19 = vpop.eup %4647 }
 0xd35   :  { %v4650_v20 = vpop.eup %4649  ;;  %v2181_v33 = vmul.f32 %v4648_v19, %v6111_v4  ;;  %v2229_v19 = vld [vmem:[#allocation2 + $0x188] sm:$0xff] }
 0xd37   :  { %v2151_v59 = vpop.f32.mrb[68].mxu0 }
 0xd38   :  { %v2160_v11 = vadd.f32 %v2151_v59, %v2074_v54  ;;  %v2153_v61 = vpop.f32.mrb[69].mxu0 }
 0xd39   :  { %v2161_v14 = vadd.f32 %v2153_v61, %v2075_v44  ;;  %v2155_v16 = vpop.f32.mrb[70].mxu0 }
 0xd3a   :  { %4651 = vtanh.f32 %v2160_v11  ;;  %v2156_v7 = vpop.f32.mrb[71].mxu0 }
 0xd3b   :  { %v3756_v55 = vmul.f32 -1.442695, %v2161_v14 }
 0xd3d   :  { %4653 = vpow2.f32 %v3756_v55 }
 0xd44   :  { %v4652_v50 = vpop.eup %4651 }
 0xd45   :  { %v2182_v22 = vmul.f32 %v4652_v50, %v4650_v20  ;;  %v2228_v20 = vld [vmem:[#allocation2 + $0x180] sm:$0xff] }
 0xd47   :  { %v4654_v3 = vpop.eup %4653  ;;  %v6189_v51 = vadd.f32 %v2182_v22, %v2181_v33 }
 0xd48   :  { %v2178_v57 = vadd.f32 1.0, %v4654_v3 }
 0xd49   :  { %4655 = vtanh.f32 %v6189_v51 }
 0xd4a   :  { %4657 = vrcp.f32 %v2178_v57 }
 0xd53   :  { %v4656_v6 = vpop.eup %4655 }
 0xd54   :  { %v4658_v1 = vpop.eup %4657 }
 0xd55   :  { %v2185_v56 = vmul.f32 %v4658_v1, %v4656_v6 }
 0xd57   :  { %v2186_v54 = vpack.c.bf16 %v2185_v56, %v2185_v56 }
 0xd59   :  { %4210 = vmatmul.mubr.bf16.vlgmr.msra.gmra.mrb[68].mxu1 %v2186_v54  ;;  %2265 = vmatmul.mubr.bf16.vlgmr.msra.gmra.mrb[72].mxu0 %v2186_v54 }
 0xd5a   :  { %2274 = vmatpush1.bf16.msra.mxu1 %v6013_v23  ;;  %2305 = vmatprep.mubr.bf16.mxu1 %v5125_v0 }
 0xd5b   :  { %2275 = vmatprep.subr.bf16.mxu1 %v6017_v15  ;;  %4214 = vmatpush3.bf16.msra.mxu0 %v6117_v10 }
 0xd5c   :  { %4215 = vmatprep.subr.bf16.mxu0 %v5126_v36  ;;  %4229 = vmatprep.mubr.msk.bf16.mxu0 %vm5127_vm0, %v5126_v36 }
 0xd5e   :  { %2276 = vmatpush1.bf16.msra.mxu1 %v6024_v25 }
 0xd5f   :  { %2277 = vmatprep.subr.bf16.mxu1 %v6027_v38  ;;  %4216 = vmatpush3.bf16.msra.mxu0 %v6125_v58 }
 0xd60   :  { %4217 = vmatprep.subr.bf16.mxu0 %v5126_v36 }
 0xd62   :  { %2278 = vmatpush1.bf16.msra.mxu1 %v6032_v34 }
 0xd63   :  { %2279 = vmatprep.subr.bf16.mxu1 %v6035_v2  ;;  %4218 = vmatpush3.bf16.msra.mxu0 %v6131_v8 }
 0xd64   :  { %4219 = vmatprep.subr.bf16.mxu0 %v5126_v36 }
 0xd66   :  { %2280 = vmatpush1.bf16.msra.mxu1 %v6040_v39 }
 0xd67   :  { %2281 = vmatprep.subr.bf16.mxu1 %v6043_v18  ;;  %4220 = vmatpush3.bf16.msra.mxu0 %v6137_v9 }
 0xd68   :  { %4221 = vmatprep.subr.bf16.mxu0 %v5126_v36 }
 0xd6a   :  { %2282 = vmatpush1.bf16.msra.mxu1 %v6048_v60 }
 0xd6b   :  { %2283 = vmatprep.subr.bf16.mxu1 %v6051_v40  ;;  %4222 = vmatpush3.bf16.msra.mxu0 %v6143_v24 }
 0xd6c   :  { %4223 = vmatprep.subr.bf16.mxu0 %v5126_v36 }
 0xd6e   :  { %2284 = vmatpush1.bf16.msra.mxu1 %v6056_v45 }
 0xd6f   :  { %2285 = vmatprep.subr.bf16.mxu1 %v6059_v41  ;;  %4224 = vmatpush3.bf16.msra.mxu0 %v6149_v53 }
 0xd70   :  { %4225 = vmatprep.subr.bf16.mxu0 %v5126_v36 }
 0xd72   :  { %2286 = vmatpush1.bf16.msra.mxu1 %v6064_v46 }
 0xd73   :  { %2287 = vmatprep.subr.bf16.mxu1 %v6067_v42  ;;  %4226 = vmatpush3.bf16.msra.mxu0 %v6155_v26 }
 0xd74   :  { %4227 = vmatprep.subr.bf16.mxu0 %v5126_v36 }
 0xd76   :  { %2288 = vmatpush1.bf16.msra.mxu1 %v6072_v47 }
 0xd77   :  { %2388 = vmatprep.subr.bf16.mxu1 %v5968_v12  ;;  %4228 = vmatpush3.bf16.msra.mxu0 %v6161_v62 }
 0xd78   :  { %2429 = vmatprep.subr.bf16.mxu0 %v5972_v5 }
 0xd79   :  { %2306 = vmatmul.mubr.bf16.vlgmr.msra.gmra.mrb[72].mxu1 %v2186_v54  ;;  %v2230_v54 = vld [vmem:[#allocation2 + $0x190] sm:$0xff] }
 0xd7a   :  { %2389 = vmatpush1.bf16.msra.mxu1 %v5975_v13  ;;  %2420 = vmatprep.mubr.bf16.mxu1 %v5125_v0 }
 0xd7b   :  { %2390 = vmatprep.subr.bf16.mxu1 %v5979_v27 }
 0xd7e   :  { %2391 = vmatpush1.bf16.msra.mxu1 %v5982_v28 }
 0xd7f   :  { %2392 = vmatprep.subr.bf16.mxu1 %v5985_v35 }
 0xd82   :  { %2393 = vmatpush1.bf16.msra.mxu1 %v5988_v31 }
 0xd83   :  { %2394 = vmatprep.subr.bf16.mxu1 %v5991_v32 }
 0xd86   :  { %2395 = vmatpush1.bf16.msra.mxu1 %v5994_v37 }
 0xd87   :  { %2396 = vmatprep.subr.bf16.mxu1 %v5997_v17 }
 0xd8a   :  { %2397 = vmatpush1.bf16.msra.mxu1 %v6087_v48 }
 0xd8b   :  { %2398 = vmatprep.subr.bf16.mxu1 %v6090_v49 }
 0xd8e   :  { %2399 = vmatpush1.bf16.msra.mxu1 %v6093_v52 }
 0xd8f   :  { %2400 = vmatprep.subr.bf16.mxu1 %v6096_v43 }
 0xd92   :  { %2401 = vmatpush1.bf16.msra.mxu1 %v6099_v30 }
 0xd93   :  { %2402 = vmatprep.subr.bf16.mxu1 %v6102_v21 }
 0xd96   :  { %2403 = vmatpush1.bf16.msra.mxu1 %v6105_v29 }
 0xd97   :  { %4233 = vmatprep.subr.bf16.mxu1 %v5126_v36 }
 0xe2c   :  { %v2221_v4 = vpop.f32.mrb[68].mxu1  ;;  %v2266_v44 = vpop.f32.mrb[72].mxu0 }
 0xe2d   :  { %v2222_v59 = vadd.f32 %v6185_v63, %v2221_v4  ;;  %v4211_v11 = vpop.f32.mrb[69].mxu1  ;;  %v2268_v61 = vpop.f32.mrb[73].mxu0  ;;  %v2314_v33 = vadd.f32 %v2266_v44, %v2228_v20  ;;  %v2231_v4 = vld [vmem:[#allocation2 + $0x198] sm:$0xff] }
 0xe2e   :  { %v2224_v14 = vpop.f32.mrb[70].mxu1  ;;  %v2270_v16 = vpop.f32.mrb[74].mxu0  ;;  %v2315_v50 = vadd.f32 %v2268_v61, %v2229_v19 }
 0xe2f   :  { %2227 = vst [vmem:[#allocation10 + $0x58] sm:$0xff] %v2222_v59  ;;  %v4212_v7 = vpop.f32.mrb[71].mxu1  ;;  %v2271_v55 = vpop.f32.mrb[75].mxu0  ;;  %v3757_v3 = vmul.f32 -1.442695, %v2314_v33 }
 0xe30   :  { %v3758_v22 = vmul.f32 -1.442695, %v2315_v50 }
 0xe32   :  { %4659 = vpow2.f32 %v3758_v22 }
 0xe33   :  { %4661 = vpow2.f32 %v3757_v3 }
 0xe3c   :  { %v4660_v57 = vpop.eup %4659 }
 0xe3d   :  { %v4662_v6 = vpop.eup %4661  ;;  %v2327_v1 = vadd.f32 1.0, %v4660_v57 }
 0xe3e   :  { %v2321_v56 = vadd.f32 1.0, %v4662_v6 }
 0xe3f   :  { %4663 = vrcp.f32 %v2327_v1 }
 0xe40   :  { %4665 = vrcp.f32 %v2321_v56 }
 0xe49   :  { %v4664_v55 = vpop.eup %4663 }
 0xe4a   :  { %v4666_v19 = vpop.eup %4665  ;;  %v2337_v50 = vmul.f32 %v4664_v55, %v6189_v51  ;;  %v2384_v51 = vld [vmem:[#allocation2 + $0x1a0] sm:$0xff]  ;;  %v2386_v55 = vld [vmem:[#allocation2 + $0x1b0] sm:$0xff] }
 0xe4c   :  { %v2307_v11 = vpop.f32.mrb[72].mxu1 }
 0xe4d   :  { %v2316_v14 = vadd.f32 %v2307_v11, %v2230_v54  ;;  %v2309_v59 = vpop.f32.mrb[73].mxu1 }
 0xe4e   :  { %v2317_v16 = vadd.f32 %v2309_v59, %v2231_v4  ;;  %v2311_v7 = vpop.f32.mrb[74].mxu1 }
 0xe4f   :  { %4667 = vtanh.f32 %v2316_v14  ;;  %v2312_v61 = vpop.f32.mrb[75].mxu1 }
 0xe50   :  { %v3759_v44 = vmul.f32 -1.442695, %v2317_v16 }
 0xe52   :  { %4669 = vpow2.f32 %v3759_v44 }
 0xe59   :  { %v4668_v20 = vpop.eup %4667 }
 0xe5a   :  { %v2338_v33 = vmul.f32 %v4668_v20, %v4666_v19  ;;  %v2387_v19 = vld [vmem:[#allocation2 + $0x1b8] sm:$0xff] }
 0xe5c   :  { %v4670_v22 = vpop.eup %4669  ;;  %v6246_v3 = vadd.f32 %v2338_v33, %v2337_v50 }
 0xe5d   :  { %v2334_v57 = vadd.f32 1.0, %v4670_v22 }
 0xe5e   :  { %4671 = vtanh.f32 %v6246_v3 }
 0xe5f   :  { %4673 = vrcp.f32 %v2334_v57 }
 0xe68   :  { %v4672_v6 = vpop.eup %4671 }
 0xe69   :  { %v4674_v1 = vpop.eup %4673 }
 0xe6a   :  { %v2341_v56 = vmul.f32 %v4674_v1, %v4672_v6 }
 0xe6c   :  { %v2342_v54 = vpack.c.bf16 %v2341_v56, %v2341_v56 }
 0xe6e   :  { %4230 = vmatmul.mubr.bf16.vlgmr.msra.gmra.mrb[76].mxu0 %v2342_v54  ;;  %2421 = vmatmul.mubr.bf16.vlgmr.msra.gmra.mrb[76].mxu1 %v2342_v54 }
 0xe6f   :  { %2430 = vmatpush1.bf16.msra.mxu0 %v6013_v23  ;;  %2461 = vmatprep.mubr.bf16.mxu0 %v5125_v0 }
 0xe70   :  { %2431 = vmatprep.subr.bf16.mxu0 %v6017_v15  ;;  %4234 = vmatpush3.bf16.msra.mxu1 %v6117_v10 }
 0xe71   :  { %4235 = vmatprep.subr.bf16.mxu1 %v5126_v36  ;;  %4249 = vmatprep.mubr.msk.bf16.mxu1 %vm5127_vm0, %v5126_v36 }
 0xe73   :  { %2432 = vmatpush1.bf16.msra.mxu0 %v6024_v25 }
 0xe74   :  { %2433 = vmatprep.subr.bf16.mxu0 %v6027_v38  ;;  %4236 = vmatpush3.bf16.msra.mxu1 %v6125_v58 }
 0xe75   :  { %4237 = vmatprep.subr.bf16.mxu1 %v5126_v36 }
 0xe77   :  { %2434 = vmatpush1.bf16.msra.mxu0 %v6032_v34 }
 0xe78   :  { %2435 = vmatprep.subr.bf16.mxu0 %v6035_v2  ;;  %4238 = vmatpush3.bf16.msra.mxu1 %v6131_v8 }
 0xe79   :  { %4239 = vmatprep.subr.bf16.mxu1 %v5126_v36 }
 0xe7b   :  { %2436 = vmatpush1.bf16.msra.mxu0 %v6040_v39 }
 0xe7c   :  { %2437 = vmatprep.subr.bf16.mxu0 %v6043_v18  ;;  %4240 = vmatpush3.bf16.msra.mxu1 %v6137_v9 }
 0xe7d   :  { %4241 = vmatprep.subr.bf16.mxu1 %v5126_v36 }
 0xe7f   :  { %2438 = vmatpush1.bf16.msra.mxu0 %v6048_v60 }
 0xe80   :  { %2439 = vmatprep.subr.bf16.mxu0 %v6051_v40  ;;  %4242 = vmatpush3.bf16.msra.mxu1 %v6143_v24 }
 0xe81   :  { %4243 = vmatprep.subr.bf16.mxu1 %v5126_v36 }
 0xe83   :  { %2440 = vmatpush1.bf16.msra.mxu0 %v6056_v45 }
 0xe84   :  { %2441 = vmatprep.subr.bf16.mxu0 %v6059_v41  ;;  %4244 = vmatpush3.bf16.msra.mxu1 %v6149_v53 }
 0xe85   :  { %4245 = vmatprep.subr.bf16.mxu1 %v5126_v36 }
 0xe87   :  { %2442 = vmatpush1.bf16.msra.mxu0 %v6064_v46 }
 0xe88   :  { %2443 = vmatprep.subr.bf16.mxu0 %v6067_v42  ;;  %4246 = vmatpush3.bf16.msra.mxu1 %v6155_v26 }
 0xe89   :  { %4247 = vmatprep.subr.bf16.mxu1 %v5126_v36 }
 0xe8b   :  { %2444 = vmatpush1.bf16.msra.mxu0 %v6072_v47 }
 0xe8c   :  { %2544 = vmatprep.subr.bf16.mxu0 %v5968_v12  ;;  %4248 = vmatpush3.bf16.msra.mxu1 %v6161_v62 }
 0xe8d   :  { %2585 = vmatprep.subr.bf16.mxu1 %v5972_v5 }
 0xe8e   :  { %2462 = vmatmul.mubr.bf16.vlgmr.msra.gmra.mrb[80].mxu0 %v2342_v54 }
 0xe8f   :  { %2545 = vmatpush1.bf16.msra.mxu0 %v5975_v13  ;;  %2576 = vmatprep.mubr.bf16.mxu0 %v5125_v0 }
 0xe90   :  { %2546 = vmatprep.subr.bf16.mxu0 %v5979_v27 }
 0xe93   :  { %2547 = vmatpush1.bf16.msra.mxu0 %v5982_v28 }
 0xe94   :  { %2548 = vmatprep.subr.bf16.mxu0 %v5985_v35 }
 0xe97   :  { %2549 = vmatpush1.bf16.msra.mxu0 %v5988_v31 }
 0xe98   :  { %2550 = vmatprep.subr.bf16.mxu0 %v5991_v32 }
 0xe9b   :  { %2551 = vmatpush1.bf16.msra.mxu0 %v5994_v37 }
 0xe9c   :  { %2552 = vmatprep.subr.bf16.mxu0 %v5997_v17  ;;  %v2385_v17 = vld [vmem:[#allocation2 + $0x1a8] sm:$0xff] }
 0xe9f   :  { %2553 = vmatpush1.bf16.msra.mxu0 %v6087_v48 }
 0xea0   :  { %2554 = vmatprep.subr.bf16.mxu0 %v6090_v49 }
 0xea3   :  { %2555 = vmatpush1.bf16.msra.mxu0 %v6093_v52 }
 0xea4   :  { %2556 = vmatprep.subr.bf16.mxu0 %v6096_v43 }
 0xea7   :  { %2557 = vmatpush1.bf16.msra.mxu0 %v6099_v30 }
 0xea8   :  { %2558 = vmatprep.subr.bf16.mxu0 %v6102_v21 }
 0xeab   :  { %2559 = vmatpush1.bf16.msra.mxu0 %v6105_v29 }
 0xeac   :  { %4253 = vmatprep.subr.bf16.mxu0 %v5126_v36 }
 0xf41   :  { %v2377_v12 = vpop.f32.mrb[76].mxu0  ;;  %v2422_v5 = vpop.f32.mrb[76].mxu1 }
 0xf42   :  { %v2378_v13 = vadd.f32 %v6185_v63, %v2377_v12  ;;  %v4231_v27 = vpop.f32.mrb[77].mxu0  ;;  %v2424_v28 = vpop.f32.mrb[77].mxu1  ;;  %v2470_v11 = vadd.f32 %v2422_v5, %v2384_v51  ;;  %v2540_v51 = vld [vmem:[#allocation2 + $0x1c0] sm:$0xff] }
 0xf43   :  { %v2380_v35 = vpop.f32.mrb[78].mxu0  ;;  %v2426_v31 = vpop.f32.mrb[78].mxu1  ;;  %v2471_v4 = vadd.f32 %v2424_v28, %v2385_v17 }
 0xf44   :  { %2383 = vst [vmem:[#allocation10 + $0x60] sm:$0xff] %v2378_v13  ;;  %v4232_v32 = vpop.f32.mrb[79].mxu0  ;;  %v2427_v37 = vpop.f32.mrb[79].mxu1  ;;  %v3760_v59 = vmul.f32 -1.442695, %v2470_v11 }
 0xf45   :  { %v3761_v14 = vmul.f32 -1.442695, %v2471_v4 }
 0xf47   :  { %4675 = vpow2.f32 %v3761_v14 }
 0xf48   :  { %4677 = vpow2.f32 %v3760_v59 }
 0xf51   :  { %v4676_v16 = vpop.eup %4675 }
 0xf52   :  { %v4678_v7 = vpop.eup %4677  ;;  %v2483_v61 = vadd.f32 1.0, %v4676_v16 }
 0xf53   :  { %v2477_v44 = vadd.f32 1.0, %v4678_v7  ;;  %v2542_v7 = vld [vmem:[#allocation2 + $0x1d0] sm:$0xff] }
 0xf54   :  { %4679 = vrcp.f32 %v2483_v61  ;;  %v2543_v61 = vld [vmem:[#allocation2 + $0x1d8] sm:$0xff] }
 0xf55   :  { %4681 = vrcp.f32 %v2477_v44 }
 0xf5e   :  { %v4680_v56 = vpop.eup %4679 }
 0xf5f   :  { %v4682_v54 = vpop.eup %4681  ;;  %v2493_v5 = vmul.f32 %v4680_v56, %v6246_v3 }
 0xf61   :  { %v2463_v20 = vpop.f32.mrb[80].mxu0 }
 0xf62   :  { %v2472_v50 = vadd.f32 %v2463_v20, %v2386_v55  ;;  %v2465_v33 = vpop.f32.mrb[81].mxu0 }
 0xf63   :  { %v2473_v22 = vadd.f32 %v2465_v33, %v2387_v19  ;;  %v2467_v57 = vpop.f32.mrb[82].mxu0 }
 0xf64   :  { %4683 = vtanh.f32 %v2472_v50  ;;  %v2468_v6 = vpop.f32.mrb[83].mxu0 }
 0xf65   :  { %v3762_v1 = vmul.f32 -1.442695, %v2473_v22 }
 0xf67   :  { %4685 = vpow2.f32 %v3762_v1 }
 0xf6e   :  { %v4684_v12 = vpop.eup %4683 }
 0xf6f   :  { %v2494_v13 = vmul.f32 %v4684_v12, %v4682_v54 }
 0xf71   :  { %v4686_v27 = vpop.eup %4685  ;;  %v6303_v28 = vadd.f32 %v2494_v13, %v2493_v5 }
 0xf72   :  { %v2490_v35 = vadd.f32 1.0, %v4686_v27 }
 0xf73   :  { %4687 = vtanh.f32 %v6303_v28 }
 0xf74   :  { %4689 = vrcp.f32 %v2490_v35 }
 0xf7d   :  { %v4688_v31 = vpop.eup %4687 }
 0xf7e   :  { %v4690_v32 = vpop.eup %4689 }
 0xf7f   :  { %v2497_v37 = vmul.f32 %v4690_v32, %v4688_v31 }
 0xf81   :  { %v2498_v17 = vpack.c.bf16 %v2497_v37, %v2497_v37  ;;  %v6383_v37 = vld [vmem:[#allocation5 + $0x8] ss:$16 sps:$4 sm:$0xff]  }
 0xf83   :  { %4250 = vmatmul.mubr.bf16.vlgmr.msra.gmra.mrb[80].mxu1 %v2498_v17  ;;  %2577 = vmatmul.mubr.bf16.vlgmr.msra.gmra.mrb[84].mxu0 %v2498_v17 }
 0xf84   :  { %2586 = vmatpush1.bf16.msra.mxu1 %v6013_v23  ;;  %2617 = vmatprep.mubr.bf16.mxu1 %v5125_v0  ;;  %v6338_v23 = vld [vmem:[#allocation5 + $0x4] ss:$16 sps:$4 sm:$0xff]  }
 0xf85   :  { %2587 = vmatprep.subr.bf16.mxu1 %v6017_v15  ;;  %4254 = vmatpush3.bf16.msra.mxu0 %v6117_v10  ;;  %v6342_v15 = vld [vmem:[#allocation5 + $0xc] ss:$16 sps:$4 sm:$0xff]  }
 0xf86   :  { %4255 = vmatprep.subr.bf16.mxu0 %v5126_v36  ;;  %4269 = vmatprep.mubr.msk.bf16.mxu0 %vm5127_vm0, %v5126_v36 }
 0xf88   :  { %2588 = vmatpush1.bf16.msra.mxu1 %v6024_v25  ;;  %v6345_v25 = vld [vmem:[#allocation5] ss:$16 sps:$4 sm:$0xff]  }
 0xf89   :  { %2589 = vmatprep.subr.bf16.mxu1 %v6027_v38  ;;  %4256 = vmatpush3.bf16.msra.mxu0 %v6125_v58  ;;  %v6349_v38 = vld [vmem:[#allocation5 + $0x24] ss:$16 sps:$4 sm:$0xff]  }
 0xf8a   :  { %4257 = vmatprep.subr.bf16.mxu0 %v5126_v36 }
 0xf8c   :  { %2590 = vmatpush1.bf16.msra.mxu1 %v6032_v34  ;;  %v6352_v34 = vld [vmem:[#allocation5 + $0x20] ss:$16 sps:$4 sm:$0xff]  }
 0xf8d   :  { %2591 = vmatprep.subr.bf16.mxu1 %v6035_v2  ;;  %4258 = vmatpush3.bf16.msra.mxu0 %v6131_v8  ;;  %v6355_v2 = vld [vmem:[#allocation5 + $0x44] ss:$16 sps:$4 sm:$0xff]  }
 0xf8e   :  { %4259 = vmatprep.subr.bf16.mxu0 %v5126_v36 }
 0xf90   :  { %2592 = vmatpush1.bf16.msra.mxu1 %v6040_v39  ;;  %v6358_v39 = vld [vmem:[#allocation5 + $0x40] ss:$16 sps:$4 sm:$0xff]  }
 0xf91   :  { %2593 = vmatprep.subr.bf16.mxu1 %v6043_v18  ;;  %4260 = vmatpush3.bf16.msra.mxu0 %v6137_v9  ;;  %v6361_v18 = vld [vmem:[#allocation5 + $0x64] ss:$16 sps:$4 sm:$0xff]  }
 0xf92   :  { %4261 = vmatprep.subr.bf16.mxu0 %v5126_v36 }
 0xf94   :  { %2594 = vmatpush1.bf16.msra.mxu1 %v6048_v60  ;;  %v6364_v60 = vld [vmem:[#allocation5 + $0x60] ss:$16 sps:$4 sm:$0xff]  }
 0xf95   :  { %2595 = vmatprep.subr.bf16.mxu1 %v6051_v40  ;;  %4262 = vmatpush3.bf16.msra.mxu0 %v6143_v24  ;;  %v6367_v40 = vld [vmem:[#allocation5 + $0x84] ss:$16 sps:$4 sm:$0xff]  }
 0xf96   :  { %4263 = vmatprep.subr.bf16.mxu0 %v5126_v36 }
 0xf98   :  { %2596 = vmatpush1.bf16.msra.mxu1 %v6056_v45 }
 0xf99   :  { %2597 = vmatprep.subr.bf16.mxu1 %v6059_v41  ;;  %4264 = vmatpush3.bf16.msra.mxu0 %v6149_v53 }
 0xf9a   :  { %4265 = vmatprep.subr.bf16.mxu0 %v5126_v36 }
 0xf9c   :  { %2598 = vmatpush1.bf16.msra.mxu1 %v6064_v46 }
 0xf9d   :  { %2599 = vmatprep.subr.bf16.mxu1 %v6067_v42  ;;  %4266 = vmatpush3.bf16.msra.mxu0 %v6155_v26 }
 0xf9e   :  { %4267 = vmatprep.subr.bf16.mxu0 %v5126_v36 }
 0xfa0   :  { %2600 = vmatpush1.bf16.msra.mxu1 %v6072_v47 }
 0xfa1   :  { %2700 = vmatprep.subr.bf16.mxu1 %v6338_v23  ;;  %4268 = vmatpush3.bf16.msra.mxu0 %v6161_v62 }
 0xfa2   :  { %2741 = vmatprep.subr.bf16.mxu0 %v6342_v15 }
 0xfa3   :  { %2618 = vmatmul.mubr.bf16.vlgmr.msra.gmra.mrb[84].mxu1 %v2498_v17  ;;  %v6394_v17 = vld [vmem:[#allocation5 + $0x28] ss:$16 sps:$4 sm:$0xff]  }
 0xfa4   :  { %2701 = vmatpush1.bf16.msra.mxu1 %v6345_v25  ;;  %2732 = vmatprep.mubr.bf16.mxu1 %v5125_v0 }
 0xfa5   :  { %2702 = vmatprep.subr.bf16.mxu1 %v6349_v38 }
 0xfa8   :  { %2703 = vmatpush1.bf16.msra.mxu1 %v6352_v34 }
 0xfa9   :  { %2704 = vmatprep.subr.bf16.mxu1 %v6355_v2 }
 0xfac   :  { %2705 = vmatpush1.bf16.msra.mxu1 %v6358_v39 }
 0xfad   :  { %2706 = vmatprep.subr.bf16.mxu1 %v6361_v18 }
 0xfb0   :  { %2707 = vmatpush1.bf16.msra.mxu1 %v6364_v60 }
 0xfb1   :  { %2708 = vmatprep.subr.bf16.mxu1 %v6367_v40 }
 0xfb4   :  { %2709 = vmatpush1.bf16.msra.mxu1 %v6087_v48 }
 0xfb5   :  { %2710 = vmatprep.subr.bf16.mxu1 %v6090_v49 }
 0xfb8   :  { %2711 = vmatpush1.bf16.msra.mxu1 %v6093_v52 }
 0xfb9   :  { %2712 = vmatprep.subr.bf16.mxu1 %v6096_v43  ;;  %v2541_v43 = vld [vmem:[#allocation2 + $0x1c8] sm:$0xff] }
 0xfbc   :  { %2713 = vmatpush1.bf16.msra.mxu1 %v6099_v30 }
 0xfbd   :  { %2714 = vmatprep.subr.bf16.mxu1 %v6102_v21 }
 0xfc0   :  { %2715 = vmatpush1.bf16.msra.mxu1 %v6105_v29 }
 0xfc1   :  { %4273 = vmatprep.subr.bf16.mxu1 %v5126_v36 }
0x1056   :  { %v2533_v45 = vpop.f32.mrb[80].mxu1  ;;  %v2578_v41 = vpop.f32.mrb[84].mxu0 }
0x1057   :  { %v2534_v46 = vadd.f32 %v6185_v63, %v2533_v45  ;;  %v4251_v42 = vpop.f32.mrb[81].mxu1  ;;  %v2580_v47 = vpop.f32.mrb[85].mxu0  ;;  %v2626_v4 = vadd.f32 %v2578_v41, %v2540_v51  ;;  %v6397_v45 = vld [vmem:[#allocation5 + $0x4c] ss:$16 sps:$4 sm:$0xff]   ;;  %v6402_v41 = vld [vmem:[#allocation5 + $0x48] ss:$16 sps:$4 sm:$0xff]  }
0x1058   :  { %v2536_v48 = vpop.f32.mrb[82].mxu1  ;;  %v2582_v49 = vpop.f32.mrb[86].mxu0  ;;  %v2627_v30 = vadd.f32 %v2580_v47, %v2541_v43  ;;  %v6413_v42 = vld [vmem:[#allocation5 + $0x8c] ss:$16 sps:$4 sm:$0xff]   ;;  %v6472_v43 = vld [vmem:[#allocation5 + $0xe4] ss:$16 sps:$4 sm:$0xff]  }
0x1059   :  { %2539 = vst [vmem:[#allocation10 + $0x68] sm:$0xff] %v2534_v46  ;;  %v4252_v52 = vpop.f32.mrb[83].mxu1  ;;  %v2583_v3 = vpop.f32.mrb[87].mxu0  ;;  %v3763_v11 = vmul.f32 -1.442695, %v2626_v4 }
0x105a   :  { %v3764_v21 = vmul.f32 -1.442695, %v2627_v30  ;;  %v6410_v46 = vld [vmem:[#allocation5 + $0x68] ss:$16 sps:$4 sm:$0xff]   ;;  %v6421_v47 = vld [vmem:[#allocation5 + $0xac] ss:$16 sps:$4 sm:$0xff]  }
0x105b   :  { %v6429_v48 = vld [vmem:[#allocation5 + $0xcc] ss:$16 sps:$4 sm:$0xff]   ;;  %v6466_v52 = vld [vmem:[#allocation5 + $0xc4] ss:$16 sps:$4 sm:$0xff]   ;;  %v6469_v3 = vld [vmem:[#allocation5 + $0xc0] ss:$16 sps:$4 sm:$0xff]  }
0x105c   :  { %4691 = vpow2.f32 %v3764_v21  ;;  %v6437_v49 = vld [vmem:[#allocation5 + $0xec] ss:$16 sps:$4 sm:$0xff]   ;;  %v6475_v51 = vld [vmem:[#allocation5 + $0xe0] ss:$16 sps:$4 sm:$0xff]  }
0x105d   :  { %4693 = vpow2.f32 %v3763_v11 }
0x1066   :  { %v4692_v29 = vpop.eup %4691 }
0x1067   :  { %v4694_v14 = vpop.eup %4693  ;;  %v2639_v59 = vadd.f32 1.0, %v4692_v29 }
0x1068   :  { %v2633_v16 = vadd.f32 1.0, %v4694_v14 }
0x1069   :  { %4695 = vrcp.f32 %v2639_v59 }
0x106a   :  { %4697 = vrcp.f32 %v2633_v16 }
0x1073   :  { %v4696_v57 = vpop.eup %4695 }
0x1074   :  { %v4698_v6 = vpop.eup %4697  ;;  %v2649_v56 = vmul.f32 %v4696_v57, %v6303_v28  ;;  %v6387_v28 = vld [vmem:[#allocation5 + $0x2c] ss:$16 sps:$4 sm:$0xff]  }
0x1076   :  { %v2619_v44 = vpop.f32.mrb[84].mxu1 }
0x1077   :  { %v2628_v55 = vadd.f32 %v2619_v44, %v2542_v7  ;;  %v2621_v19 = vpop.f32.mrb[85].mxu1  ;;  %v2696_v44 = vld [vmem:[#allocation2 + $0x1e0] sm:$0xff] }
0x1078   :  { %v2629_v20 = vadd.f32 %v2621_v19, %v2543_v61  ;;  %v2623_v50 = vpop.f32.mrb[86].mxu1  ;;  %v2697_v61 = vld [vmem:[#allocation2 + $0x1e8] sm:$0xff] }
0x1079   :  { %4699 = vtanh.f32 %v2628_v55  ;;  %v2624_v33 = vpop.f32.mrb[87].mxu1 }
0x107a   :  { %v3765_v22 = vmul.f32 -1.442695, %v2629_v20 }
0x107c   :  { %4701 = vpow2.f32 %v3765_v22 }
0x1083   :  { %v4700_v1 = vpop.eup %4699 }
0x1084   :  { %v2650_v54 = vmul.f32 %v4700_v1, %v4698_v6  ;;  %v2699_v1 = vld [vmem:[#allocation2 + $0x1f8] sm:$0xff] }
0x1086   :  { %v4702_v12 = vpop.eup %4701  ;;  %v6380_v5 = vadd.f32 %v2650_v54, %v2649_v56 }
0x1087   :  { %v2646_v13 = vadd.f32 1.0, %v4702_v12 }
0x1088   :  { %4703 = vtanh.f32 %v6380_v5 }
0x1089   :  { %4705 = vrcp.f32 %v2646_v13 }
0x1092   :  { %v4704_v27 = vpop.eup %4703 }
0x1093   :  { %v4706_v35 = vpop.eup %4705 }
0x1094   :  { %v2653_v31 = vmul.f32 %v4706_v35, %v4704_v27 }
0x1096   :  { %v2654_v32 = vpack.c.bf16 %v2653_v31, %v2653_v31 }
0x1098   :  { %4270 = vmatmul.mubr.bf16.vlgmr.msra.gmra.mrb[88].mxu0 %v2654_v32  ;;  %2733 = vmatmul.mubr.bf16.vlgmr.msra.gmra.mrb[88].mxu1 %v2654_v32 }
0x1099   :  { %2742 = vmatpush1.bf16.msra.mxu0 %v6383_v37  ;;  %2773 = vmatprep.mubr.bf16.mxu0 %v5125_v0 }
0x109a   :  { %2743 = vmatprep.subr.bf16.mxu0 %v6387_v28  ;;  %4274 = vmatpush3.bf16.msra.mxu1 %v6117_v10  ;;  %v6405_v10 = vld [vmem:[#allocation5 + $0x6c] ss:$16 sps:$4 sm:$0xff]  }
0x109b   :  { %4275 = vmatprep.subr.bf16.mxu1 %v5126_v36  ;;  %4289 = vmatprep.mubr.msk.bf16.mxu1 %vm5127_vm0, %v5126_v36 }
0x109d   :  { %2744 = vmatpush1.bf16.msra.mxu0 %v6394_v17 }
0x109e   :  { %2745 = vmatprep.subr.bf16.mxu0 %v6397_v45  ;;  %4276 = vmatpush3.bf16.msra.mxu1 %v6125_v58  ;;  %v6418_v58 = vld [vmem:[#allocation5 + $0x88] ss:$16 sps:$4 sm:$0xff]  }
0x109f   :  { %4277 = vmatprep.subr.bf16.mxu1 %v5126_v36 }
0x10a1   :  { %2746 = vmatpush1.bf16.msra.mxu0 %v6402_v41 }
0x10a2   :  { %2747 = vmatprep.subr.bf16.mxu0 %v6405_v10  ;;  %4278 = vmatpush3.bf16.msra.mxu1 %v6131_v8  ;;  %v6426_v8 = vld [vmem:[#allocation5 + $0xa8] ss:$16 sps:$4 sm:$0xff]  }
0x10a3   :  { %4279 = vmatprep.subr.bf16.mxu1 %v5126_v36 }
0x10a5   :  { %2748 = vmatpush1.bf16.msra.mxu0 %v6410_v46 }
0x10a6   :  { %2749 = vmatprep.subr.bf16.mxu0 %v6413_v42  ;;  %4280 = vmatpush3.bf16.msra.mxu1 %v6137_v9  ;;  %v6434_v9 = vld [vmem:[#allocation5 + $0xc8] ss:$16 sps:$4 sm:$0xff]  }
0x10a7   :  { %4281 = vmatprep.subr.bf16.mxu1 %v5126_v36 }
0x10a9   :  { %2750 = vmatpush1.bf16.msra.mxu0 %v6418_v58 }
0x10aa   :  { %2751 = vmatprep.subr.bf16.mxu0 %v6421_v47  ;;  %4282 = vmatpush3.bf16.msra.mxu1 %v6143_v24  ;;  %v6442_v24 = vld [vmem:[#allocation5 + $0xe8] ss:$16 sps:$4 sm:$0xff]  }
0x10ab   :  { %4283 = vmatprep.subr.bf16.mxu1 %v5126_v36 }
0x10ad   :  { %2752 = vmatpush1.bf16.msra.mxu0 %v6426_v8 }
0x10ae   :  { %2753 = vmatprep.subr.bf16.mxu0 %v6429_v48  ;;  %4284 = vmatpush3.bf16.msra.mxu1 %v6149_v53  ;;  %v6457_v53 = vld [vmem:[#allocation5 + $0x80] ss:$16 sps:$4 sm:$0xff]  }
0x10af   :  { %4285 = vmatprep.subr.bf16.mxu1 %v5126_v36 }
0x10b1   :  { %2754 = vmatpush1.bf16.msra.mxu0 %v6434_v9 }
0x10b2   :  { %2755 = vmatprep.subr.bf16.mxu0 %v6437_v49  ;;  %4286 = vmatpush3.bf16.msra.mxu1 %v6155_v26  ;;  %v6460_v26 = vld [vmem:[#allocation5 + $0xa4] ss:$16 sps:$4 sm:$0xff]  }
0x10b3   :  { %4287 = vmatprep.subr.bf16.mxu1 %v5126_v36 }
0x10b5   :  { %2756 = vmatpush1.bf16.msra.mxu0 %v6442_v24 }
0x10b6   :  { %2856 = vmatprep.subr.bf16.mxu0 %v6338_v23  ;;  %4288 = vmatpush3.bf16.msra.mxu1 %v6161_v62  ;;  %v6463_v62 = vld [vmem:[#allocation5 + $0xa0] ss:$16 sps:$4 sm:$0xff]  }
0x10b7   :  { %2897 = vmatprep.subr.bf16.mxu1 %v6342_v15 }
0x10b8   :  { %2774 = vmatmul.mubr.bf16.vlgmr.msra.gmra.mrb[92].mxu0 %v2654_v32 }
0x10b9   :  { %2857 = vmatpush1.bf16.msra.mxu0 %v6345_v25  ;;  %2888 = vmatprep.mubr.bf16.mxu0 %v5125_v0 }
0x10ba   :  { %2858 = vmatprep.subr.bf16.mxu0 %v6349_v38 }
0x10bd   :  { %2859 = vmatpush1.bf16.msra.mxu0 %v6352_v34 }
0x10be   :  { %2860 = vmatprep.subr.bf16.mxu0 %v6355_v2 }
0x10c1   :  { %2861 = vmatpush1.bf16.msra.mxu0 %v6358_v39 }
0x10c2   :  { %2862 = vmatprep.subr.bf16.mxu0 %v6361_v18 }
0x10c5   :  { %2863 = vmatpush1.bf16.msra.mxu0 %v6364_v60 }
0x10c6   :  { %2864 = vmatprep.subr.bf16.mxu0 %v6367_v40 }
0x10c9   :  { %2865 = vmatpush1.bf16.msra.mxu0 %v6457_v53 }
0x10ca   :  { %2866 = vmatprep.subr.bf16.mxu0 %v6460_v26 }
0x10cd   :  { %2867 = vmatpush1.bf16.msra.mxu0 %v6463_v62 }
0x10ce   :  { %2868 = vmatprep.subr.bf16.mxu0 %v6466_v52 }
0x10d1   :  { %2869 = vmatpush1.bf16.msra.mxu0 %v6469_v3 }
0x10d2   :  { %2870 = vmatprep.subr.bf16.mxu0 %v6472_v43 }
0x10d5   :  { %2871 = vmatpush1.bf16.msra.mxu0 %v6475_v51 }
0x10d6   :  { %4293 = vmatprep.subr.bf16.mxu0 %v5126_v36 }
0x116b   :  { %v2689_v30 = vpop.f32.mrb[88].mxu0  ;;  %v2734_v4 = vpop.f32.mrb[88].mxu1 }
0x116c   :  { %v2690_v21 = vadd.f32 %v6185_v63, %v2689_v30  ;;  %v4271_v11 = vpop.f32.mrb[89].mxu0  ;;  %v2736_v29 = vpop.f32.mrb[89].mxu1  ;;  %v2782_v19 = vadd.f32 %v2734_v4, %v2696_v44  ;;  %v2698_v63 = vld [vmem:[#allocation2 + $0x1f0] sm:$0xff] }
0x116d   :  { %v2692_v14 = vpop.f32.mrb[90].mxu0  ;;  %v2738_v59 = vpop.f32.mrb[90].mxu1  ;;  %v2783_v55 = vadd.f32 %v2736_v29, %v2697_v61 }
0x116e   :  { %2695 = vst [vmem:[#allocation10 + $0x70] sm:$0xff] %v2690_v21  ;;  %v4272_v16 = vpop.f32.mrb[91].mxu0  ;;  %v2739_v7 = vpop.f32.mrb[91].mxu1  ;;  %v3766_v50 = vmul.f32 -1.442695, %v2782_v19  ;;  %v6501_v19 = vld [vmem:[#allocation8 + $0x10] sm:$0xff]  }
0x116f   :  { %v3767_v20 = vmul.f32 -1.442695, %v2783_v55  ;;  %v6495_v55 = vld [vmem:[#allocation8 + $0x8] sm:$0xff]  }
0x1171   :  { %4707 = vpow2.f32 %v3767_v20  ;;  %v6507_v20 = vld [vmem:[#allocation8 + $0x18] sm:$0xff]  }
0x1172   :  { %4709 = vpow2.f32 %v3766_v50  ;;  %v6513_v50 = vld [vmem:[#allocation8 + $0x20] sm:$0xff]  }
0x117b   :  { %v4708_v33 = vpop.eup %4707 }
0x117c   :  { %v4710_v22 = vpop.eup %4709  ;;  %v2795_v57 = vadd.f32 1.0, %v4708_v33  ;;  %v6519_v33 = vld [vmem:[#allocation8 + $0x28] sm:$0xff]  }
0x117d   :  { %v2789_v6 = vadd.f32 1.0, %v4710_v22  ;;  %v6525_v22 = vld [vmem:[#allocation8 + $0x30] sm:$0xff]  }
0x117e   :  { %4711 = vrcp.f32 %v2795_v57  ;;  %v6531_v57 = vld [vmem:[#allocation8 + $0x38] sm:$0xff]  }
0x117f   :  { %4713 = vrcp.f32 %v2789_v6 }
0x1188   :  { %v4712_v32 = vpop.eup %4711 }
0x1189   :  { %v4714_v30 = vpop.eup %4713  ;;  %v2805_v21 = vmul.f32 %v4712_v32, %v6380_v5  ;;  %v6487_v5 = vld [vmem:[#allocation8] sm:$0xff]  }
0x118a   :  { %v2853_v32 = vld [vmem:[#allocation2 + $0x208] sm:$0xff] }
0x118b   :  { %v2775_v56 = vpop.f32.mrb[92].mxu0 }
0x118c   :  { %v2784_v54 = vadd.f32 %v2775_v56, %v2698_v63  ;;  %v2777_v12 = vpop.f32.mrb[93].mxu0 }
0x118d   :  { %v2785_v13 = vadd.f32 %v2777_v12, %v2699_v1  ;;  %v2779_v27 = vpop.f32.mrb[94].mxu0  ;;  %v6555_v1 = vld [vmem:[%s6785_s5] ss:$0 sm:$0xff]  ;;  %s5128_s5 = smov [#allocation11]  }
0x118e   :  { %4715 = vtanh.f32 %v2784_v54  ;;  %v2780_v35 = vpop.f32.mrb[95].mxu0  ;;  %s3652_s19 = sshll.u32 %s5128_s5, 4  ;;  %s3653_s19 = int_to_ptr.vmem [resolvable:$true] %s3652_s19 }
0x118f   :  { %v3768_v31 = vmul.f32 -1.442695, %v2785_v13  ;;  %s5039_s21 = scalar_lea.vmem %s3653_s19, 128  ;;  %p5044_p5 = scmp.lt.s32.totalorder %s3653_s19, %s3653_s19 }
0x1190   :  { %p5040_p4 = scmp.ne.s32.totalorder %s3653_s19, %s5039_s21  ;;  %p5045_p6 = scmp.lt.s32.totalorder %s5039_s21, %s5039_s21 }
0x1191   :  { %4717 = vpow2.f32 %v3768_v31 }
0x1192   :  { %p5046_p7 = por %p5045_p6, %p5044_p5 }
0x1194   :  { %p5047_p8 = pnand %p5046_p7, %p5040_p4 }
0x1198   :  { %v4716_v4 = vpop.eup %4715 }
0x1199   :  { %v2806_v11 = vmul.f32 %v4716_v4, %v4714_v30  ;;  %v2852_v30 = vld [vmem:[#allocation2 + $0x200] sm:$0xff] }
0x119b   :  { %v4718_v29 = vpop.eup %4717  ;;  %v6481_v14 = vadd.f32 %v2806_v11, %v2805_v21 }
0x119c   :  { %v2802_v59 = vadd.f32 1.0, %v4718_v29 }
0x119d   :  { %4719 = vtanh.f32 %v6481_v14 }
0x119e   :  { %4721 = vrcp.f32 %v2802_v59 }
0x11a7   :  { %v4720_v16 = vpop.eup %4719 }
0x11a8   :  { %v4722_v7 = vpop.eup %4721 }
0x11a9   :  { %v2809_v61 = vmul.f32 %v4722_v7, %v4720_v16 }
0x11ab   :  { %v2810_v44 = vpack.c.bf16 %v2809_v61, %v2809_v61 }
0x11ad   :  { %4290 = vmatmul.mubr.bf16.vlgmr.msra.gmra.mrb[92].mxu1 %v2810_v44  ;;  %2889 = vmatmul.mubr.bf16.vlgmr.msra.gmra.mrb[96].mxu0 %v2810_v44 }
0x11ae   :  { %2898 = vmatpush1.bf16.msra.mxu1 %v6383_v37  ;;  %2929 = vmatprep.mubr.bf16.mxu1 %v5125_v0 }
0x11af   :  { %2899 = vmatprep.subr.bf16.mxu1 %v6387_v28  ;;  %4294 = vmatpush3.bf16.msra.mxu0 %v6487_v5 }
0x11b0   :  { %4295 = vmatprep.subr.bf16.mxu0 %v5126_v36  ;;  %4309 = vmatprep.mubr.msk.bf16.mxu0 %vm5127_vm0, %v5126_v36 }
0x11b2   :  { %2900 = vmatpush1.bf16.msra.mxu1 %v6394_v17 }
0x11b3   :  { %2901 = vmatprep.subr.bf16.mxu1 %v6397_v45  ;;  %4296 = vmatpush3.bf16.msra.mxu0 %v6495_v55 }
0x11b4   :  { %4297 = vmatprep.subr.bf16.mxu0 %v5126_v36 }
0x11b6   :  { %2902 = vmatpush1.bf16.msra.mxu1 %v6402_v41 }
0x11b7   :  { %2903 = vmatprep.subr.bf16.mxu1 %v6405_v10  ;;  %4298 = vmatpush3.bf16.msra.mxu0 %v6501_v19 }
0x11b8   :  { %4299 = vmatprep.subr.bf16.mxu0 %v5126_v36 }
0x11ba   :  { %2904 = vmatpush1.bf16.msra.mxu1 %v6410_v46 }
0x11bb   :  { %2905 = vmatprep.subr.bf16.mxu1 %v6413_v42  ;;  %4300 = vmatpush3.bf16.msra.mxu0 %v6507_v20 }
0x11bc   :  { %4301 = vmatprep.subr.bf16.mxu0 %v5126_v36 }
0x11be   :  { %2906 = vmatpush1.bf16.msra.mxu1 %v6418_v58 }
0x11bf   :  { %2907 = vmatprep.subr.bf16.mxu1 %v6421_v47  ;;  %4302 = vmatpush3.bf16.msra.mxu0 %v6513_v50 }
0x11c0   :  { %4303 = vmatprep.subr.bf16.mxu0 %v5126_v36 }
0x11c2   :  { %2908 = vmatpush1.bf16.msra.mxu1 %v6426_v8 }
0x11c3   :  { %2909 = vmatprep.subr.bf16.mxu1 %v6429_v48  ;;  %4304 = vmatpush3.bf16.msra.mxu0 %v6519_v33 }
0x11c4   :  { %4305 = vmatprep.subr.bf16.mxu0 %v5126_v36 }
0x11c6   :  { %2910 = vmatpush1.bf16.msra.mxu1 %v6434_v9 }
0x11c7   :  { %2911 = vmatprep.subr.bf16.mxu1 %v6437_v49  ;;  %4306 = vmatpush3.bf16.msra.mxu0 %v6525_v22 }
0x11c8   :  { %4307 = vmatprep.subr.bf16.mxu0 %v5126_v36 }
0x11ca   :  { %2912 = vmatpush1.bf16.msra.mxu1 %v6442_v24 }
0x11cb   :  { %3012 = vmatprep.subr.bf16.mxu1 %v6338_v23  ;;  %4308 = vmatpush3.bf16.msra.mxu0 %v6531_v57 }
0x11cc   :  { %3053 = vmatprep.subr.bf16.mxu0 %v6342_v15 }
0x11cd   :  { %2930 = vmatmul.mubr.bf16.vlgmr.msra.gmra.mrb[96].mxu1 %v2810_v44  ;;  %v2854_v44 = vld [vmem:[#allocation2 + $0x210] sm:$0xff] }
0x11ce   :  { %3013 = vmatpush1.bf16.msra.mxu1 %v6345_v25  ;;  %3044 = vmatprep.mubr.bf16.mxu1 %v5125_v0 }
0x11cf   :  { %3014 = vmatprep.subr.bf16.mxu1 %v6349_v38 }
0x11d2   :  { %3015 = vmatpush1.bf16.msra.mxu1 %v6352_v34 }
0x11d3   :  { %3016 = vmatprep.subr.bf16.mxu1 %v6355_v2 }
0x11d6   :  { %3017 = vmatpush1.bf16.msra.mxu1 %v6358_v39 }
0x11d7   :  { %3018 = vmatprep.subr.bf16.mxu1 %v6361_v18 }
0x11da   :  { %3019 = vmatpush1.bf16.msra.mxu1 %v6364_v60 }
0x11db   :  { %3020 = vmatprep.subr.bf16.mxu1 %v6367_v40 }
0x11de   :  { %3021 = vmatpush1.bf16.msra.mxu1 %v6457_v53 }
0x11df   :  { %3022 = vmatprep.subr.bf16.mxu1 %v6460_v26 }
0x11e2   :  { %3023 = vmatpush1.bf16.msra.mxu1 %v6463_v62 }
0x11e3   :  { %3024 = vmatprep.subr.bf16.mxu1 %v6466_v52 }
0x11e6   :  { %3025 = vmatpush1.bf16.msra.mxu1 %v6469_v3 }
0x11e7   :  { %3026 = vmatprep.subr.bf16.mxu1 %v6472_v43 }
0x11ea   :  { %3027 = vmatpush1.bf16.msra.mxu1 %v6475_v51 }
0x11eb   :  { %4313 = vmatprep.subr.bf16.mxu1 %v5126_v36 }
0x1280   :  { %v2845_v6 = vpop.f32.mrb[92].mxu1  ;;  %v2890_v63 = vpop.f32.mrb[96].mxu0 }
0x1281   :  { %v2846_v56 = vadd.f32 %v6555_v1, %v2845_v6  ;;  %v4291_v54 = vpop.f32.mrb[93].mxu1  ;;  %v2892_v12 = vpop.f32.mrb[97].mxu0  ;;  %v2938_v21 = vadd.f32 %v2890_v63, %v2852_v30  ;;  %v2855_v6 = vld [vmem:[#allocation2 + $0x218] sm:$0xff] }
0x1282   :  { %v2848_v13 = vpop.f32.mrb[94].mxu1  ;;  %v2894_v27 = vpop.f32.mrb[98].mxu0  ;;  %v2939_v4 = vadd.f32 %v2892_v12, %v2853_v32 }
0x1283   :  { %2851 = vst [vmem:[#allocation10 + $0x78] sm:$0xff] %v2846_v56  ;;  %v4292_v35 = vpop.f32.mrb[95].mxu1  ;;  %v2895_v31 = vpop.f32.mrb[99].mxu0  ;;  %v3769_v29 = vmul.f32 -1.442695, %v2938_v21 }
0x1284   :  { %v3770_v11 = vmul.f32 -1.442695, %v2939_v4 }
0x1286   :  { %4723 = vpow2.f32 %v3770_v11 }
0x1287   :  { %4725 = vpow2.f32 %v3769_v29 }
0x1290   :  { %v4724_v59 = vpop.eup %4723 }
0x1291   :  { %v4726_v16 = vpop.eup %4725  ;;  %v2951_v7 = vadd.f32 1.0, %v4724_v59 }
0x1292   :  { %v2945_v61 = vadd.f32 1.0, %v4726_v16 }
0x1293   :  { %4727 = vrcp.f32 %v2951_v7 }
0x1294   :  { %4729 = vrcp.f32 %v2945_v61 }
0x129d   :  { %v4728_v31 = vpop.eup %4727 }
0x129e   :  { %v4730_v32 = vpop.eup %4729  ;;  %v2961_v4 = vmul.f32 %v4728_v31, %v6481_v14  ;;  %v3009_v31 = vld [vmem:[#allocation2 + $0x228] sm:$0xff] }
0x12a0   :  { %v2931_v54 = vpop.f32.mrb[96].mxu1 }
0x12a1   :  { %v2940_v13 = vadd.f32 %v2931_v54, %v2854_v44  ;;  %v2933_v56 = vpop.f32.mrb[97].mxu1 }
0x12a2   :  { %v2941_v27 = vadd.f32 %v2933_v56, %v2855_v6  ;;  %v2935_v35 = vpop.f32.mrb[98].mxu1 }
0x12a3   :  { %4731 = vtanh.f32 %v2940_v13  ;;  %v2936_v12 = vpop.f32.mrb[99].mxu1 }
0x12a4   :  { %v3771_v63 = vmul.f32 -1.442695, %v2941_v27 }
0x12a6   :  { %4733 = vpow2.f32 %v3771_v63 }
0x12ad   :  { %v4732_v30 = vpop.eup %4731 }
0x12ae   :  { %v2962_v21 = vmul.f32 %v4732_v30, %v4730_v32  ;;  %v3008_v32 = vld [vmem:[#allocation2 + $0x220] sm:$0xff] }
0x12b0   :  { %v4734_v11 = vpop.eup %4733  ;;  %v6559_v29 = vadd.f32 %v2962_v21, %v2961_v4 }
0x12b1   :  { %v2958_v59 = vadd.f32 1.0, %v4734_v11 }
0x12b2   :  { %4735 = vtanh.f32 %v6559_v29 }
0x12b3   :  { %4737 = vrcp.f32 %v2958_v59 }
0x12bc   :  { %v4736_v16 = vpop.eup %4735 }
0x12bd   :  { %v4738_v7 = vpop.eup %4737 }
0x12be   :  { %v2965_v61 = vmul.f32 %v4738_v7, %v4736_v16 }
0x12c0   :  { %v2966_v44 = vpack.c.bf16 %v2965_v61, %v2965_v61 }
0x12c2   :  { %4310 = vmatmul.mubr.bf16.vlgmr.msra.gmra.mrb[100].mxu0 %v2966_v44  ;;  %3045 = vmatmul.mubr.bf16.vlgmr.msra.gmra.mrb[100].mxu1 %v2966_v44 }
0x12c3   :  { %3054 = vmatpush1.bf16.msra.mxu0 %v6383_v37  ;;  %3085 = vmatprep.mubr.bf16.mxu0 %v5125_v0 }
0x12c4   :  { %3055 = vmatprep.subr.bf16.mxu0 %v6387_v28  ;;  %4314 = vmatpush3.bf16.msra.mxu1 %v6487_v5 }
0x12c5   :  { %4315 = vmatprep.subr.bf16.mxu1 %v5126_v36  ;;  %4329 = vmatprep.mubr.msk.bf16.mxu1 %vm5127_vm0, %v5126_v36 }
0x12c7   :  { %3056 = vmatpush1.bf16.msra.mxu0 %v6394_v17 }
0x12c8   :  { %3057 = vmatprep.subr.bf16.mxu0 %v6397_v45  ;;  %4316 = vmatpush3.bf16.msra.mxu1 %v6495_v55 }
0x12c9   :  { %4317 = vmatprep.subr.bf16.mxu1 %v5126_v36 }
0x12cb   :  { %3058 = vmatpush1.bf16.msra.mxu0 %v6402_v41 }
0x12cc   :  { %3059 = vmatprep.subr.bf16.mxu0 %v6405_v10  ;;  %4318 = vmatpush3.bf16.msra.mxu1 %v6501_v19 }
0x12cd   :  { %4319 = vmatprep.subr.bf16.mxu1 %v5126_v36 }
0x12cf   :  { %3060 = vmatpush1.bf16.msra.mxu0 %v6410_v46 }
0x12d0   :  { %3061 = vmatprep.subr.bf16.mxu0 %v6413_v42  ;;  %4320 = vmatpush3.bf16.msra.mxu1 %v6507_v20 }
0x12d1   :  { %4321 = vmatprep.subr.bf16.mxu1 %v5126_v36 }
0x12d3   :  { %3062 = vmatpush1.bf16.msra.mxu0 %v6418_v58 }
0x12d4   :  { %3063 = vmatprep.subr.bf16.mxu0 %v6421_v47  ;;  %4322 = vmatpush3.bf16.msra.mxu1 %v6513_v50 }
0x12d5   :  { %4323 = vmatprep.subr.bf16.mxu1 %v5126_v36 }
0x12d7   :  { %3064 = vmatpush1.bf16.msra.mxu0 %v6426_v8 }
0x12d8   :  { %3065 = vmatprep.subr.bf16.mxu0 %v6429_v48  ;;  %4324 = vmatpush3.bf16.msra.mxu1 %v6519_v33 }
0x12d9   :  { %4325 = vmatprep.subr.bf16.mxu1 %v5126_v36 }
0x12db   :  { %3066 = vmatpush1.bf16.msra.mxu0 %v6434_v9 }
0x12dc   :  { %3067 = vmatprep.subr.bf16.mxu0 %v6437_v49  ;;  %4326 = vmatpush3.bf16.msra.mxu1 %v6525_v22 }
0x12dd   :  { %4327 = vmatprep.subr.bf16.mxu1 %v5126_v36 }
0x12df   :  { %3068 = vmatpush1.bf16.msra.mxu0 %v6442_v24 }
0x12e0   :  { %3168 = vmatprep.subr.bf16.mxu0 %v6338_v23  ;;  %4328 = vmatpush3.bf16.msra.mxu1 %v6531_v57 }
0x12e1   :  { %3209 = vmatprep.subr.bf16.mxu1 %v6342_v15 }
0x12e2   :  { %3086 = vmatmul.mubr.bf16.vlgmr.msra.gmra.mrb[104].mxu0 %v2966_v44  ;;  %v3010_v44 = vld [vmem:[#allocation2 + $0x230] sm:$0xff] }
0x12e3   :  { %3169 = vmatpush1.bf16.msra.mxu0 %v6345_v25  ;;  %3200 = vmatprep.mubr.bf16.mxu0 %v5125_v0 }
0x12e4   :  { %3170 = vmatprep.subr.bf16.mxu0 %v6349_v38 }
0x12e7   :  { %3171 = vmatpush1.bf16.msra.mxu0 %v6352_v34 }
0x12e8   :  { %3172 = vmatprep.subr.bf16.mxu0 %v6355_v2 }
0x12eb   :  { %3173 = vmatpush1.bf16.msra.mxu0 %v6358_v39 }
0x12ec   :  { %3174 = vmatprep.subr.bf16.mxu0 %v6361_v18 }
0x12ef   :  { %3175 = vmatpush1.bf16.msra.mxu0 %v6364_v60 }
0x12f0   :  { %3176 = vmatprep.subr.bf16.mxu0 %v6367_v40 }
0x12f3   :  { %3177 = vmatpush1.bf16.msra.mxu0 %v6457_v53 }
0x12f4   :  { %3178 = vmatprep.subr.bf16.mxu0 %v6460_v26 }
0x12f7   :  { %3179 = vmatpush1.bf16.msra.mxu0 %v6463_v62 }
0x12f8   :  { %3180 = vmatprep.subr.bf16.mxu0 %v6466_v52 }
0x12fb   :  { %3181 = vmatpush1.bf16.msra.mxu0 %v6469_v3 }
0x12fc   :  { %3182 = vmatprep.subr.bf16.mxu0 %v6472_v43 }
0x12ff   :  { %3183 = vmatpush1.bf16.msra.mxu0 %v6475_v51 }
0x1300   :  { %4333 = vmatprep.subr.bf16.mxu0 %v5126_v36 }
0x1395   :  { %v3001_v14 = vpop.f32.mrb[100].mxu0  ;;  %v3046_v6 = vpop.f32.mrb[100].mxu1 }
0x1396   :  { %v3002_v54 = vadd.f32 %v6555_v1, %v3001_v14  ;;  %v4311_v13 = vpop.f32.mrb[101].mxu0  ;;  %v3048_v56 = vpop.f32.mrb[101].mxu1  ;;  %v3094_v4 = vadd.f32 %v3046_v6, %v3008_v32  ;;  %v3011_v14 = vld [vmem:[#allocation2 + $0x238] sm:$0xff] }
0x1397   :  { %v3004_v27 = vpop.f32.mrb[102].mxu0  ;;  %v3050_v35 = vpop.f32.mrb[102].mxu1  ;;  %v3095_v30 = vadd.f32 %v3048_v56, %v3009_v31 }
0x1398   :  { %3007 = vst [vmem:[#allocation10 + $0x80] sm:$0xff] %v3002_v54  ;;  %v4312_v12 = vpop.f32.mrb[103].mxu0  ;;  %v3051_v63 = vpop.f32.mrb[103].mxu1  ;;  %v3772_v11 = vmul.f32 -1.442695, %v3094_v4 }
0x1399   :  { %v3773_v21 = vmul.f32 -1.442695, %v3095_v30 }
0x139b   :  { %4739 = vpow2.f32 %v3773_v21 }
0x139c   :  { %4741 = vpow2.f32 %v3772_v11 }
0x13a5   :  { %v4740_v59 = vpop.eup %4739 }
0x13a6   :  { %v4742_v16 = vpop.eup %4741  ;;  %v3107_v7 = vadd.f32 1.0, %v4740_v59 }
0x13a7   :  { %v3101_v61 = vadd.f32 1.0, %v4742_v16 }
0x13a8   :  { %4743 = vrcp.f32 %v3107_v7 }
0x13a9   :  { %4745 = vrcp.f32 %v3101_v61 }
0x13b2   :  { %v4744_v63 = vpop.eup %4743 }
0x13b3   :  { %v4746_v31 = vpop.eup %4745  ;;  %v3117_v30 = vmul.f32 %v4744_v63, %v6559_v29  ;;  %v3164_v29 = vld [vmem:[#allocation2 + $0x240] sm:$0xff]  ;;  %v3166_v63 = vld [vmem:[#allocation2 + $0x250] sm:$0xff] }
0x13b5   :  { %v3087_v13 = vpop.f32.mrb[104].mxu0 }
0x13b6   :  { %v3096_v27 = vadd.f32 %v3087_v13, %v3010_v44  ;;  %v3089_v54 = vpop.f32.mrb[105].mxu0 }
0x13b7   :  { %v3097_v35 = vadd.f32 %v3089_v54, %v3011_v14  ;;  %v3091_v12 = vpop.f32.mrb[106].mxu0 }
0x13b8   :  { %4747 = vtanh.f32 %v3096_v27  ;;  %v3092_v56 = vpop.f32.mrb[107].mxu0 }
0x13b9   :  { %v3774_v6 = vmul.f32 -1.442695, %v3097_v35 }
0x13bb   :  { %4749 = vpow2.f32 %v3774_v6 }
0x13c2   :  { %v4748_v32 = vpop.eup %4747 }
0x13c3   :  { %v3118_v4 = vmul.f32 %v4748_v32, %v4746_v31  ;;  %v3167_v31 = vld [vmem:[#allocation2 + $0x258] sm:$0xff] }
0x13c5   :  { %v4750_v21 = vpop.eup %4749  ;;  %v6616_v11 = vadd.f32 %v3118_v4, %v3117_v30 }
0x13c6   :  { %v3114_v59 = vadd.f32 1.0, %v4750_v21 }
0x13c7   :  { %4751 = vtanh.f32 %v6616_v11 }
0x13c8   :  { %4753 = vrcp.f32 %v3114_v59 }
0x13d1   :  { %v4752_v16 = vpop.eup %4751 }
0x13d2   :  { %v4754_v7 = vpop.eup %4753 }
0x13d3   :  { %v3121_v61 = vmul.f32 %v4754_v7, %v4752_v16 }
0x13d5   :  { %v3122_v44 = vpack.c.bf16 %v3121_v61, %v3121_v61 }
0x13d7   :  { %4330 = vmatmul.mubr.bf16.vlgmr.msra.gmra.mrb[104].mxu1 %v3122_v44  ;;  %3201 = vmatmul.mubr.bf16.vlgmr.msra.gmra.mrb[108].mxu0 %v3122_v44 }
0x13d8   :  { %3210 = vmatpush1.bf16.msra.mxu1 %v6383_v37  ;;  %3241 = vmatprep.mubr.bf16.mxu1 %v5125_v0 }
0x13d9   :  { %3211 = vmatprep.subr.bf16.mxu1 %v6387_v28  ;;  %4334 = vmatpush3.bf16.msra.mxu0 %v6487_v5 }
0x13da   :  { %4335 = vmatprep.subr.bf16.mxu0 %v5126_v36  ;;  %4349 = vmatprep.mubr.msk.bf16.mxu0 %vm5127_vm0, %v5126_v36 }
0x13dc   :  { %3212 = vmatpush1.bf16.msra.mxu1 %v6394_v17 }
0x13dd   :  { %3213 = vmatprep.subr.bf16.mxu1 %v6397_v45  ;;  %4336 = vmatpush3.bf16.msra.mxu0 %v6495_v55 }
0x13de   :  { %4337 = vmatprep.subr.bf16.mxu0 %v5126_v36 }
0x13e0   :  { %3214 = vmatpush1.bf16.msra.mxu1 %v6402_v41 }
0x13e1   :  { %3215 = vmatprep.subr.bf16.mxu1 %v6405_v10  ;;  %4338 = vmatpush3.bf16.msra.mxu0 %v6501_v19 }
0x13e2   :  { %4339 = vmatprep.subr.bf16.mxu0 %v5126_v36 }
0x13e4   :  { %3216 = vmatpush1.bf16.msra.mxu1 %v6410_v46 }
0x13e5   :  { %3217 = vmatprep.subr.bf16.mxu1 %v6413_v42  ;;  %4340 = vmatpush3.bf16.msra.mxu0 %v6507_v20 }
0x13e6   :  { %4341 = vmatprep.subr.bf16.mxu0 %v5126_v36 }
0x13e8   :  { %3218 = vmatpush1.bf16.msra.mxu1 %v6418_v58 }
0x13e9   :  { %3219 = vmatprep.subr.bf16.mxu1 %v6421_v47  ;;  %4342 = vmatpush3.bf16.msra.mxu0 %v6513_v50 }
0x13ea   :  { %4343 = vmatprep.subr.bf16.mxu0 %v5126_v36 }
0x13ec   :  { %3220 = vmatpush1.bf16.msra.mxu1 %v6426_v8 }
0x13ed   :  { %3221 = vmatprep.subr.bf16.mxu1 %v6429_v48  ;;  %4344 = vmatpush3.bf16.msra.mxu0 %v6519_v33 }
0x13ee   :  { %4345 = vmatprep.subr.bf16.mxu0 %v5126_v36 }
0x13f0   :  { %3222 = vmatpush1.bf16.msra.mxu1 %v6434_v9 }
0x13f1   :  { %3223 = vmatprep.subr.bf16.mxu1 %v6437_v49  ;;  %4346 = vmatpush3.bf16.msra.mxu0 %v6525_v22 }
0x13f2   :  { %4347 = vmatprep.subr.bf16.mxu0 %v5126_v36 }
0x13f4   :  { %3224 = vmatpush1.bf16.msra.mxu1 %v6442_v24 }
0x13f5   :  { %3324 = vmatprep.subr.bf16.mxu1 %v6338_v23  ;;  %4348 = vmatpush3.bf16.msra.mxu0 %v6531_v57 }
0x13f6   :  { %3365 = vmatprep.subr.bf16.mxu0 %v6342_v15 }
0x13f7   :  { %3242 = vmatmul.mubr.bf16.vlgmr.msra.gmra.mrb[108].mxu1 %v3122_v44 }
0x13f8   :  { %3325 = vmatpush1.bf16.msra.mxu1 %v6345_v25  ;;  %3356 = vmatprep.mubr.bf16.mxu1 %v5125_v0 }
0x13f9   :  { %3326 = vmatprep.subr.bf16.mxu1 %v6349_v38 }
0x13fc   :  { %3327 = vmatpush1.bf16.msra.mxu1 %v6352_v34 }
0x13fd   :  { %3328 = vmatprep.subr.bf16.mxu1 %v6355_v2 }
0x1400   :  { %3329 = vmatpush1.bf16.msra.mxu1 %v6358_v39 }
0x1401   :  { %3330 = vmatprep.subr.bf16.mxu1 %v6361_v18 }
0x1404   :  { %3331 = vmatpush1.bf16.msra.mxu1 %v6364_v60 }
0x1405   :  { %3332 = vmatprep.subr.bf16.mxu1 %v6367_v40  ;;  %v3165_v40 = vld [vmem:[#allocation2 + $0x248] sm:$0xff] }
0x1408   :  { %3333 = vmatpush1.bf16.msra.mxu1 %v6457_v53 }
0x1409   :  { %3334 = vmatprep.subr.bf16.mxu1 %v6460_v26 }
0x140c   :  { %3335 = vmatpush1.bf16.msra.mxu1 %v6463_v62 }
0x140d   :  { %3336 = vmatprep.subr.bf16.mxu1 %v6466_v52 }
0x1410   :  { %3337 = vmatpush1.bf16.msra.mxu1 %v6469_v3 }
0x1411   :  { %3338 = vmatprep.subr.bf16.mxu1 %v6472_v43 }
0x1414   :  { %3339 = vmatpush1.bf16.msra.mxu1 %v6475_v51 }
0x1415   :  { %4353 = vmatprep.subr.bf16.mxu1 %v5126_v36 }
0x14aa   :  { %v3157_v23 = vpop.f32.mrb[104].mxu1  ;;  %v3202_v15 = vpop.f32.mrb[108].mxu0 }
0x14ab   :  { %v3158_v25 = vadd.f32 %v6555_v1, %v3157_v23  ;;  %v4331_v38 = vpop.f32.mrb[105].mxu1  ;;  %v3204_v34 = vpop.f32.mrb[109].mxu0  ;;  %v3250_v13 = vadd.f32 %v3202_v15, %v3164_v29  ;;  %v3320_v29 = vld [vmem:[#allocation2 + $0x260] sm:$0xff] }
0x14ac   :  { %v3160_v2 = vpop.f32.mrb[106].mxu1  ;;  %v3206_v39 = vpop.f32.mrb[110].mxu0  ;;  %v3251_v14 = vadd.f32 %v3204_v34, %v3165_v40 }
0x14ad   :  { %3163 = vst [vmem:[#allocation10 + $0x88] sm:$0xff] %v3158_v25  ;;  %v4332_v18 = vpop.f32.mrb[107].mxu1  ;;  %v3207_v60 = vpop.f32.mrb[111].mxu0  ;;  %v3775_v54 = vmul.f32 -1.442695, %v3250_v13 }
0x14ae   :  { %v3776_v27 = vmul.f32 -1.442695, %v3251_v14 }
0x14b0   :  { %4755 = vpow2.f32 %v3776_v27 }
0x14b1   :  { %4757 = vpow2.f32 %v3775_v54 }
0x14ba   :  { %v4756_v35 = vpop.eup %4755 }
0x14bb   :  { %v4758_v12 = vpop.eup %4757  ;;  %v3263_v56 = vadd.f32 1.0, %v4756_v35 }
0x14bc   :  { %v3257_v6 = vadd.f32 1.0, %v4758_v12  ;;  %v3322_v12 = vld [vmem:[#allocation2 + $0x270] sm:$0xff] }
0x14bd   :  { %4759 = vrcp.f32 %v3263_v56  ;;  %v3323_v56 = vld [vmem:[#allocation2 + $0x278] sm:$0xff] }
0x14be   :  { %4761 = vrcp.f32 %v3257_v6 }
0x14c7   :  { %v4760_v61 = vpop.eup %4759 }
0x14c8   :  { %v4762_v44 = vpop.eup %4761  ;;  %v3273_v15 = vmul.f32 %v4760_v61, %v6616_v11 }
0x14ca   :  { %v3243_v32 = vpop.f32.mrb[108].mxu1 }
0x14cb   :  { %v3252_v30 = vadd.f32 %v3243_v32, %v3166_v63  ;;  %v3245_v4 = vpop.f32.mrb[109].mxu1 }
0x14cc   :  { %v3253_v21 = vadd.f32 %v3245_v4, %v3167_v31  ;;  %v3247_v59 = vpop.f32.mrb[110].mxu1 }
0x14cd   :  { %4763 = vtanh.f32 %v3252_v30  ;;  %v3248_v16 = vpop.f32.mrb[111].mxu1 }
0x14ce   :  { %v3777_v7 = vmul.f32 -1.442695, %v3253_v21 }
0x14d0   :  { %4765 = vpow2.f32 %v3777_v7 }
0x14d7   :  { %v4764_v23 = vpop.eup %4763 }
0x14d8   :  { %v3274_v25 = vmul.f32 %v4764_v23, %v4762_v44 }
0x14da   :  { %v4766_v38 = vpop.eup %4765  ;;  %v6673_v34 = vadd.f32 %v3274_v25, %v3273_v15 }
0x14db   :  { %v3270_v2 = vadd.f32 1.0, %v4766_v38 }
0x14dc   :  { %4767 = vtanh.f32 %v6673_v34 }
0x14dd   :  { %4769 = vrcp.f32 %v3270_v2 }
0x14e6   :  { %v4768_v39 = vpop.eup %4767 }
0x14e7   :  { %v4770_v18 = vpop.eup %4769 }
0x14e8   :  { %v3277_v60 = vmul.f32 %v4770_v18, %v4768_v39 }
0x14ea   :  { %v3278_v40 = vpack.c.bf16 %v3277_v60, %v3277_v60  ;;  %v4936_v60 = vld [vmem:[#allocation5 + $0x8] ss:$16 sps:$4 sm:$0xff]  }
0x14ec   :  { %4350 = vmatmul.mubr.bf16.vlgmr.msra.gmra.mrb[112].mxu0 %v3278_v40  ;;  %3357 = vmatmul.mubr.bf16.vlgmr.msra.gmra.mrb[112].mxu1 %v3278_v40 }
0x14ed   :  { %3366 = vmatpush1.bf16.msra.mxu0 %v6383_v37  ;;  %3397 = vmatprep.mubr.bf16.mxu0 %v5125_v0  ;;  %v4926_v37 = vld [vmem:[#allocation5 + $0x4] ss:$16 sps:$4 sm:$0xff]  }
0x14ee   :  { %3367 = vmatprep.subr.bf16.mxu0 %v6387_v28  ;;  %4354 = vmatpush3.bf16.msra.mxu1 %v6487_v5  ;;  %v4927_v28 = vld [vmem:[#allocation5 + $0xc] ss:$16 sps:$4 sm:$0xff]  }
0x14ef   :  { %4355 = vmatprep.subr.bf16.mxu1 %v5126_v36  ;;  %4369 = vmatprep.mubr.msk.bf16.mxu1 %vm5127_vm0, %v5126_v36 }
0x14f1   :  { %3368 = vmatpush1.bf16.msra.mxu0 %v6394_v17  ;;  %v4928_v17 = vld [vmem:[#allocation5] ss:$16 sps:$4 sm:$0xff]  }
0x14f2   :  { %3369 = vmatprep.subr.bf16.mxu0 %v6397_v45  ;;  %4356 = vmatpush3.bf16.msra.mxu1 %v6495_v55  ;;  %v4929_v45 = vld [vmem:[#allocation5 + $0x24] ss:$16 sps:$4 sm:$0xff]  }
0x14f3   :  { %4357 = vmatprep.subr.bf16.mxu1 %v5126_v36 }
0x14f5   :  { %3370 = vmatpush1.bf16.msra.mxu0 %v6402_v41  ;;  %v4930_v41 = vld [vmem:[#allocation5 + $0x20] ss:$16 sps:$4 sm:$0xff]  }
0x14f6   :  { %3371 = vmatprep.subr.bf16.mxu0 %v6405_v10  ;;  %4358 = vmatpush3.bf16.msra.mxu1 %v6501_v19  ;;  %v4931_v10 = vld [vmem:[#allocation5 + $0x44] ss:$16 sps:$4 sm:$0xff]  }
0x14f7   :  { %4359 = vmatprep.subr.bf16.mxu1 %v5126_v36 }
0x14f9   :  { %3372 = vmatpush1.bf16.msra.mxu0 %v6410_v46  ;;  %v4932_v46 = vld [vmem:[#allocation5 + $0x40] ss:$16 sps:$4 sm:$0xff]  }
0x14fa   :  { %3373 = vmatprep.subr.bf16.mxu0 %v6413_v42  ;;  %4360 = vmatpush3.bf16.msra.mxu1 %v6507_v20  ;;  %v4933_v42 = vld [vmem:[#allocation5 + $0x64] ss:$16 sps:$4 sm:$0xff]  }
0x14fb   :  { %4361 = vmatprep.subr.bf16.mxu1 %v5126_v36 }
0x14fd   :  { %3374 = vmatpush1.bf16.msra.mxu0 %v6418_v58  ;;  %v4934_v58 = vld [vmem:[#allocation5 + $0x60] ss:$16 sps:$4 sm:$0xff]  }
0x14fe   :  { %3375 = vmatprep.subr.bf16.mxu0 %v6421_v47  ;;  %4362 = vmatpush3.bf16.msra.mxu1 %v6513_v50  ;;  %v4935_v47 = vld [vmem:[#allocation5 + $0x84] ss:$16 sps:$4 sm:$0xff]  }
0x14ff   :  { %4363 = vmatprep.subr.bf16.mxu1 %v5126_v36 }
0x1501   :  { %3376 = vmatpush1.bf16.msra.mxu0 %v6426_v8 }
0x1502   :  { %3377 = vmatprep.subr.bf16.mxu0 %v6429_v48  ;;  %4364 = vmatpush3.bf16.msra.mxu1 %v6519_v33 }
0x1503   :  { %4365 = vmatprep.subr.bf16.mxu1 %v5126_v36 }
0x1505   :  { %3378 = vmatpush1.bf16.msra.mxu0 %v6434_v9 }
0x1506   :  { %3379 = vmatprep.subr.bf16.mxu0 %v6437_v49  ;;  %4366 = vmatpush3.bf16.msra.mxu1 %v6525_v22 }
0x1507   :  { %4367 = vmatprep.subr.bf16.mxu1 %v5126_v36 }
0x1509   :  { %3380 = vmatpush1.bf16.msra.mxu0 %v6442_v24 }
0x150a   :  { %3480 = vmatprep.subr.bf16.mxu0 %v4926_v37  ;;  %4368 = vmatpush3.bf16.msra.mxu1 %v6531_v57  ;;  %v4939_v37 = vld [vmem:[#allocation5 + $0x4c] ss:$16 sps:$4 sm:$0xff]  }
0x150b   :  { %3521 = vmatprep.subr.bf16.mxu1 %v4927_v28  ;;  %v4940_v28 = vld [vmem:[#allocation5 + $0x48] ss:$16 sps:$4 sm:$0xff]  }
0x150c   :  { %3398 = vmatmul.mubr.bf16.vlgmr.msra.gmra.mrb[116].mxu0 %v3278_v40  ;;  %v4937_v40 = vld [vmem:[#allocation5 + $0x2c] ss:$16 sps:$4 sm:$0xff]  }
0x150d   :  { %3481 = vmatpush1.bf16.msra.mxu0 %v4928_v17  ;;  %3512 = vmatprep.mubr.bf16.mxu0 %v5125_v0  ;;  %v4943_v17 = vld [vmem:[#allocation5 + $0x8c] ss:$16 sps:$4 sm:$0xff]  }
0x150e   :  { %3482 = vmatprep.subr.bf16.mxu0 %v4929_v45  ;;  %v4944_v45 = vld [vmem:[#allocation5 + $0x88] ss:$16 sps:$4 sm:$0xff]  }
0x1511   :  { %3483 = vmatpush1.bf16.msra.mxu0 %v4930_v41  ;;  %v4946_v41 = vld [vmem:[#allocation5 + $0xa8] ss:$16 sps:$4 sm:$0xff]  }
0x1512   :  { %3484 = vmatprep.subr.bf16.mxu0 %v4931_v10  ;;  %v4948_v10 = vld [vmem:[#allocation5 + $0xc8] ss:$16 sps:$4 sm:$0xff]  }
0x1515   :  { %3485 = vmatpush1.bf16.msra.mxu0 %v4932_v46  ;;  %v4950_v46 = vld [vmem:[#allocation5 + $0xe8] ss:$16 sps:$4 sm:$0xff]  }
0x1516   :  { %3486 = vmatprep.subr.bf16.mxu0 %v4933_v42 }
0x1519   :  { %3487 = vmatpush1.bf16.msra.mxu0 %v4934_v58 }
0x151a   :  { %3488 = vmatprep.subr.bf16.mxu0 %v4935_v47 }
0x151d   :  { %3489 = vmatpush1.bf16.msra.mxu0 %v6457_v53 }
0x151e   :  { %3490 = vmatprep.subr.bf16.mxu0 %v6460_v26 }
0x1521   :  { %3491 = vmatpush1.bf16.msra.mxu0 %v6463_v62 }
0x1522   :  { %3492 = vmatprep.subr.bf16.mxu0 %v6466_v52  ;;  %v3321_v52 = vld [vmem:[#allocation2 + $0x268] sm:$0xff] }
0x1525   :  { %3493 = vmatpush1.bf16.msra.mxu0 %v6469_v3 }
0x1526   :  { %3494 = vmatprep.subr.bf16.mxu0 %v6472_v43 }
0x1529   :  { %3495 = vmatpush1.bf16.msra.mxu0 %v6475_v51 }
0x152a   :  { %4373 = vmatprep.subr.bf16.mxu0 %v5126_v36 }
0x15bf   :  { %v3313_v8 = vpop.f32.mrb[112].mxu0  ;;  %v3358_v48 = vpop.f32.mrb[112].mxu1 }
0x15c0   :  { %v3314_v9 = vadd.f32 %v6555_v1, %v3313_v8  ;;  %v4351_v49 = vpop.f32.mrb[113].mxu0  ;;  %v3360_v24 = vpop.f32.mrb[113].mxu1  ;;  %v3406_v14 = vadd.f32 %v3358_v48, %v3320_v29 }
0x15c1   :  { %v3316_v53 = vpop.f32.mrb[114].mxu0  ;;  %v3362_v26 = vpop.f32.mrb[114].mxu1  ;;  %v3407_v3 = vadd.f32 %v3360_v24, %v3321_v52  ;;  %v3477_v24 = vld [vmem:[#allocation2 + $0x288] sm:$0xff] }
0x15c2   :  { %3319 = vst [vmem:[#allocation10 + $0x90] sm:$0xff] %v3314_v9  ;;  %v4352_v62 = vpop.f32.mrb[115].mxu0  ;;  %v3363_v11 = vpop.f32.mrb[115].mxu1  ;;  %v3778_v13 = vmul.f32 -1.442695, %v3406_v14  ;;  %v3479_v14 = vld [vmem:[#allocation2 + $0x298] sm:$0xff] }
0x15c3   :  { %v3779_v43 = vmul.f32 -1.442695, %v3407_v3  ;;  %v3478_v3 = vld [vmem:[#allocation2 + $0x290] sm:$0xff] }
0x15c5   :  { %4771 = vpow2.f32 %v3779_v43 }
0x15c6   :  { %4773 = vpow2.f32 %v3778_v13 }
0x15cf   :  { %v4772_v51 = vpop.eup %4771 }
0x15d0   :  { %v4774_v27 = vpop.eup %4773  ;;  %v3419_v54 = vadd.f32 1.0, %v4772_v51 }
0x15d1   :  { %v3413_v35 = vadd.f32 1.0, %v4774_v27 }
0x15d2   :  { %4775 = vrcp.f32 %v3419_v54 }
0x15d3   :  { %4777 = vrcp.f32 %v3413_v35 }
0x15dc   :  { %v4776_v59 = vpop.eup %4775 }
0x15dd   :  { %v4778_v16 = vpop.eup %4777  ;;  %v3429_v61 = vmul.f32 %v4776_v59, %v6673_v34  ;;  %v4938_v34 = vld [vmem:[#allocation5 + $0x28] ss:$16 sps:$4 sm:$0xff]  }
0x15df   :  { %v3399_v6 = vpop.f32.mrb[116].mxu0 }
0x15e0   :  { %v3408_v63 = vadd.f32 %v3399_v6, %v3322_v12  ;;  %v3401_v31 = vpop.f32.mrb[117].mxu0 }
0x15e1   :  { %v3409_v32 = vadd.f32 %v3401_v31, %v3323_v56  ;;  %v3403_v30 = vpop.f32.mrb[118].mxu0 }
0x15e2   :  { %4779 = vtanh.f32 %v3408_v63  ;;  %v3404_v4 = vpop.f32.mrb[119].mxu0 }
0x15e3   :  { %v3780_v21 = vmul.f32 -1.442695, %v3409_v32 }
0x15e5   :  { %4781 = vpow2.f32 %v3780_v21 }
0x15ec   :  { %v4780_v7 = vpop.eup %4779 }
0x15ed   :  { %v3430_v44 = vmul.f32 %v4780_v7, %v4778_v16 }
0x15ef   :  { %v4782_v23 = vpop.eup %4781  ;;  %v6720_v15 = vadd.f32 %v3430_v44, %v3429_v61 }
0x15f0   :  { %v3426_v25 = vadd.f32 1.0, %v4782_v23 }
0x15f1   :  { %4783 = vtanh.f32 %v6720_v15 }
0x15f2   :  { %4785 = vrcp.f32 %v3426_v25 }
0x15fb   :  { %v4784_v38 = vpop.eup %4783 }
0x15fc   :  { %v4786_v2 = vpop.eup %4785 }
0x15fd   :  { %v3433_v39 = vmul.f32 %v4786_v2, %v4784_v38 }
0x15ff   :  { %v3434_v18 = vpack.c.bf16 %v3433_v39, %v3433_v39 }
0x1601   :  { %4370 = vmatmul.mubr.bf16.vlgmr.msra.gmra.mrb[116].mxu1 %v3434_v18  ;;  %3513 = vmatmul.mubr.bf16.vlgmr.msra.gmra.mrb[120].mxu0 %v3434_v18 }
0x1602   :  { %3522 = vmatpush1.bf16.msra.mxu1 %v4936_v60  ;;  %3553 = vmatprep.mubr.bf16.mxu1 %v5125_v0  ;;  %v4941_v0 = vld [vmem:[#allocation5 + $0x6c] ss:$16 sps:$4 sm:$0xff]  }
0x1603   :  { %3523 = vmatprep.subr.bf16.mxu1 %v4937_v40  ;;  %4374 = vmatpush3.bf16.msra.mxu0 %v6487_v5  ;;  %v4942_v5 = vld [vmem:[#allocation5 + $0x68] ss:$16 sps:$4 sm:$0xff]  }
0x1604   :  { %4375 = vmatprep.subr.bf16.mxu0 %v5126_v36  ;;  %4389 = vmatprep.mubr.msk.bf16.mxu0 %vm5127_vm0, %v5126_v36 }
0x1606   :  { %3524 = vmatpush1.bf16.msra.mxu1 %v4938_v34 }
0x1607   :  { %3525 = vmatprep.subr.bf16.mxu1 %v4939_v37  ;;  %4376 = vmatpush3.bf16.msra.mxu0 %v6495_v55  ;;  %v4945_v55 = vld [vmem:[#allocation5 + $0xac] ss:$16 sps:$4 sm:$0xff]  }
0x1608   :  { %4377 = vmatprep.subr.bf16.mxu0 %v5126_v36 }
0x160a   :  { %3526 = vmatpush1.bf16.msra.mxu1 %v4940_v28 }
0x160b   :  { %3527 = vmatprep.subr.bf16.mxu1 %v4941_v0  ;;  %4378 = vmatpush3.bf16.msra.mxu0 %v6501_v19  ;;  %v4947_v19 = vld [vmem:[#allocation5 + $0xcc] ss:$16 sps:$4 sm:$0xff]  }
0x160c   :  { %4379 = vmatprep.subr.bf16.mxu0 %v5126_v36 }
0x160e   :  { %3528 = vmatpush1.bf16.msra.mxu1 %v4942_v5 }
0x160f   :  { %3529 = vmatprep.subr.bf16.mxu1 %v4943_v17  ;;  %4380 = vmatpush3.bf16.msra.mxu0 %v6507_v20  ;;  %v4949_v20 = vld [vmem:[#allocation5 + $0xec] ss:$16 sps:$4 sm:$0xff]  }
0x1610   :  { %4381 = vmatprep.subr.bf16.mxu0 %v5126_v36 }
0x1612   :  { %3530 = vmatpush1.bf16.msra.mxu1 %v4944_v45 }
0x1613   :  { %3531 = vmatprep.subr.bf16.mxu1 %v4945_v55  ;;  %4382 = vmatpush3.bf16.msra.mxu0 %v6513_v50 }
0x1614   :  { %4383 = vmatprep.subr.bf16.mxu0 %v5126_v36 }
0x1616   :  { %3532 = vmatpush1.bf16.msra.mxu1 %v4946_v41 }
0x1617   :  { %3533 = vmatprep.subr.bf16.mxu1 %v4947_v19  ;;  %4384 = vmatpush3.bf16.msra.mxu0 %v6519_v33 }
0x1618   :  { %4385 = vmatprep.subr.bf16.mxu0 %v5126_v36 }
0x161a   :  { %3534 = vmatpush1.bf16.msra.mxu1 %v4948_v10 }
0x161b   :  { %3535 = vmatprep.subr.bf16.mxu1 %v4949_v20  ;;  %4386 = vmatpush3.bf16.msra.mxu0 %v6525_v22  ;;  %v3476_v22 = vld [vmem:[#allocation2 + $0x280] sm:$0xff] }
0x161c   :  { %4387 = vmatprep.subr.bf16.mxu0 %v5126_v36 }
0x161e   :  { %3536 = vmatpush1.bf16.msra.mxu1 %v4950_v46 }
0x161f   :  { %4388 = vmatpush3.bf16.msra.mxu0 %v6531_v57 }
0x1621   :  { %3554 = vmatmul.mubr.bf16.vlgmr.msra.gmra.mrb[120].mxu1 %v3434_v18 }
0x16d4   :  { %v3469_v50 = vpop.f32.mrb[116].mxu1  ;;  %v3514_v42 = vpop.f32.mrb[120].mxu0 }
0x16d5   :  { %v3470_v58 = vadd.f32 %v6555_v1, %v3469_v50  ;;  %v4371_v33 = vpop.f32.mrb[117].mxu1  ;;  %v3516_v47 = vpop.f32.mrb[121].mxu0  ;;  %v3562_v36 = vadd.f32 %v3514_v42, %v3476_v22 }
0x16d6   :  { %v3472_v8 = vpop.f32.mrb[118].mxu1  ;;  %v3518_v48 = vpop.f32.mrb[122].mxu0  ;;  %v3563_v53 = vadd.f32 %v3516_v47, %v3477_v24 }
0x16d7   :  { %3475 = vst [vmem:[#allocation10 + $0x98] sm:$0xff] %v3470_v58  ;;  %v4372_v9 = vpop.f32.mrb[119].mxu1  ;;  %v3519_v49 = vpop.f32.mrb[123].mxu0  ;;  %v3781_v62 = vmul.f32 -1.442695, %v3562_v36 }
0x16d8   :  { %v3782_v26 = vmul.f32 -1.442695, %v3563_v53 }
0x16da   :  { %4787 = vpow2.f32 %v3782_v26 }
0x16db   :  { %4789 = vpow2.f32 %v3781_v62 }
0x16e4   :  { %v4788_v57 = vpop.eup %4787 }
0x16e5   :  { %v4790_v11 = vpop.eup %4789  ;;  %v3575_v52 = vadd.f32 1.0, %v4788_v57 }
0x16e6   :  { %v3569_v29 = vadd.f32 1.0, %v4790_v11 }
0x16e7   :  { %4791 = vrcp.f32 %v3575_v52 }
0x16e8   :  { %4793 = vrcp.f32 %v3569_v29 }
0x16f1   :  { %v4792_v56 = vpop.eup %4791 }
0x16f2   :  { %v4794_v6 = vpop.eup %4793  ;;  %v3585_v31 = vmul.f32 %v4792_v56, %v6720_v15 }
0x16f4   :  { %v3555_v43 = vpop.f32.mrb[120].mxu1 }
0x16f5   :  { %v3564_v13 = vadd.f32 %v3555_v43, %v3478_v3  ;;  %v3557_v51 = vpop.f32.mrb[121].mxu1 }
0x16f6   :  { %v3565_v27 = vadd.f32 %v3557_v51, %v3479_v14  ;;  %v3559_v54 = vpop.f32.mrb[122].mxu1 }
0x16f7   :  { %4795 = vtanh.f32 %v3564_v13  ;;  %v3560_v35 = vpop.f32.mrb[123].mxu1 }
0x16f8   :  { %v3783_v12 = vmul.f32 -1.442695, %v3565_v27 }
0x16fa   :  { %4797 = vpow2.f32 %v3783_v12 }
0x1701   :  { %v4796_v63 = vpop.eup %4795 }
0x1702   :  { %v3586_v32 = vmul.f32 %v4796_v63, %v4794_v6 }
0x1704   :  { %v4798_v30 = vpop.eup %4797  ;;  %v3587_v4 = vadd.f32 %v3586_v32, %v3585_v31 }
0x1705   :  { %v3582_v21 = vadd.f32 1.0, %v4798_v30 }
0x1706   :  { %4799 = vtanh.f32 %v3587_v4  ;;  %3633 = vst [vmem:[#allocation13] sm:$0xff] %v3587_v4 }
0x1707   :  { %4801 = vrcp.f32 %v3582_v21 }
0x1710   :  { %v4800_v59 = vpop.eup %4799 }
0x1711   :  { %v4802_v16 = vpop.eup %4801 }
0x1712   :  { %v3589_v7 = vmul.f32 %v4802_v16, %v4800_v59 }
0x1714   :  { %v3590_v61 = vpack.c.bf16 %v3589_v7, %v3589_v7  ;;  %3632 = vst [vmem:[#allocation11] sm:$0xff] %v3589_v7 }
0x1716   :  { %4390 = vmatmul.mubr.bf16.vlgmr.msra.gmra.mrb[124].mxu0 %v3590_v61 }
0x1717   :  { %5050 = shalt.err (!%p5047_p8)
}
0x1718   :  { %s5051_s22 = scalar_lea.hbm %s6787_s7, 128 }
0x1719   :  { %p5052_p9 = scmp.ne.s32.totalorder %s6787_s7, %s5051_s22  ;;  %p5055_p10 = scmp.lt.u32.totalorder %s5051_s22, %s6787_s7 }
0x171b   :  { %p5057_p11 = pnand %p5055_p10, %p5052_p9 }
0x171d   :  { %5060 = shalt.err (!%p5057_p11)
}
0x171e   :  { %3655 = dma.vmem_to_hbm [thread:$0]  %s3653_s19, 128, %s6787_s7, [#allocation12]  }
0x171f   :  { %s5129_s1 = smov [#allocation13]  }
0x1720   :  { %s3662_s28 = sshll.u32 %s5129_s1, 4  ;;  %s3663_s28 = int_to_ptr.vmem [resolvable:$true] %s3662_s28 }
0x1721   :  { %s5061_s2 = scalar_lea.vmem %s3663_s28, 128  ;;  %p5066_p13 = scmp.lt.s32.totalorder %s3663_s28, %s3663_s28 }
0x1722   :  { %p5062_p12 = scmp.ne.s32.totalorder %s3663_s28, %s5061_s2  ;;  %p5067_p0 = scmp.lt.s32.totalorder %s5061_s2, %s5061_s2 }
0x1724   :  { %p5068_p1 = por %p5067_p0, %p5066_p13 }
0x1726   :  { %p5069_p2 = pnand %p5068_p1, %p5062_p12 }
0x1728   :  { %5072 = shalt.err (!%p5069_p2)
}
0x1729   :  { %s5073_s10 = scalar_lea.hbm %s6788_s8, 128 }
0x172a   :  { %p5074_p3 = scmp.ne.s32.totalorder %s6788_s8, %s5073_s10  ;;  %p5077_p4 = scmp.lt.u32.totalorder %s5073_s10, %s6788_s8 }
0x172c   :  { %p5079_p5 = pnand %p5077_p4, %p5074_p3 }
0x172e   :  { %5082 = shalt.err (!%p5079_p5)
}
0x172f   :  { %3665 = dma.vmem_to_hbm [thread:$0]  %s3663_s28, 128, %s6788_s8, [#allocation12]  }
0x1730   :  { %s5130_s14 = smov [#allocation10]  }
0x1731   :  { %s3639_s15 = sshll.u32 %s5130_s14, 4  ;;  %s3640_s15 = int_to_ptr.vmem [resolvable:$true] %s3639_s15 }
0x1732   :  { %s5083_s16 = scalar_lea.vmem %s3640_s15, 2688  ;;  %p5088_p7 = scmp.lt.s32.totalorder %s3640_s15, %s3640_s15 }
0x1733   :  { %p5084_p6 = scmp.ne.s32.totalorder %s3640_s15, %s5083_s16  ;;  %p5089_p8 = scmp.lt.s32.totalorder %s5083_s16, %s5083_s16 }
0x1735   :  { %p5090_p9 = por %p5089_p8, %p5088_p7 }
0x1737   :  { %p5091_p10 = pnand %p5090_p9, %p5084_p6 }
0x17e9   :  { %v3625_v44 = vpop.f32.mrb[124].mxu0 }
0x17ea   :  { %v3626_v23 = vadd.f32 %v6555_v1, %v3625_v44  ;;  %v4391_v15 = vpop.f32.mrb[125].mxu0 }
0x17eb   :  { %v3628_v25 = vpop.f32.mrb[126].mxu0 }
0x17ec   :  { %3631 = vst [vmem:[#allocation10 + $0xa0] sm:$0xff] %v3626_v23  ;;  %v4392_v38 = vpop.f32.mrb[127].mxu0 }
0x17ed   :  { %5094 = shalt.err (!%p5091_p10)
}
0x17ee   :  { %s5095_s8 = scalar_lea.hbm %s6786_s6, 2688 }
0x17ef   :  { %p5096_p11 = scmp.ne.s32.totalorder %s6786_s6, %s5095_s8  ;;  %p5099_p12 = scmp.lt.u32.totalorder %s5095_s8, %s6786_s6 }
0x17f1   :  { %p5101_p13 = pnand %p5099_p12, %p5096_p11 }
0x17f3   :  { %5104 = shalt.err (!%p5101_p13)
}
0x17f4   :  { %s5131_s20 = smov 128   ;;  %s5132_s22 = smov 8  }
0x17f5   :  { %3645 = dma.vmem_to_hbm [thread:$0]  %s3640_s15, 2688, %s6786_s6, [#allocation4], %s5131_s20, %s5131_s20, %s5132_s22  }
0x17f6   :  { %5111 = dma.done.wait [#allocation4], 2688  }
0x17f7   :  { %5112 = vsyncadd [#allocation4], 4294964608 }
0x17f8   :  { %5113 = dma.done.wait [#allocation12], 256  }
0x17f9   :  { %5114 = vsyncadd [#allocation12], 4294967040 }
0x17fa   :  { %3675 = vsyncpa [#allocation3], 1 }
0x17fb   :  { %3676 = vsyncpa [#allocation6], 1 }
0x17fc   :  { %3677 = vsyncpa [#allocation9], 1 }
0x17fd   :  { %3678 = vsyncpa [#allocation4], 1 }
0x17fe   :  { %3679 = vsyncpa [#allocation12], 1 }

</bundles_post_ra>
